<compile_context>
chip_gen: v7x
topology: tpu7x:2x2x1
jax: 0.10.0
libtpu: 0.0.40
codegen_flags: <defaults>
</compile_context>

<pallas_src>
import functools
import math

import jax
import jax.numpy as jnp
from jax import lax
from jax.experimental import pallas as pl
from jax.experimental.pallas import tpu as pltpu

_VMEM_LIMIT = 64 * 1024 * 1024  # explicit scoped-VMEM budget (fits v5e/v6e/v7x)


def _pick_tile(dim, target, align):
    """Largest aligned block size <= target that exactly divides dim, else the full dim."""
    if dim <= target:
        return dim
    t = (target // align) * align
    while t >= align:
        if dim % t == 0:
            return t
        t -= align
    return dim


# ---------------------------------------------------------------------------
# Tiled linear (matmul + bias [+ relu]); K-loop + f32 accumulator only if needed
# ---------------------------------------------------------------------------

def _linear_acc_kernel(x_ref, w_ref, b_ref, o_ref, acc_ref, *, act):
    k = pl.program_id(2)

    @pl.when(k == 0)
    def _():
        acc_ref[...] = jnp.zeros_like(acc_ref)

    w = w_ref[...]
    acc_ref[...] += jnp.dot(x_ref[...].astype(w.dtype), w,
                            preferred_element_type=jnp.float32)

    @pl.when(k == pl.num_programs(2) - 1)
    def _():
        out = acc_ref[...] + b_ref[...].astype(jnp.float32)
        if act == "relu":
            out = jnp.maximum(out, 0.0)
        o_ref[...] = out.astype(o_ref.dtype)


def _linear_1k_kernel(x_ref, w_ref, b_ref, o_ref, *, act):
    # Single K step: no scratch accumulator, no zero-init, write result directly.
    w = w_ref[...]
    out = jnp.dot(x_ref[...].astype(w.dtype), w, preferred_element_type=jnp.float32)
    out = out + b_ref[...].astype(jnp.float32)
    if act == "relu":
        out = jnp.maximum(out, 0.0)
    o_ref[...] = out.astype(o_ref.dtype)


def linear(x, w, b, act=None, out_dtype=jnp.bfloat16, tm=512, tn=512, tk=1024):
    M, K = x.shape
    K2, N = w.shape
    assert K == K2
    tm = _pick_tile(M, tm, 16)     # 16-row sublane alignment (bf16 packing)
    tn = _pick_tile(N, tn, 128)
    tk = _pick_tile(K, tk, 128)
    nk = K // tk
    if nk == 1:
        return pl.pallas_call(
            functools.partial(_linear_1k_kernel, act=act),
            out_shape=jax.ShapeDtypeStruct((M, N), out_dtype),
            grid=(M // tm, N // tn),
            in_specs=[
                pl.BlockSpec((tm, K), lambda i, j: (i, 0)),
                pl.BlockSpec((K, tn), lambda i, j: (0, j)),
                pl.BlockSpec((1, tn), lambda i, j: (0, j)),
            ],
            out_specs=pl.BlockSpec((tm, tn), lambda i, j: (i, j)),
            compiler_params=pltpu.CompilerParams(
                dimension_semantics=("parallel", "parallel"),
                vmem_limit_bytes=_VMEM_LIMIT,
            ),
        )(x, w, b.reshape(1, N))

    return pl.pallas_call(
        functools.partial(_linear_acc_kernel, act=act),
        out_shape=jax.ShapeDtypeStruct((M, N), out_dtype),
        grid=(M // tm, N // tn, nk),
        in_specs=[
            pl.BlockSpec((tm, tk), lambda i, j, k: (i, k)),
            pl.BlockSpec((tk, tn), lambda i, j, k: (k, j)),
            pl.BlockSpec((1, tn), lambda i, j, k: (0, j)),
        ],
        out_specs=pl.BlockSpec((tm, tn), lambda i, j, k: (i, j)),
        scratch_shapes=[pltpu.VMEM((tm, tn), jnp.float32)],
        compiler_params=pltpu.CompilerParams(
            dimension_semantics=("parallel", "parallel", "arbitrary"),
            vmem_limit_bytes=_VMEM_LIMIT,
        ),
    )(x, w, b.reshape(1, N))


# ---------------------------------------------------------------------------
# Fused attention sub-layer (q-tiled): SDPA -> concat-heads out proj -> add + LN
# ---------------------------------------------------------------------------

def _attn_kernel(x_ref, qr_ref, kv_ref, wo_ref, bo_ref, g_ref, bln_ref, o_ref,
                 *, nhead, eps):
    H = x_ref.shape[-1]
    dh = H // nhead
    scale = 1.0 / math.sqrt(dh)

    qr = qr_ref[...]                              # (tq, 3H) bf16 (only Q columns used)
    kv = kv_ref[...]                              # (T,  3H) bf16 (K and V columns used)

    ctx_heads = []
    for hd in range(nhead):                       # static unroll; per-head tiles are small (tq x T)
        q_h = qr[:, hd * dh:(hd + 1) * dh]
        k_h = kv[:, H + hd * dh:H + (hd + 1) * dh]
        v_h = kv[:, 2 * H + hd * dh:2 * H + (hd + 1) * dh]
        # bf16 MXU operands, f32 accumulation.
        s = jnp.dot(q_h, k_h.T, preferred_element_type=jnp.float32) * scale   # (tq, T) f32
        m = jnp.max(s, axis=-1, keepdims=True)
        p = jnp.exp(s - m)
        p = p * pl.reciprocal(jnp.sum(p, axis=-1, keepdims=True), approx=True)
        ctx_heads.append(
            jnp.dot(p.astype(kv.dtype), v_h,
                    preferred_element_type=jnp.float32).astype(qr.dtype))     # (tq, dh) bf16
    ctx = jnp.concatenate(ctx_heads, axis=-1)     # (tq, H) bf16 — one full-K out projection
    y = jnp.dot(ctx, wo_ref[...], preferred_element_type=jnp.float32)
    y = y + bo_ref[...].astype(jnp.float32)

    h = x_ref[...].astype(jnp.float32) + y        # post-norm residual
    mean = jnp.mean(h, axis=-1, keepdims=True)
    var = jnp.mean((h - mean) ** 2, axis=-1, keepdims=True)
    nrm = (h - mean) * lax.rsqrt(var + eps)
    o_ref[...] = (nrm * g_ref[...].astype(jnp.float32)
                  + bln_ref[...].astype(jnp.float32)).astype(o_ref.dtype)


def attention_block(h, qkv, wo, bo, gamma, beta, nhead, eps=1e-5, tq=128):
    """h: (B, T, H) residual input; qkv: (B, T, 3H) pre-computed projection."""
    B, T, H = h.shape
    tq = _pick_tile(T, tq, 16)
    return pl.pallas_call(
        functools.partial(_attn_kernel, nhead=nhead, eps=eps),
        out_shape=jax.ShapeDtypeStruct((B, T, H), h.dtype),
        grid=(B, T // tq),
        in_specs=[
            pl.BlockSpec((None, tq, H), lambda b, qi: (b, qi, 0)),      # residual rows
            pl.BlockSpec((None, tq, 3 * H), lambda b, qi: (b, qi, 0)),  # Q rows of qkv
            pl.BlockSpec((None, T, 3 * H), lambda b, qi: (b, 0, 0)),    # full K/V rows (resident per b)
            pl.BlockSpec((H, H), lambda b, qi: (0, 0)),
            pl.BlockSpec((1, H), lambda b, qi: (0, 0)),
            pl.BlockSpec((1, H), lambda b, qi: (0, 0)),
            pl.BlockSpec((1, H), lambda b, qi: (0, 0)),
        ],
        out_specs=pl.BlockSpec((None, tq, H), lambda b, qi: (b, qi, 0)),
        compiler_params=pltpu.CompilerParams(
            dimension_semantics=("parallel", "parallel"),
            vmem_limit_bytes=_VMEM_LIMIT,
        ),
    )(h, qkv, qkv, wo, bo.reshape(1, H), gamma.reshape(1, H), beta.reshape(1, H))


# ---------------------------------------------------------------------------
# Fused feed-forward: relu(x@W1+b1)@W2+b2, residual + LayerNorm epilogue
# ---------------------------------------------------------------------------

def _ffn_ln_kernel(x_ref, w1_ref, b1_ref, w2_ref, b2_ref, g_ref, bln_ref, o_ref, *, eps):
    x = x_ref[...]                                           # (tm, H) bf16
    w1 = w1_ref[...]                                         # (H, FF) bf16
    w2 = w2_ref[...]                                         # (FF, H) bf16
    h1 = jnp.dot(x.astype(w1.dtype), w1, preferred_element_type=jnp.float32)
    h1 = jnp.maximum(h1 + b1_ref[...].astype(jnp.float32), 0.0)      # (tm, FF) stays in VMEM
    y = jnp.dot(h1.astype(w2.dtype), w2, preferred_element_type=jnp.float32)
    y = y + b2_ref[...].astype(jnp.float32)

    h = x.astype(jnp.float32) + y                            # post-norm residual
    mean = jnp.mean(h, axis=-1, keepdims=True)
    var = jnp.mean((h - mean) ** 2, axis=-1, keepdims=True)
    nrm = (h - mean) * lax.rsqrt(var + eps)
    o_ref[...] = (nrm * g_ref[...].astype(jnp.float32)
                  + bln_ref[...].astype(jnp.float32)).astype(o_ref.dtype)


def ffn_layernorm(x, w1, b1, w2, b2, gamma, beta, eps=1e-5, tm=512):
    M, H = x.shape
    FF = w1.shape[1]
    tm = _pick_tile(M, tm, 16)
    return pl.pallas_call(
        functools.partial(_ffn_ln_kernel, eps=eps),
        out_shape=jax.ShapeDtypeStruct((M, H), x.dtype),
        grid=(M // tm,),
        in_specs=[
            pl.BlockSpec((tm, H), lambda i: (i, 0)),
            pl.BlockSpec((H, FF), lambda i: (0, 0)),
            pl.BlockSpec((1, FF), lambda i: (0, 0)),
            pl.BlockSpec((FF, H), lambda i: (0, 0)),
            pl.BlockSpec((1, H), lambda i: (0, 0)),
            pl.BlockSpec((1, H), lambda i: (0, 0)),
            pl.BlockSpec((1, H), lambda i: (0, 0)),
        ],
        out_specs=pl.BlockSpec((tm, H), lambda i: (i, 0)),
        compiler_params=pltpu.CompilerParams(
            dimension_semantics=("parallel",),
            vmem_limit_bytes=_VMEM_LIMIT,
        ),
    )(x, w1, b1.reshape(1, FF), w2, b2.reshape(1, H),
      gamma.reshape(1, H), beta.reshape(1, H))


# ---------------------------------------------------------------------------
# Parameter construction (deterministic, matches nn.Module shapes)
# ---------------------------------------------------------------------------

def init_params(key, input_size, hidden_size, num_layers, nhead, n_classes,
                dim_feedforward=2048, w_dtype=jnp.bfloat16):
    H, FF = hidden_size, dim_feedforward
    assert H % nhead == 0

    def w(k, shape, scale=0.02):
        return (scale * jax.random.normal(k, shape)).astype(w_dtype)

    keys = jax.random.split(key, 2 + 4 * num_layers)
    ki = iter(keys)

    params = {
        # Conv1d(input_size, hidden_size, 1): weight (H, C, 1) stored transposed as (C, H).
        "conv_w": w(next(ki), (input_size, H)),
        "conv_b": jnp.zeros((H,), jnp.float32),
        # Final Linear(hidden_size, n_classes): weight (n_classes, H) stored as (H, n_classes).
        "fc_w": w(next(ki), (H, n_classes)),
        "fc_b": jnp.zeros((n_classes,), jnp.float32),
        "layers": [],
    }
    for _ in range(num_layers):
        params["layers"].append({
            "in_proj_w": w(next(ki), (H, 3 * H)),    # MHA in_proj (3H,H) transposed
            "in_proj_b": jnp.zeros((3 * H,), jnp.float32),
            "out_proj_w": w(next(ki), (H, H)),       # MHA out_proj (H,H) transposed
            "out_proj_b": jnp.zeros((H,), jnp.float32),
            "lin1_w": w(next(ki), (H, FF)),          # linear1 (FF,H) transposed
            "lin1_b": jnp.zeros((FF,), jnp.float32),
            "lin2_w": w(next(ki), (FF, H)),          # linear2 (H,FF) transposed
            "lin2_b": jnp.zeros((H,), jnp.float32),
            "ln1_g": jnp.ones((H,), jnp.float32),
            "ln1_b": jnp.zeros((H,), jnp.float32),
            "ln2_g": jnp.ones((H,), jnp.float32),
            "ln2_b": jnp.zeros((H,), jnp.float32),
        })
    return params


# ---------------------------------------------------------------------------
# Forward pass (bf16 inter-kernel activations; only free reshapes between kernels)
# ---------------------------------------------------------------------------

def transformer_decoder_forward(params, x, nhead):
    """x: (B, C, T) float32  ->  (B, T, n_classes) float32."""
    B, C, T = x.shape
    H = params["conv_w"].shape[1]

    # Conv1d(kernel=1) == pointwise linear over channels (tokens as rows).
    x_rows = jnp.transpose(x, (0, 2, 1)).reshape(B * T, C)            # (B*T, C) f32
    h = linear(x_rows, params["conv_w"], params["conv_b"])            # (B*T, H) bf16

    for layer in params["layers"]:
        # --- QKV projection (tiled matmul, bf16 out) ---
        qkv = linear(h, layer["in_proj_w"], layer["in_proj_b"])       # (B*T, 3H) bf16
        # --- fused self-attention sub-layer (post-norm, eval mode), q-tiled ---
        h = attention_block(h.reshape(B, T, H), qkv.reshape(B, T, 3 * H),
                            layer["out_proj_w"], layer["out_proj_b"],
                            layer["ln1_g"], layer["ln1_b"],
                            nhead).reshape(B * T, H)
        # --- fused feed-forward sub-layer: norm2(x + lin2(relu(lin1(x)))) ---
        h = ffn_layernorm(h,
                          layer["lin1_w"], layer["lin1_b"],
                          layer["lin2_w"], layer["lin2_b"],
                          layer["ln2_g"], layer["ln2_b"])

    # Final classifier: pad the output lane dim to 128 (unmasked stores), slice back.
    fc_w, fc_b = params["fc_w"], params["fc_b"]
    n_classes = fc_w.shape[1]
    n_pad = max(128, ((n_classes + 127) // 128) * 128)
    if n_pad != n_classes:
        fc_w = jnp.pad(fc_w, ((0, 0), (0, n_pad - n_classes)))
        fc_b = jnp.pad(fc_b, (0, n_pad - n_classes))
    out = linear(h, fc_w, fc_b, out_dtype=jnp.float32)                # (B*T, n_pad) f32
    return out[:, :n_classes].reshape(B, T, n_classes)


# ---------------------------------------------------------------------------

if __name__ == "__main__":
    # Small shapes consistent with the module: (batch, n_channels, n_timesteps).
    B, C, T = 2, 4, 16
    HIDDEN = 32
    NUM_LAYERS = 2
    NHEAD = 4
    N_CLASSES = 5
    DIM_FF = 2048               # nn.TransformerEncoderLayer default

    key = jax.random.PRNGKey(0)
    kp, kx = jax.random.split(key)
    params = init_params(kp, C, HIDDEN, NUM_LAYERS, NHEAD, N_CLASSES, DIM_FF)
    x = jax.random.normal(kx, (B, C, T), dtype=jnp.float32)

    fwd = jax.jit(transformer_decoder_forward, static_argnums=(2,))
    out = fwd(params, x, NHEAD)
    out = jax.block_until_ready(out)
    assert out.shape == (B, T, N_CLASSES), out.shape
    assert bool(jnp.all(jnp.isfinite(out)))
    print("KERNEL_OK")
</pallas_src>

<mosaic_0001>
module attributes {stable_mosaic.version = 11 : i64} {
  func.func @_linear_1k_kernel(%arg0: i32, %arg1: i32, %arg2: memref<32x4xf32, #tpu.memory_space<vmem>>, %arg3: memref<4x32xbf16, #tpu.memory_space<vmem>>, %arg4: memref<1x32xf32, #tpu.memory_space<vmem>>, %arg5: memref<32x32xbf16, #tpu.memory_space<vmem>>) attributes {dimension_semantics = [#tpu.dimension_semantics<parallel>, #tpu.dimension_semantics<parallel>], iteration_bounds = array<i64: 1, 1>, scalar_prefetch = 0 : i64, scratch_operands = 0 : i64, tpu.core_type = #tpu.core_type<tc>, window_params = [{transform_indices = @transform_0, window_bounds = array<i64: 32, 4>}, {transform_indices = @transform_1, window_bounds = array<i64: 4, 32>}, {transform_indices = @transform_2, window_bounds = array<i64: 1, 32>}, {transform_indices = @transform_3, window_bounds = array<i64: 32, 32>}]} {
    %c0 = arith.constant 0 : index
    %c0_0 = arith.constant 0 : index
    %0 = vector.load %arg3[%c0, %c0_0] : memref<4x32xbf16, #tpu.memory_space<vmem>>, vector<4x32xbf16>
    %c0_1 = arith.constant 0 : index
    %c0_2 = arith.constant 0 : index
    %1 = vector.load %arg2[%c0_1, %c0_2] : memref<32x4xf32, #tpu.memory_space<vmem>>, vector<32x4xf32>
    %2 = arith.truncf %1 : vector<32x4xf32> to vector<32x4xbf16>
    %cst = arith.constant dense<0.000000e+00> : vector<32x32xf32>
    %3 = tpu.matmul %2, %0, %cst {dimension_numbers = #tpu.dot_dimension_numbers<[1], [0], [0], [1], [0, 0, 1, 1], [], []>} : vector<32x4xbf16>, vector<4x32xbf16>, vector<32x32xf32> -> vector<32x32xf32>
    %c0_3 = arith.constant 0 : index
    %c0_4 = arith.constant 0 : index
    %4 = vector.load %arg4[%c0_3, %c0_4] : memref<1x32xf32, #tpu.memory_space<vmem>>, vector<1x32xf32>
    %5 = vector.broadcast %4 : vector<1x32xf32> to vector<32x32xf32>
    %6 = arith.addf %3, %5 : vector<32x32xf32>
    %7 = arith.truncf %6 : vector<32x32xf32> to vector<32x32xbf16>
    %c0_5 = arith.constant 0 : index
    %c0_6 = arith.constant 0 : index
    %8 = vector.load %arg5[%c0_5, %c0_6] : memref<32x32xbf16, #tpu.memory_space<vmem>>, vector<32x32xbf16>
    tpu.vector_store %arg5[%c0_5, %c0_6], %7 {strides = array<i32>} : memref<32x32xbf16, #tpu.memory_space<vmem>>, vector<32x32xbf16>,
    return
  }
  func.func @transform_0(%arg0: i32, %arg1: i32) -> (i32, i32) {
    %c0_i32 = arith.constant 0 : i32
    %c0_i32_0 = arith.constant 0 : i32
    return %arg0, %c0_i32 : i32, i32
  }
  func.func @transform_1(%arg0: i32, %arg1: i32) -> (i32, i32) {
    %c0_i32 = arith.constant 0 : i32
    %c0_i32_0 = arith.constant 0 : i32
    return %c0_i32, %arg1 : i32, i32
  }
  func.func @transform_2(%arg0: i32, %arg1: i32) -> (i32, i32) {
    %c0_i32 = arith.constant 0 : i32
    %c0_i32_0 = arith.constant 0 : i32
    return %c0_i32, %arg1 : i32, i32
  }
  func.func @transform_3(%arg0: i32, %arg1: i32) -> (i32, i32) {
    %c0_i32 = arith.constant 0 : i32
    return %arg0, %arg1 : i32, i32
  }
}

module attributes {stable_mosaic.version = 11 : i64} {
  func.func @_linear_1k_kernel(%arg0: i32, %arg1: i32, %arg2: memref<32x32xbf16, #tpu.memory_space<vmem>>, %arg3: memref<32x96xbf16, #tpu.memory_space<vmem>>, %arg4: memref<1x96xf32, #tpu.memory_space<vmem>>, %arg5: memref<32x96xbf16, #tpu.memory_space<vmem>>) attributes {dimension_semantics = [#tpu.dimension_semantics<parallel>, #tpu.dimension_semantics<parallel>], iteration_bounds = array<i64: 1, 1>, scalar_prefetch = 0 : i64, scratch_operands = 0 : i64, tpu.core_type = #tpu.core_type<tc>, window_params = [{transform_indices = @transform_0, window_bounds = array<i64: 32, 32>}, {transform_indices = @transform_1, window_bounds = array<i64: 32, 96>}, {transform_indices = @transform_2, window_bounds = array<i64: 1, 96>}, {transform_indices = @transform_3, window_bounds = array<i64: 32, 96>}]} {
    %c0 = arith.constant 0 : index
    %c0_0 = arith.constant 0 : index
    %0 = vector.load %arg3[%c0, %c0_0] : memref<32x96xbf16, #tpu.memory_space<vmem>>, vector<32x96xbf16>
    %c0_1 = arith.constant 0 : index
    %c0_2 = arith.constant 0 : index
    %1 = vector.load %arg2[%c0_1, %c0_2] : memref<32x32xbf16, #tpu.memory_space<vmem>>, vector<32x32xbf16>
    %cst = arith.constant dense<0.000000e+00> : vector<32x96xf32>
    %2 = tpu.matmul %1, %0, %cst {dimension_numbers = #tpu.dot_dimension_numbers<[1], [0], [0], [1], [0, 0, 1, 1], [], []>} : vector<32x32xbf16>, vector<32x96xbf16>, vector<32x96xf32> -> vector<32x96xf32>
    %c0_3 = arith.constant 0 : index
    %c0_4 = arith.constant 0 : index
    %3 = vector.load %arg4[%c0_3, %c0_4] : memref<1x96xf32, #tpu.memory_space<vmem>>, vector<1x96xf32>
    %4 = vector.broadcast %3 : vector<1x96xf32> to vector<32x96xf32>
    %5 = arith.addf %2, %4 : vector<32x96xf32>
    %6 = arith.truncf %5 : vector<32x96xf32> to vector<32x96xbf16>
    %c0_5 = arith.constant 0 : index
    %c0_6 = arith.constant 0 : index
    %7 = vector.load %arg5[%c0_5, %c0_6] : memref<32x96xbf16, #tpu.memory_space<vmem>>, vector<32x96xbf16>
    tpu.vector_store %arg5[%c0_5, %c0_6], %6 {strides = array<i32>} : memref<32x96xbf16, #tpu.memory_space<vmem>>, vector<32x96xbf16>,
    return
  }
  func.func @transform_0(%arg0: i32, %arg1: i32) -> (i32, i32) {
    %c0_i32 = arith.constant 0 : i32
    %c0_i32_0 = arith.constant 0 : i32
    return %arg0, %c0_i32 : i32, i32
  }
  func.func @transform_1(%arg0: i32, %arg1: i32) -> (i32, i32) {
    %c0_i32 = arith.constant 0 : i32
    %c0_i32_0 = arith.constant 0 : i32
    return %c0_i32, %arg1 : i32, i32
  }
  func.func @transform_2(%arg0: i32, %arg1: i32) -> (i32, i32) {
    %c0_i32 = arith.constant 0 : i32
    %c0_i32_0 = arith.constant 0 : i32
    return %c0_i32, %arg1 : i32, i32
  }
  func.func @transform_3(%arg0: i32, %arg1: i32) -> (i32, i32) {
    %c0_i32 = arith.constant 0 : i32
    return %arg0, %arg1 : i32, i32
  }
}

module attributes {stable_mosaic.version = 11 : i64} {
  func.func @_attn_kernel(%arg0: i32, %arg1: i32, %arg2: memref<1x16x32xbf16, #tpu.memory_space<vmem>>, %arg3: memref<1x16x96xbf16, #tpu.memory_space<vmem>>, %arg4: memref<1x16x96xbf16, #tpu.memory_space<vmem>>, %arg5: memref<32x32xbf16, #tpu.memory_space<vmem>>, %arg6: memref<1x32xf32, #tpu.memory_space<vmem>>, %arg7: memref<1x32xf32, #tpu.memory_space<vmem>>, %arg8: memref<1x32xf32, #tpu.memory_space<vmem>>, %arg9: memref<1x16x32xbf16, #tpu.memory_space<vmem>>) attributes {dimension_semantics = [#tpu.dimension_semantics<parallel>, #tpu.dimension_semantics<parallel>], iteration_bounds = array<i64: 2, 1>, scalar_prefetch = 0 : i64, scratch_operands = 0 : i64, tpu.core_type = #tpu.core_type<tc>, window_params = [{transform_indices = @transform_0, window_bounds = array<i64: 1, 16, 32>}, {transform_indices = @transform_1, window_bounds = array<i64: 1, 16, 96>}, {transform_indices = @transform_2, window_bounds = array<i64: 1, 16, 96>}, {pipeline_mode = #tpu.pipeline_mode<synchronous>, transform_indices = @transform_3, window_bounds = array<i64: 32, 32>}, {pipeline_mode = #tpu.pipeline_mode<synchronous>, transform_indices = @transform_4, window_bounds = array<i64: 1, 32>}, {pipeline_mode = #tpu.pipeline_mode<synchronous>, transform_indices = @transform_5, window_bounds = array<i64: 1, 32>}, {pipeline_mode = #tpu.pipeline_mode<synchronous>, transform_indices = @transform_6, window_bounds = array<i64: 1, 32>}, {transform_indices = @transform_7, window_bounds = array<i64: 1, 16, 32>}]} {
    %c0 = arith.constant 0 : index
    %c0_0 = arith.constant 0 : index
    %c0_1 = arith.constant 0 : index
    %0 = vector.load %arg3[%c0, %c0_0, %c0_1] : memref<1x16x96xbf16, #tpu.memory_space<vmem>>, vector<1x16x96xbf16>
    %1 = vector.shape_cast %0 : vector<1x16x96xbf16> to vector<16x96xbf16>
    %c0_2 = arith.constant 0 : index
    %c0_3 = arith.constant 0 : index
    %c0_4 = arith.constant 0 : index
    %2 = vector.load %arg4[%c0_2, %c0_3, %c0_4] : memref<1x16x96xbf16, #tpu.memory_space<vmem>>, vector<1x16x96xbf16>
    %3 = vector.shape_cast %2 : vector<1x16x96xbf16> to vector<16x96xbf16>
    %4 = vector.extract_strided_slice %1 {offsets = [0, 0], sizes = [16, 8], strides = [1, 1]} : vector<16x96xbf16> to vector<16x8xbf16>
    %5 = vector.extract_strided_slice %3 {offsets = [0, 32], sizes = [16, 8], strides = [1, 1]} : vector<16x96xbf16> to vector<16x8xbf16>
    %6 = vector.extract_strided_slice %3 {offsets = [0, 64], sizes = [16, 8], strides = [1, 1]} : vector<16x96xbf16> to vector<16x8xbf16>
    %7 = tpu.transpose %5, [1, 0] : vector<16x8xbf16> -> vector<8x16xbf16>
    %cst = arith.constant dense<0.000000e+00> : vector<16x16xf32>
    %8 = tpu.matmul %4, %7, %cst {dimension_numbers = #tpu.dot_dimension_numbers<[1], [0], [0], [1], [0, 0, 1, 1], [], []>} : vector<16x8xbf16>, vector<8x16xbf16>, vector<16x16xf32> -> vector<16x16xf32>
    %cst_5 = arith.constant 0.353553385 : f32
    %9 = vector.broadcast %cst_5 : f32 to vector<16x16xf32>
    %10 = arith.mulf %8, %9 : vector<16x16xf32>
    %cst_6 = arith.constant dense<0xFF800000> : vector<16xf32>
    %11 = vector.multi_reduction <maximumf>, %10, %cst_6 [1] : vector<16x16xf32> to vector<16xf32>
    %12 = vector.shape_cast %11 : vector<16xf32> to vector<16x1xf32>
    %13 = vector.broadcast %12 : vector<16x1xf32> to vector<16x16xf32>
    %14 = arith.subf %10, %13 : vector<16x16xf32>
    %15 = math.exp %14 : vector<16x16xf32>
    %cst_7 = arith.constant dense<0.000000e+00> : vector<16xf32>
    %16 = vector.multi_reduction <add>, %15, %cst_7 [1] : vector<16x16xf32> to vector<16xf32>
    %17 = vector.shape_cast %16 : vector<16xf32> to vector<16x1xf32>
    %18 = tpu.reciprocal %17 {approx = true} : vector<16x1xf32> -> vector<16x1xf32>
    %19 = vector.broadcast %18 : vector<16x1xf32> to vector<16x16xf32>
    %20 = arith.mulf %15, %19 : vector<16x16xf32>
    %21 = arith.truncf %20 : vector<16x16xf32> to vector<16x16xbf16>
    %cst_8 = arith.constant dense<0.000000e+00> : vector<16x8xf32>
    %22 = tpu.matmul %21, %6, %cst_8 {dimension_numbers = #tpu.dot_dimension_numbers<[1], [0], [0], [1], [0, 0, 1, 1], [], []>} : vector<16x16xbf16>, vector<16x8xbf16>, vector<16x8xf32> -> vector<16x8xf32>
    %23 = arith.truncf %22 : vector<16x8xf32> to vector<16x8xbf16>
    %24 = vector.extract_strided_slice %1 {offsets = [0, 8], sizes = [16, 8], strides = [1, 1]} : vector<16x96xbf16> to vector<16x8xbf16>
    %25 = vector.extract_strided_slice %3 {offsets = [0, 40], sizes = [16, 8], strides = [1, 1]} : vector<16x96xbf16> to vector<16x8xbf16>
    %26 = vector.extract_strided_slice %3 {offsets = [0, 72], sizes = [16, 8], strides = [1, 1]} : vector<16x96xbf16> to vector<16x8xbf16>
    %27 = tpu.transpose %25, [1, 0] : vector<16x8xbf16> -> vector<8x16xbf16>
    %cst_9 = arith.constant dense<0.000000e+00> : vector<16x16xf32>
    %28 = tpu.matmul %24, %27, %cst_9 {dimension_numbers = #tpu.dot_dimension_numbers<[1], [0], [0], [1], [0, 0, 1, 1], [], []>} : vector<16x8xbf16>, vector<8x16xbf16>, vector<16x16xf32> -> vector<16x16xf32>
    %cst_10 = arith.constant 0.353553385 : f32
    %29 = vector.broadcast %cst_10 : f32 to vector<16x16xf32>
    %30 = arith.mulf %28, %29 : vector<16x16xf32>
    %cst_11 = arith.constant dense<0xFF800000> : vector<16xf32>
    %31 = vector.multi_reduction <maximumf>, %30, %cst_11 [1] : vector<16x16xf32> to vector<16xf32>
    %32 = vector.shape_cast %31 : vector<16xf32> to vector<16x1xf32>
    %33 = vector.broadcast %32 : vector<16x1xf32> to vector<16x16xf32>
    %34 = arith.subf %30, %33 : vector<16x16xf32>
    %35 = math.exp %34 : vector<16x16xf32>
    %cst_12 = arith.constant dense<0.000000e+00> : vector<16xf32>
    %36 = vector.multi_reduction <add>, %35, %cst_12 [1] : vector<16x16xf32> to vector<16xf32>
    %37 = vector.shape_cast %36 : vector<16xf32> to vector<16x1xf32>
    %38 = tpu.reciprocal %37 {approx = true} : vector<16x1xf32> -> vector<16x1xf32>
    %39 = vector.broadcast %38 : vector<16x1xf32> to vector<16x16xf32>
    %40 = arith.mulf %35, %39 : vector<16x16xf32>
    %41 = arith.truncf %40 : vector<16x16xf32> to vector<16x16xbf16>
    %cst_13 = arith.constant dense<0.000000e+00> : vector<16x8xf32>
    %42 = tpu.matmul %41, %26, %cst_13 {dimension_numbers = #tpu.dot_dimension_numbers<[1], [0], [0], [1], [0, 0, 1, 1], [], []>} : vector<16x16xbf16>, vector<16x8xbf16>, vector<16x8xf32> -> vector<16x8xf32>
    %43 = arith.truncf %42 : vector<16x8xf32> to vector<16x8xbf16>
    %44 = vector.extract_strided_slice %1 {offsets = [0, 16], sizes = [16, 8], strides = [1, 1]} : vector<16x96xbf16> to vector<16x8xbf16>
    %45 = vector.extract_strided_slice %3 {offsets = [0, 48], sizes = [16, 8], strides = [1, 1]} : vector<16x96xbf16> to vector<16x8xbf16>
    %46 = vector.extract_strided_slice %3 {offsets = [0, 80], sizes = [16, 8], strides = [1, 1]} : vector<16x96xbf16> to vector<16x8xbf16>
    %47 = tpu.transpose %45, [1, 0] : vector<16x8xbf16> -> vector<8x16xbf16>
    %cst_14 = arith.constant dense<0.000000e+00> : vector<16x16xf32>
    %48 = tpu.matmul %44, %47, %cst_14 {dimension_numbers = #tpu.dot_dimension_numbers<[1], [0], [0], [1], [0, 0, 1, 1], [], []>} : vector<16x8xbf16>, vector<8x16xbf16>, vector<16x16xf32> -> vector<16x16xf32>
    %cst_15 = arith.constant 0.353553385 : f32
    %49 = vector.broadcast %cst_15 : f32 to vector<16x16xf32>
    %50 = arith.mulf %48, %49 : vector<16x16xf32>
    %cst_16 = arith.constant dense<0xFF800000> : vector<16xf32>
    %51 = vector.multi_reduction <maximumf>, %50, %cst_16 [1] : vector<16x16xf32> to vector<16xf32>
    %52 = vector.shape_cast %51 : vector<16xf32> to vector<16x1xf32>
    %53 = vector.broadcast %52 : vector<16x1xf32> to vector<16x16xf32>
    %54 = arith.subf %50, %53 : vector<16x16xf32>
    %55 = math.exp %54 : vector<16x16xf32>
    %cst_17 = arith.constant dense<0.000000e+00> : vector<16xf32>
    %56 = vector.multi_reduction <add>, %55, %cst_17 [1] : vector<16x16xf32> to vector<16xf32>
    %57 = vector.shape_cast %56 : vector<16xf32> to vector<16x1xf32>
    %58 = tpu.reciprocal %57 {approx = true} : vector<16x1xf32> -> vector<16x1xf32>
    %59 = vector.broadcast %58 : vector<16x1xf32> to vector<16x16xf32>
    %60 = arith.mulf %55, %59 : vector<16x16xf32>
    %61 = arith.truncf %60 : vector<16x16xf32> to vector<16x16xbf16>
    %cst_18 = arith.constant dense<0.000000e+00> : vector<16x8xf32>
    %62 = tpu.matmul %61, %46, %cst_18 {dimension_numbers = #tpu.dot_dimension_numbers<[1], [0], [0], [1], [0, 0, 1, 1], [], []>} : vector<16x16xbf16>, vector<16x8xbf16>, vector<16x8xf32> -> vector<16x8xf32>
    %63 = arith.truncf %62 : vector<16x8xf32> to vector<16x8xbf16>
    %64 = vector.extract_strided_slice %1 {offsets = [0, 24], sizes = [16, 8], strides = [1, 1]} : vector<16x96xbf16> to vector<16x8xbf16>
    %65 = vector.extract_strided_slice %3 {offsets = [0, 56], sizes = [16, 8], strides = [1, 1]} : vector<16x96xbf16> to vector<16x8xbf16>
    %66 = vector.extract_strided_slice %3 {offsets = [0, 88], sizes = [16, 8], strides = [1, 1]} : vector<16x96xbf16> to vector<16x8xbf16>
    %67 = tpu.transpose %65, [1, 0] : vector<16x8xbf16> -> vector<8x16xbf16>
    %cst_19 = arith.constant dense<0.000000e+00> : vector<16x16xf32>
    %68 = tpu.matmul %64, %67, %cst_19 {dimension_numbers = #tpu.dot_dimension_numbers<[1], [0], [0], [1], [0, 0, 1, 1], [], []>} : vector<16x8xbf16>, vector<8x16xbf16>, vector<16x16xf32> -> vector<16x16xf32>
    %cst_20 = arith.constant 0.353553385 : f32
    %69 = vector.broadcast %cst_20 : f32 to vector<16x16xf32>
    %70 = arith.mulf %68, %69 : vector<16x16xf32>
    %cst_21 = arith.constant dense<0xFF800000> : vector<16xf32>
    %71 = vector.multi_reduction <maximumf>, %70, %cst_21 [1] : vector<16x16xf32> to vector<16xf32>
    %72 = vector.shape_cast %71 : vector<16xf32> to vector<16x1xf32>
    %73 = vector.broadcast %72 : vector<16x1xf32> to vector<16x16xf32>
    %74 = arith.subf %70, %73 : vector<16x16xf32>
    %75 = math.exp %74 : vector<16x16xf32>
    %cst_22 = arith.constant dense<0.000000e+00> : vector<16xf32>
    %76 = vector.multi_reduction <add>, %75, %cst_22 [1] : vector<16x16xf32> to vector<16xf32>
    %77 = vector.shape_cast %76 : vector<16xf32> to vector<16x1xf32>
    %78 = tpu.reciprocal %77 {approx = true} : vector<16x1xf32> -> vector<16x1xf32>
    %79 = vector.broadcast %78 : vector<16x1xf32> to vector<16x16xf32>
    %80 = arith.mulf %75, %79 : vector<16x16xf32>
    %81 = arith.truncf %80 : vector<16x16xf32> to vector<16x16xbf16>
    %cst_23 = arith.constant dense<0.000000e+00> : vector<16x8xf32>
    %82 = tpu.matmul %81, %66, %cst_23 {dimension_numbers = #tpu.dot_dimension_numbers<[1], [0], [0], [1], [0, 0, 1, 1], [], []>} : vector<16x16xbf16>, vector<16x8xbf16>, vector<16x8xf32> -> vector<16x8xf32>
    %83 = arith.truncf %82 : vector<16x8xf32> to vector<16x8xbf16>
    %84 = tpu.concatenate %23, %43, %63, %83 in 1 : vector<16x8xbf16>, vector<16x8xbf16>, vector<16x8xbf16>, vector<16x8xbf16> -> vector<16x32xbf16>
    %c0_24 = arith.constant 0 : index
    %c0_25 = arith.constant 0 : index
    %85 = vector.load %arg5[%c0_24, %c0_25] : memref<32x32xbf16, #tpu.memory_space<vmem>>, vector<32x32xbf16>
    %cst_26 = arith.constant dense<0.000000e+00> : vector<16x32xf32>
    %86 = tpu.matmul %84, %85, %cst_26 {dimension_numbers = #tpu.dot_dimension_numbers<[1], [0], [0], [1], [0, 0, 1, 1], [], []>} : vector<16x32xbf16>, vector<32x32xbf16>, vector<16x32xf32> -> vector<16x32xf32>
    %c0_27 = arith.constant 0 : index
    %c0_28 = arith.constant 0 : index
    %87 = vector.load %arg6[%c0_27, %c0_28] : memref<1x32xf32, #tpu.memory_space<vmem>>, vector<1x32xf32>
    %88 = vector.broadcast %87 : vector<1x32xf32> to vector<16x32xf32>
    %89 = arith.addf %86, %88 : vector<16x32xf32>
    %c0_29 = arith.constant 0 : index
    %c0_30 = arith.constant 0 : index
    %c0_31 = arith.constant 0 : index
    %90 = vector.load %arg2[%c0_29, %c0_30, %c0_31] : memref<1x16x32xbf16, #tpu.memory_space<vmem>>, vector<1x16x32xbf16>
    %91 = vector.shape_cast %90 : vector<1x16x32xbf16> to vector<16x32xbf16>
    %92 = arith.extf %91 : vector<16x32xbf16> to vector<16x32xf32>
    %93 = arith.addf %92, %89 : vector<16x32xf32>
    %cst_32 = arith.constant dense<0.000000e+00> : vector<16xf32>
    %94 = vector.multi_reduction <add>, %93, %cst_32 [1] : vector<16x32xf32> to vector<16xf32>
    %95 = vector.shape_cast %94 : vector<16xf32> to vector<16x1xf32>
    %cst_33 = arith.constant 3.200000e+01 : f32
    %96 = vector.broadcast %cst_33 : f32 to vector<16x1xf32>
    %97 = arith.divf %95, %96 : vector<16x1xf32>
    %98 = vector.broadcast %97 : vector<16x1xf32> to vector<16x32xf32>
    %99 = arith.subf %93, %98 : vector<16x32xf32>
    %100 = arith.mulf %99, %99 : vector<16x32xf32>
    %cst_34 = arith.constant dense<0.000000e+00> : vector<16xf32>
    %101 = vector.multi_reduction <add>, %100, %cst_34 [1] : vector<16x32xf32> to vector<16xf32>
    %102 = vector.shape_cast %101 : vector<16xf32> to vector<16x1xf32>
    %cst_35 = arith.constant 3.200000e+01 : f32
    %103 = vector.broadcast %cst_35 : f32 to vector<16x1xf32>
    %104 = arith.divf %102, %103 : vector<16x1xf32>
    %105 = vector.broadcast %97 : vector<16x1xf32> to vector<16x32xf32>
    %106 = arith.subf %93, %105 : vector<16x32xf32>
    %cst_36 = arith.constant 9.99999974E-6 : f32
    %107 = vector.broadcast %cst_36 : f32 to vector<16x1xf32>
    %108 = arith.addf %104, %107 : vector<16x1xf32>
    %109 = math.rsqrt %108 : vector<16x1xf32>
    %110 = vector.broadcast %109 : vector<16x1xf32> to vector<16x32xf32>
    %111 = arith.mulf %106, %110 : vector<16x32xf32>
    %c0_37 = arith.constant 0 : index
    %c0_38 = arith.constant 0 : index
    %112 = vector.load %arg7[%c0_37, %c0_38] : memref<1x32xf32, #tpu.memory_space<vmem>>, vector<1x32xf32>
    %113 = vector.broadcast %112 : vector<1x32xf32> to vector<16x32xf32>
    %114 = arith.mulf %111, %113 : vector<16x32xf32>
    %c0_39 = arith.constant 0 : index
    %c0_40 = arith.constant 0 : index
    %115 = vector.load %arg8[%c0_39, %c0_40] : memref<1x32xf32, #tpu.memory_space<vmem>>, vector<1x32xf32>
    %116 = vector.broadcast %115 : vector<1x32xf32> to vector<16x32xf32>
    %117 = arith.addf %114, %116 : vector<16x32xf32>
    %118 = arith.truncf %117 : vector<16x32xf32> to vector<16x32xbf16>
    %c0_41 = arith.constant 0 : index
    %c0_42 = arith.constant 0 : index
    %c0_43 = arith.constant 0 : index
    %119 = vector.load %arg9[%c0_41, %c0_42, %c0_43] : memref<1x16x32xbf16, #tpu.memory_space<vmem>>, vector<1x16x32xbf16>
    %120 = vector.shape_cast %119 : vector<1x16x32xbf16> to vector<16x32xbf16>
    %121 = vector.shape_cast %118 : vector<16x32xbf16> to vector<1x16x32xbf16>
    tpu.vector_store %arg9[%c0_41, %c0_42, %c0_43], %121 {strides = array<i32>} : memref<1x16x32xbf16, #tpu.memory_space<vmem>>, vector<1x16x32xbf16>,
    return
  }
  func.func @transform_0(%arg0: i32, %arg1: i32) -> (i32, i32, i32) {
    %c0_i32 = arith.constant 0 : i32
    %c0_i32_0 = arith.constant 0 : i32
    return %arg0, %arg1, %c0_i32 : i32, i32, i32
  }
  func.func @transform_1(%arg0: i32, %arg1: i32) -> (i32, i32, i32) {
    %c0_i32 = arith.constant 0 : i32
    %c0_i32_0 = arith.constant 0 : i32
    return %arg0, %arg1, %c0_i32 : i32, i32, i32
  }
  func.func @transform_2(%arg0: i32, %arg1: i32) -> (i32, i32, i32) {
    %c0_i32 = arith.constant 0 : i32
    %c0_i32_0 = arith.constant 0 : i32
    %c0_i32_1 = arith.constant 0 : i32
    return %arg0, %c0_i32, %c0_i32_0 : i32, i32, i32
  }
  func.func @transform_3(%arg0: i32, %arg1: i32) -> (i32, i32) {
    %c0_i32 = arith.constant 0 : i32
    %c0_i32_0 = arith.constant 0 : i32
    %c0_i32_1 = arith.constant 0 : i32
    return %c0_i32, %c0_i32_0 : i32, i32
  }
  func.func @transform_4(%arg0: i32, %arg1: i32) -> (i32, i32) {
    %c0_i32 = arith.constant 0 : i32
    %c0_i32_0 = arith.constant 0 : i32
    %c0_i32_1 = arith.constant 0 : i32
    return %c0_i32, %c0_i32_0 : i32, i32
  }
  func.func @transform_5(%arg0: i32, %arg1: i32) -> (i32, i32) {
    %c0_i32 = arith.constant 0 : i32
    %c0_i32_0 = arith.constant 0 : i32
    %c0_i32_1 = arith.constant 0 : i32
    return %c0_i32, %c0_i32_0 : i32, i32
  }
  func.func @transform_6(%arg0: i32, %arg1: i32) -> (i32, i32) {
    %c0_i32 = arith.constant 0 : i32
    %c0_i32_0 = arith.constant 0 : i32
    %c0_i32_1 = arith.constant 0 : i32
    return %c0_i32, %c0_i32_0 : i32, i32
  }
  func.func @transform_7(%arg0: i32, %arg1: i32) -> (i32, i32, i32) {
    %c0_i32 = arith.constant 0 : i32
    %c0_i32_0 = arith.constant 0 : i32
    return %arg0, %arg1, %c0_i32 : i32, i32, i32
  }
}

module attributes {stable_mosaic.version = 11 : i64} {
  func.func @_ffn_ln_kernel(%arg0: i32, %arg1: memref<32x32xbf16, #tpu.memory_space<vmem>>, %arg2: memref<32x2048xbf16, #tpu.memory_space<vmem>>, %arg3: memref<1x2048xf32, #tpu.memory_space<vmem>>, %arg4: memref<2048x32xbf16, #tpu.memory_space<vmem>>, %arg5: memref<1x32xf32, #tpu.memory_space<vmem>>, %arg6: memref<1x32xf32, #tpu.memory_space<vmem>>, %arg7: memref<1x32xf32, #tpu.memory_space<vmem>>, %arg8: memref<32x32xbf16, #tpu.memory_space<vmem>>) attributes {dimension_semantics = [#tpu.dimension_semantics<parallel>], iteration_bounds = array<i64: 1>, scalar_prefetch = 0 : i64, scratch_operands = 0 : i64, tpu.core_type = #tpu.core_type<tc>, window_params = [{transform_indices = @transform_0, window_bounds = array<i64: 32, 32>}, {pipeline_mode = #tpu.pipeline_mode<synchronous>, transform_indices = @transform_1, window_bounds = array<i64: 32, 2048>}, {pipeline_mode = #tpu.pipeline_mode<synchronous>, transform_indices = @transform_2, window_bounds = array<i64: 1, 2048>}, {pipeline_mode = #tpu.pipeline_mode<synchronous>, transform_indices = @transform_3, window_bounds = array<i64: 2048, 32>}, {pipeline_mode = #tpu.pipeline_mode<synchronous>, transform_indices = @transform_4, window_bounds = array<i64: 1, 32>}, {pipeline_mode = #tpu.pipeline_mode<synchronous>, transform_indices = @transform_5, window_bounds = array<i64: 1, 32>}, {pipeline_mode = #tpu.pipeline_mode<synchronous>, transform_indices = @transform_6, window_bounds = array<i64: 1, 32>}, {transform_indices = @transform_7, window_bounds = array<i64: 32, 32>}]} {
    %c0 = arith.constant 0 : index
    %c0_0 = arith.constant 0 : index
    %0 = vector.load %arg1[%c0, %c0_0] : memref<32x32xbf16, #tpu.memory_space<vmem>>, vector<32x32xbf16>
    %c0_1 = arith.constant 0 : index
    %c0_2 = arith.constant 0 : index
    %1 = vector.load %arg2[%c0_1, %c0_2] : memref<32x2048xbf16, #tpu.memory_space<vmem>>, vector<32x2048xbf16>
    %c0_3 = arith.constant 0 : index
    %c0_4 = arith.constant 0 : index
    %2 = vector.load %arg4[%c0_3, %c0_4] : memref<2048x32xbf16, #tpu.memory_space<vmem>>, vector<2048x32xbf16>
    %cst = arith.constant dense<0.000000e+00> : vector<32x2048xf32>
    %3 = tpu.matmul %0, %1, %cst {dimension_numbers = #tpu.dot_dimension_numbers<[1], [0], [0], [1], [0, 0, 1, 1], [], []>} : vector<32x32xbf16>, vector<32x2048xbf16>, vector<32x2048xf32> -> vector<32x2048xf32>
    %c0_5 = arith.constant 0 : index
    %c0_6 = arith.constant 0 : index
    %4 = vector.load %arg3[%c0_5, %c0_6] : memref<1x2048xf32, #tpu.memory_space<vmem>>, vector<1x2048xf32>
    %5 = vector.broadcast %4 : vector<1x2048xf32> to vector<32x2048xf32>
    %6 = arith.addf %3, %5 : vector<32x2048xf32>
    %cst_7 = arith.constant 0.000000e+00 : f32
    %7 = vector.broadcast %cst_7 : f32 to vector<32x2048xf32>
    %8 = arith.maximumf %6, %7 : vector<32x2048xf32>
    %9 = arith.truncf %8 : vector<32x2048xf32> to vector<32x2048xbf16>
    %cst_8 = arith.constant dense<0.000000e+00> : vector<32x32xf32>
    %10 = tpu.matmul %9, %2, %cst_8 {dimension_numbers = #tpu.dot_dimension_numbers<[1], [0], [0], [1], [0, 0, 1, 1], [], []>} : vector<32x2048xbf16>, vector<2048x32xbf16>, vector<32x32xf32> -> vector<32x32xf32>
    %c0_9 = arith.constant 0 : index
    %c0_10 = arith.constant 0 : index
    %11 = vector.load %arg5[%c0_9, %c0_10] : memref<1x32xf32, #tpu.memory_space<vmem>>, vector<1x32xf32>
    %12 = vector.broadcast %11 : vector<1x32xf32> to vector<32x32xf32>
    %13 = arith.addf %10, %12 : vector<32x32xf32>
    %14 = arith.extf %0 : vector<32x32xbf16> to vector<32x32xf32>
    %15 = arith.addf %14, %13 : vector<32x32xf32>
    %cst_11 = arith.constant dense<0.000000e+00> : vector<32xf32>
    %16 = vector.multi_reduction <add>, %15, %cst_11 [1] : vector<32x32xf32> to vector<32xf32>
    %17 = vector.shape_cast %16 : vector<32xf32> to vector<32x1xf32>
    %cst_12 = arith.constant 3.200000e+01 : f32
    %18 = vector.broadcast %cst_12 : f32 to vector<32x1xf32>
    %19 = arith.divf %17, %18 : vector<32x1xf32>
    %20 = vector.broadcast %19 : vector<32x1xf32> to vector<32x32xf32>
    %21 = arith.subf %15, %20 : vector<32x32xf32>
    %22 = arith.mulf %21, %21 : vector<32x32xf32>
    %cst_13 = arith.constant dense<0.000000e+00> : vector<32xf32>
    %23 = vector.multi_reduction <add>, %22, %cst_13 [1] : vector<32x32xf32> to vector<32xf32>
    %24 = vector.shape_cast %23 : vector<32xf32> to vector<32x1xf32>
    %cst_14 = arith.constant 3.200000e+01 : f32
    %25 = vector.broadcast %cst_14 : f32 to vector<32x1xf32>
    %26 = arith.divf %24, %25 : vector<32x1xf32>
    %27 = vector.broadcast %19 : vector<32x1xf32> to vector<32x32xf32>
    %28 = arith.subf %15, %27 : vector<32x32xf32>
    %cst_15 = arith.constant 9.99999974E-6 : f32
    %29 = vector.broadcast %cst_15 : f32 to vector<32x1xf32>
    %30 = arith.addf %26, %29 : vector<32x1xf32>
    %31 = math.rsqrt %30 : vector<32x1xf32>
    %32 = vector.broadcast %31 : vector<32x1xf32> to vector<32x32xf32>
    %33 = arith.mulf %28, %32 : vector<32x32xf32>
    %c0_16 = arith.constant 0 : index
    %c0_17 = arith.constant 0 : index
    %34 = vector.load %arg6[%c0_16, %c0_17] : memref<1x32xf32, #tpu.memory_space<vmem>>, vector<1x32xf32>
    %35 = vector.broadcast %34 : vector<1x32xf32> to vector<32x32xf32>
    %36 = arith.mulf %33, %35 : vector<32x32xf32>
    %c0_18 = arith.constant 0 : index
    %c0_19 = arith.constant 0 : index
    %37 = vector.load %arg7[%c0_18, %c0_19] : memref<1x32xf32, #tpu.memory_space<vmem>>, vector<1x32xf32>
    %38 = vector.broadcast %37 : vector<1x32xf32> to vector<32x32xf32>
    %39 = arith.addf %36, %38 : vector<32x32xf32>
    %40 = arith.truncf %39 : vector<32x32xf32> to vector<32x32xbf16>
    %c0_20 = arith.constant 0 : index
    %c0_21 = arith.constant 0 : index
    %41 = vector.load %arg8[%c0_20, %c0_21] : memref<32x32xbf16, #tpu.memory_space<vmem>>, vector<32x32xbf16>
    tpu.vector_store %arg8[%c0_20, %c0_21], %40 {strides = array<i32>} : memref<32x32xbf16, #tpu.memory_space<vmem>>, vector<32x32xbf16>,
    return
  }
  func.func @transform_0(%arg0: i32) -> (i32, i32) {
    %c0_i32 = arith.constant 0 : i32
    %c0_i32_0 = arith.constant 0 : i32
    return %arg0, %c0_i32 : i32, i32
  }
  func.func @transform_1(%arg0: i32) -> (i32, i32) {
    %c0_i32 = arith.constant 0 : i32
    %c0_i32_0 = arith.constant 0 : i32
    %c0_i32_1 = arith.constant 0 : i32
    return %c0_i32, %c0_i32_0 : i32, i32
  }
  func.func @transform_2(%arg0: i32) -> (i32, i32) {
    %c0_i32 = arith.constant 0 : i32
    %c0_i32_0 = arith.constant 0 : i32
    %c0_i32_1 = arith.constant 0 : i32
    return %c0_i32, %c0_i32_0 : i32, i32
  }
  func.func @transform_3(%arg0: i32) -> (i32, i32) {
    %c0_i32 = arith.constant 0 : i32
    %c0_i32_0 = arith.constant 0 : i32
    %c0_i32_1 = arith.constant 0 : i32
    return %c0_i32, %c0_i32_0 : i32, i32
  }
  func.func @transform_4(%arg0: i32) -> (i32, i32) {
    %c0_i32 = arith.constant 0 : i32
    %c0_i32_0 = arith.constant 0 : i32
    %c0_i32_1 = arith.constant 0 : i32
    return %c0_i32, %c0_i32_0 : i32, i32
  }
  func.func @transform_5(%arg0: i32) -> (i32, i32) {
    %c0_i32 = arith.constant 0 : i32
    %c0_i32_0 = arith.constant 0 : i32
    %c0_i32_1 = arith.constant 0 : i32
    return %c0_i32, %c0_i32_0 : i32, i32
  }
  func.func @transform_6(%arg0: i32) -> (i32, i32) {
    %c0_i32 = arith.constant 0 : i32
    %c0_i32_0 = arith.constant 0 : i32
    %c0_i32_1 = arith.constant 0 : i32
    return %c0_i32, %c0_i32_0 : i32, i32
  }
  func.func @transform_7(%arg0: i32) -> (i32, i32) {
    %c0_i32 = arith.constant 0 : i32
    %c0_i32_0 = arith.constant 0 : i32
    return %arg0, %c0_i32 : i32, i32
  }
}

module attributes {stable_mosaic.version = 11 : i64} {
  func.func @_linear_1k_kernel(%arg0: i32, %arg1: i32, %arg2: memref<32x32xbf16, #tpu.memory_space<vmem>>, %arg3: memref<32x128xbf16, #tpu.memory_space<vmem>>, %arg4: memref<1x128xf32, #tpu.memory_space<vmem>>, %arg5: memref<32x128xf32, #tpu.memory_space<vmem>>) attributes {dimension_semantics = [#tpu.dimension_semantics<parallel>, #tpu.dimension_semantics<parallel>], iteration_bounds = array<i64: 1, 1>, scalar_prefetch = 0 : i64, scratch_operands = 0 : i64, tpu.core_type = #tpu.core_type<tc>, window_params = [{transform_indices = @transform_0, window_bounds = array<i64: 32, 32>}, {transform_indices = @transform_1, window_bounds = array<i64: 32, 128>}, {transform_indices = @transform_2, window_bounds = array<i64: 1, 128>}, {transform_indices = @transform_3, window_bounds = array<i64: 32, 128>}]} {
    %c0 = arith.constant 0 : index
    %c0_0 = arith.constant 0 : index
    %0 = vector.load %arg3[%c0, %c0_0] : memref<32x128xbf16, #tpu.memory_space<vmem>>, vector<32x128xbf16>
    %c0_1 = arith.constant 0 : index
    %c0_2 = arith.constant 0 : index
    %1 = vector.load %arg2[%c0_1, %c0_2] : memref<32x32xbf16, #tpu.memory_space<vmem>>, vector<32x32xbf16>
    %cst = arith.constant dense<0.000000e+00> : vector<32x128xf32>
    %2 = tpu.matmul %1, %0, %cst {dimension_numbers = #tpu.dot_dimension_numbers<[1], [0], [0], [1], [0, 0, 1, 1], [], []>} : vector<32x32xbf16>, vector<32x128xbf16>, vector<32x128xf32> -> vector<32x128xf32>
    %c0_3 = arith.constant 0 : index
    %c0_4 = arith.constant 0 : index
    %3 = vector.load %arg4[%c0_3, %c0_4] : memref<1x128xf32, #tpu.memory_space<vmem>>, vector<1x128xf32>
    %4 = vector.broadcast %3 : vector<1x128xf32> to vector<32x128xf32>
    %5 = arith.addf %2, %4 : vector<32x128xf32>
    %c0_5 = arith.constant 0 : index
    %c0_6 = arith.constant 0 : index
    %6 = vector.load %arg5[%c0_5, %c0_6] : memref<32x128xf32, #tpu.memory_space<vmem>>, vector<32x128xf32>
    tpu.vector_store %arg5[%c0_5, %c0_6], %5 {strides = array<i32>} : memref<32x128xf32, #tpu.memory_space<vmem>>, vector<32x128xf32>,
    return
  }
  func.func @transform_0(%arg0: i32, %arg1: i32) -> (i32, i32) {
    %c0_i32 = arith.constant 0 : i32
    %c0_i32_0 = arith.constant 0 : i32
    return %arg0, %c0_i32 : i32, i32
  }
  func.func @transform_1(%arg0: i32, %arg1: i32) -> (i32, i32) {
    %c0_i32 = arith.constant 0 : i32
    %c0_i32_0 = arith.constant 0 : i32
    return %c0_i32, %arg1 : i32, i32
  }
  func.func @transform_2(%arg0: i32, %arg1: i32) -> (i32, i32) {
    %c0_i32 = arith.constant 0 : i32
    %c0_i32_0 = arith.constant 0 : i32
    return %c0_i32, %arg1 : i32, i32
  }
  func.func @transform_3(%arg0: i32, %arg1: i32) -> (i32, i32) {
    %c0_i32 = arith.constant 0 : i32
    return %arg0, %arg1 : i32, i32
  }
}

</mosaic_0001>

<bundles_post_ra>
// kernel: transformer_decoder_forward.9
= control target key start
LH: loop header
LB: loop body
LE: loop exit
PB: predicated region body
PF: predicated region fallthrough
CT: control target
= control target key end

     0   :  { %8 = vsyncpa [#allocation3], 0  ;;  %s412_s0 = inlined_call_operand.hbm [shape: bf16[32,32], index: 0, kind: input, shape index: {}]   ;;  %s413_s1 = inlined_call_operand.hbm [shape: bf16[32,96], index: 1, kind: input, shape index: {}]   ;;  %s414_s2 = inlined_call_operand.hbm [shape: f32[1,96], index: 2, kind: input, shape index: {}]   ;;  %s415_s3 = inlined_call_operand.hbm [shape: bf16[32,96], index: 3, kind: output, shape index: {}]  }
   0x1   :  { %9 = vsyncpa [#allocation6], 0 }
   0x2   :  { %10 = vsyncpa [#allocation4], 0  ;;  %s318_s12 = smov [#allocation5]   ;;  %s319_s14 = smov [#allocation2]  }
   0x3   :  { %s28_s13 = sshll.u32 %s318_s12, 4  ;;  %s16_s15 = sshll.u32 %s319_s14, 4  ;;  %s29_s13 = int_to_ptr.vmem [resolvable:$true] %s28_s13  ;;  %s344_s15 = int_to_ptr.vmem [resolvable:$true] %s16_s15 }
   0x4   :  { %s224_s18 = scalar_lea.hbm %s413_s1, 256 }
   0x5   :  { %p225_p0 = scmp.ne.s32.totalorder %s413_s1, %s224_s18  ;;  %p228_p1 = scmp.lt.u32.totalorder %s224_s18, %s413_s1 }
   0x7   :  { %p230_p2 = pnand %p228_p1, %p225_p0 }
   0x9   :  { %233 = shalt.err (!%p230_p2)
}
   0xa   :  { %s234_s23 = scalar_lea.vmem %s29_s13, 256  ;;  %p239_p4 = scmp.lt.s32.totalorder %s29_s13, %s29_s13 }
   0xb   :  { %p235_p3 = scmp.ne.s32.totalorder %s29_s13, %s234_s23  ;;  %p240_p5 = scmp.lt.s32.totalorder %s234_s23, %s234_s23 }
   0xd   :  { %p241_p6 = por %p240_p5, %p239_p4 }
   0xf   :  { %p242_p7 = pnand %p241_p6, %p235_p3 }
  0x11   :  { %245 = shalt.err (!%p242_p7)
}
  0x12   :  { %s320_s24 = smov 64   ;;  %s321_s25 = smov 4  }
  0x13   :  { %34 = dma.hbm_to_vmem [thread:$0]  %s413_s1, 256, %s29_s13, [#allocation6], %s320_s24, %s320_s24, %s321_s25  }
  0x14   :  { %s246_s30 = scalar_lea.hbm %s412_s0, 256 }
  0x15   :  { %p247_p8 = scmp.ne.s32.totalorder %s412_s0, %s246_s30  ;;  %p250_p9 = scmp.lt.u32.totalorder %s246_s30, %s412_s0 }
  0x17   :  { %p252_p10 = pnand %p250_p9, %p247_p8 }
  0x19   :  { %255 = shalt.err (!%p252_p10)
}
  0x1a   :  { %s256_s8 = scalar_lea.vmem %s344_s15, 256  ;;  %p261_p12 = scmp.lt.s32.totalorder %s344_s15, %s344_s15 }
  0x1b   :  { %p257_p11 = scmp.ne.s32.totalorder %s344_s15, %s256_s8  ;;  %p262_p13 = scmp.lt.s32.totalorder %s256_s8, %s256_s8 }
  0x1d   :  { %p263_p0 = por %p262_p13, %p261_p12 }
  0x1f   :  { %p264_p1 = pnand %p263_p0, %p257_p11 }
  0x21   :  { %267 = shalt.err (!%p264_p1)
}
  0x22   :  { %22 = dma.hbm_to_vmem [thread:$0]  %s412_s0, 256, %s344_s15, [#allocation3], %s320_s24, %s320_s24, %s321_s25  }
  0x23   :  { %s322_s10 = smov [#allocation7]   ;;  %s268_s14 = scalar_lea.hbm %s414_s2, 16 }
  0x24   :  { %s41_s11 = sshll.u32 %s322_s10, 4  ;;  %p269_p2 = scmp.ne.s32.totalorder %s414_s2, %s268_s14  ;;  %s42_s11 = int_to_ptr.vmem [resolvable:$true] %s41_s11 }
  0x25   :  { %p272_p3 = scmp.lt.u32.totalorder %s268_s14, %s414_s2 }
  0x27   :  { %p274_p4 = pnand %p272_p3, %p269_p2 }
  0x29   :  { %277 = shalt.err (!%p274_p4)
}
  0x2a   :  { %s278_s20 = scalar_lea.vmem %s42_s11, 16  ;;  %s282_s0 = scalar_lea.vmem %s42_s11, 32 }
  0x2b   :  { %p279_p5 = scmp.ne.s32.totalorder %s42_s11, %s278_s20  ;;  %p283_p6 = scmp.lt.s32.totalorder %s42_s11, %s42_s11 }
  0x2c   :  { %p284_p7 = scmp.lt.s32.totalorder %s282_s0, %s278_s20 }
  0x2e   :  { %p285_p8 = por %p284_p7, %p283_p6 }
  0x30   :  { %p286_p9 = pnand %p285_p8, %p279_p5 }
  0x32   :  { %289 = shalt.err (!%p286_p9)
}
  0x33   :  { %44 = dma.hbm_to_vmem [thread:$0]  %s414_s2, 16, %s42_s11, [#allocation6]  }
  0x34   :  { %312 = dma.done.wait [#allocation3], 256  }
  0x35   :  { %313 = vsyncadd [#allocation3], 4294967040 }
  0x36   :  { %314 = dma.done.wait [#allocation6], 272  }
  0x37   :  { %315 = vsyncadd [#allocation6], 4294967024  ;;  %v220_v0 = vld [vmem:[#allocation5] sm:$0xff]   ;;  %v221_v1 = vld [vmem:[#allocation5 + $0x8] sm:$0xff]   ;;  %vm92_vm0 = vcmask 261120   ;;  %vm164_vm1 = vcmask 781312  }
  0x38   :  { %206 = vmatprep.subr.bf16.mxu0 %v220_v0  ;;  %v222_v2 = vld [vmem:[#allocation2] sm:$0xff]   ;;  %v223_v3 = vld [vmem:[#allocation2 + $0x8] sm:$0xff]   ;;  %s323_s2 = smov [#allocation8]  }
  0x39   :  { %207 = vmatpush3.bf16.msra.mxu0 %v220_v0  ;;  %210 = vmatprep.mubr.msk.bf16.mxu0 %vm92_vm0, %v222_v2  ;;  %v187_v4 = vld [vmem:[#allocation7] ss:$0 sm:$0xff]  ;;  %s174_s22 = sshll.u32 %s323_s2, 4  ;;  %s175_s22 = int_to_ptr.vmem [resolvable:$true] %s174_s22 }
  0x3a   :  { %208 = vmatprep.subr.bf16.mxu0 %v221_v1  ;;  %s290_s23 = scalar_lea.vmem %s175_s22, 256  ;;  %p295_p11 = scmp.lt.s32.totalorder %s175_s22, %s175_s22 }
  0x3b   :  { %p291_p10 = scmp.ne.s32.totalorder %s175_s22, %s290_s23  ;;  %p296_p12 = scmp.lt.s32.totalorder %s290_s23, %s290_s23 }
  0x3d   :  { %209 = vmatpush3.bf16.msra.mxu0 %v221_v1  ;;  %p297_p13 = por %p296_p12, %p295_p11 }
  0x3f   :  { %p298_p0 = pnand %p297_p13, %p291_p10 }
  0x40   :  { %211 = vmatmul.mubr.msk.bf16.vlgmr.msra.gmra.mrb[0].mxu0 %vm92_vm0, %v223_v3 }
 0x113   :  { %v212_v5 = vpop.f32.mrb[0].mxu0 }
 0x114   :  { %v142_v6 = vadd.f32 %v212_v5, %v187_v4  ;;  %v133_v7 = vpop.f32.mrb[1].mxu0 }
 0x115   :  { %v134_v8 = vadd.f32 %v187_v4, %v133_v7  ;;  %v213_v9 = vpop.f32.mrb[2].mxu0 }
 0x116   :  { %v200_v10 = vpack.c.bf16 %v142_v6, %v142_v6  ;;  %v145_v11 = vadd.f32 %v213_v9, %v187_v4  ;;  %v136_v12 = vpop.f32.mrb[3].mxu0 }
 0x117   :  { %v198_v13 = vpack.c.bf16 %v134_v8, %v134_v8  ;;  %v137_v14 = vadd.f32 %v187_v4, %v136_v12 }
 0x118   :  { %167 = vst.msk [vmem:[#allocation8 + $0x8] sm:$0xf] %vm164_vm1, %v200_v10  ;;  %v201_v15 = vpack.c.bf16 %v145_v11, %v145_v11 }
 0x119   :  { %165 = vst.msk [vmem:[#allocation8] sm:$0xf] %vm164_vm1, %v198_v13  ;;  %v199_v16 = vpack.c.bf16 %v137_v14, %v137_v14 }
 0x11a   :  { %168 = vst.msk [vmem:[#allocation8 + $0xc] sm:$0xf] %vm164_vm1, %v201_v15 }
 0x11b   :  { %166 = vst.msk [vmem:[#allocation8 + $0x4] sm:$0xf] %vm164_vm1, %v199_v16 }
 0x11c   :  { %301 = shalt.err (!%p298_p0)
}
 0x11d   :  { %s302_s28 = scalar_lea.hbm %s415_s3, 256 }
 0x11e   :  { %p303_p1 = scmp.ne.s32.totalorder %s415_s3, %s302_s28  ;;  %p306_p2 = scmp.lt.u32.totalorder %s302_s28, %s415_s3 }
 0x120   :  { %p308_p3 = pnand %p306_p2, %p303_p1 }
 0x122   :  { %311 = shalt.err (!%p308_p3)
}
 0x123   :  { %180 = dma.vmem_to_hbm [thread:$0]  %s175_s22, 256, %s415_s3, [#allocation4], %s320_s24, %s320_s24, %s321_s25  }
 0x124   :  { %316 = dma.done.wait [#allocation4], 256  }
 0x125   :  { %317 = vsyncadd [#allocation4], 4294967040 }
 0x126   :  { %184 = vsyncpa [#allocation3], 1 }
 0x127   :  { %185 = vsyncpa [#allocation6], 1 }
 0x128   :  { %186 = vsyncpa [#allocation4], 1 }

// kernel: transformer_decoder_forward.8
= control target key start
LH: loop header
LB: loop body
LE: loop exit
PB: predicated region body
PF: predicated region fallthrough
CT: control target
= control target key end

     0   :  { %8 = vsyncpa [#allocation3], 0  ;;  %s376_s0 = inlined_call_operand.hbm [shape: f32[32,4], index: 0, kind: input, shape index: {}]   ;;  %s377_s1 = inlined_call_operand.hbm [shape: bf16[4,32], index: 1, kind: input, shape index: {}]   ;;  %s378_s2 = inlined_call_operand.hbm [shape: f32[1,32], index: 2, kind: input, shape index: {}]   ;;  %s379_s3 = inlined_call_operand.hbm [shape: bf16[32,32], index: 3, kind: output, shape index: {}]  }
   0x1   :  { %9 = vsyncpa [#allocation6], 0 }
   0x2   :  { %10 = vsyncpa [#allocation4], 0  ;;  %s289_s12 = smov [#allocation5]   ;;  %s290_s14 = smov [#allocation2]  }
   0x3   :  { %s29_s13 = sshll.u32 %s289_s12, 4  ;;  %s16_s15 = sshll.u32 %s290_s14, 4  ;;  %s30_s13 = int_to_ptr.vmem [resolvable:$true] %s29_s13  ;;  %s317_s15 = int_to_ptr.vmem [resolvable:$true] %s16_s15 }
   0x4   :  { %s195_s18 = scalar_lea.hbm %s377_s1, 32 }
   0x5   :  { %p196_p0 = scmp.ne.s32.totalorder %s377_s1, %s195_s18  ;;  %p199_p1 = scmp.lt.u32.totalorder %s195_s18, %s377_s1 }
   0x7   :  { %p201_p2 = pnand %p199_p1, %p196_p0 }
   0x9   :  { %204 = shalt.err (!%p201_p2)
}
   0xa   :  { %s205_s23 = scalar_lea.vmem %s30_s13, 32  ;;  %p210_p4 = scmp.lt.s32.totalorder %s30_s13, %s30_s13 }
   0xb   :  { %p206_p3 = scmp.ne.s32.totalorder %s30_s13, %s205_s23  ;;  %p211_p5 = scmp.lt.s32.totalorder %s205_s23, %s205_s23 }
   0xd   :  { %p212_p6 = por %p211_p5, %p210_p4 }
   0xf   :  { %p213_p7 = pnand %p212_p6, %p206_p3 }
  0x11   :  { %216 = shalt.err (!%p213_p7)
}
  0x12   :  { %32 = dma.hbm_to_vmem [thread:$0]  %s377_s1, 32, %s30_s13, [#allocation6]  }
  0x13   :  { %s217_s28 = scalar_lea.hbm %s376_s0, 512 }
  0x14   :  { %p218_p8 = scmp.ne.s32.totalorder %s376_s0, %s217_s28  ;;  %p221_p9 = scmp.lt.u32.totalorder %s217_s28, %s376_s0 }
  0x16   :  { %p223_p10 = pnand %p221_p9, %p218_p8 }
  0x18   :  { %226 = shalt.err (!%p223_p10)
}
  0x19   :  { %s227_s6 = scalar_lea.vmem %s317_s15, 512  ;;  %p232_p12 = scmp.lt.s32.totalorder %s317_s15, %s317_s15 }
  0x1a   :  { %p228_p11 = scmp.ne.s32.totalorder %s317_s15, %s227_s6  ;;  %p233_p13 = scmp.lt.s32.totalorder %s227_s6, %s227_s6 }
  0x1c   :  { %p234_p0 = por %p233_p13, %p232_p12 }
  0x1e   :  { %p235_p1 = pnand %p234_p0, %p228_p11 }
  0x20   :  { %238 = shalt.err (!%p235_p1)
}
  0x21   :  { %s291_s1 = smov 128   ;;  %s292_s7 = smov 8  }
  0x22   :  { %22 = dma.hbm_to_vmem [thread:$0]  %s376_s0, 512, %s317_s15, [#allocation3], %s291_s1, %s291_s1, %s292_s7  }
  0x23   :  { %s293_s10 = smov [#allocation7]   ;;  %s239_s14 = scalar_lea.hbm %s378_s2, 16 }
  0x24   :  { %s39_s11 = sshll.u32 %s293_s10, 4  ;;  %p240_p2 = scmp.ne.s32.totalorder %s378_s2, %s239_s14  ;;  %s40_s11 = int_to_ptr.vmem [resolvable:$true] %s39_s11 }
  0x25   :  { %p243_p3 = scmp.lt.u32.totalorder %s239_s14, %s378_s2 }
  0x27   :  { %p245_p4 = pnand %p243_p3, %p240_p2 }
  0x29   :  { %248 = shalt.err (!%p245_p4)
}
  0x2a   :  { %s249_s20 = scalar_lea.vmem %s40_s11, 16  ;;  %s253_s0 = scalar_lea.vmem %s40_s11, 32 }
  0x2b   :  { %p250_p5 = scmp.ne.s32.totalorder %s40_s11, %s249_s20  ;;  %p254_p6 = scmp.lt.s32.totalorder %s40_s11, %s40_s11 }
  0x2c   :  { %p255_p7 = scmp.lt.s32.totalorder %s253_s0, %s249_s20 }
  0x2e   :  { %p256_p8 = por %p255_p7, %p254_p6 }
  0x30   :  { %p257_p9 = pnand %p256_p8, %p250_p5 }
  0x32   :  { %260 = shalt.err (!%p257_p9)
}
  0x33   :  { %42 = dma.hbm_to_vmem [thread:$0]  %s378_s2, 16, %s40_s11, [#allocation6]  }
  0x34   :  { %283 = dma.done.wait [#allocation3], 512  }
  0x35   :  { %284 = vsyncadd [#allocation3], 4294966784 }
  0x36   :  { %285 = dma.done.wait [#allocation6], 48  }
  0x37   :  { %286 = vsyncadd [#allocation6], 4294967248  ;;  %vm74_vm0 = vcmask 1041408   ;;  %v53_v0 = vld [vmem:[#allocation5] sm:$0x3]  ;;  %v55_v2 = vld [vmem:[#allocation2 + $0x8] sm:$0xff] }
  0x38   :  { %v54_v1 = vld [vmem:[#allocation2] sm:$0xff]  ;;  %vm67_vm1 = vcmask 31744   ;;  %186 = vmatprep.subr.msk.bf16.mxu0 %vm74_vm0, %v53_v0  ;;  %v76_v3 = vsel %vm74_vm0, %v53_v0, 0  ;;  %v56_v5 = vld [vmem:[#allocation2 + $0x10] sm:$0xff]  ;;  %v57_v6 = vld [vmem:[#allocation2 + $0x18] sm:$0xff]  ;;  %vm143_vm2 = vcmask 257024  }
  0x39   :  { %v58_v4 = vpack.c.bf16 %v55_v2, %v54_v1  ;;  %181 = vmatpush3.bf16.msra.mxu0 %v76_v3  ;;  %v59_v7 = vpack.c.bf16 %v57_v6, %v56_v5  ;;  %v166_v8 = vld [vmem:[#allocation7] ss:$0 sm:$0xff]  ;;  %s294_s2 = smov [#allocation8]  }
  0x3a   :  { %s153_s22 = sshll.u32 %s294_s2, 4  ;;  %s154_s22 = int_to_ptr.vmem [resolvable:$true] %s153_s22 }
  0x3b   :  { %182 = vmatprep.mubr.msk.bf16.mxu0 %vm67_vm1, %v58_v4  ;;  %s261_s23 = scalar_lea.vmem %s154_s22, 256  ;;  %p266_p11 = scmp.lt.s32.totalorder %s154_s22, %s154_s22 }
  0x3c   :  { %183 = vmatmul.mubr.msk.bf16.vlgmr.msra.gmra.mrb[0].mxu0 %vm67_vm1, %v59_v7  ;;  %p262_p10 = scmp.ne.s32.totalorder %s154_s22, %s261_s23  ;;  %p267_p12 = scmp.lt.s32.totalorder %s261_s23, %s261_s23 }
  0x3e   :  { %p268_p13 = por %p267_p12, %p266_p11 }
  0x40   :  { %p269_p0 = pnand %p268_p13, %p262_p10 }
 0x10f   :  { %v184_v9 = vpop.f32.mrb[0].mxu0 }
 0x110   :  { %v121_v10 = vadd.f32 %v184_v9, %v166_v8  ;;  %v112_v11 = vpop.f32.mrb[1].mxu0 }
 0x111   :  { %v113_v12 = vadd.f32 %v166_v8, %v112_v11  ;;  %v185_v13 = vpop.f32.mrb[2].mxu0 }
 0x112   :  { %v175_v14 = vpack.c.bf16 %v121_v10, %v121_v10  ;;  %v124_v15 = vadd.f32 %v185_v13, %v166_v8  ;;  %v115_v16 = vpop.f32.mrb[3].mxu0 }
 0x113   :  { %v173_v17 = vpack.c.bf16 %v113_v12, %v113_v12  ;;  %v116_v18 = vadd.f32 %v166_v8, %v115_v16 }
 0x114   :  { %146 = vst.msk [vmem:[#allocation8 + $0x8] sm:$0xf] %vm143_vm2, %v175_v14  ;;  %v176_v19 = vpack.c.bf16 %v124_v15, %v124_v15 }
 0x115   :  { %144 = vst.msk [vmem:[#allocation8] sm:$0xf] %vm143_vm2, %v173_v17  ;;  %v174_v20 = vpack.c.bf16 %v116_v18, %v116_v18 }
 0x116   :  { %147 = vst.msk [vmem:[#allocation8 + $0xc] sm:$0xf] %vm143_vm2, %v176_v19 }
 0x117   :  { %145 = vst.msk [vmem:[#allocation8 + $0x4] sm:$0xf] %vm143_vm2, %v174_v20 }
 0x118   :  { %272 = shalt.err (!%p269_p0)
}
 0x119   :  { %s273_s26 = scalar_lea.hbm %s379_s3, 256 }
 0x11a   :  { %p274_p1 = scmp.ne.s32.totalorder %s379_s3, %s273_s26  ;;  %p277_p2 = scmp.lt.u32.totalorder %s273_s26, %s379_s3 }
 0x11c   :  { %p279_p3 = pnand %p277_p2, %p274_p1 }
 0x11e   :  { %282 = shalt.err (!%p279_p3)
}
 0x11f   :  { %s295_s4 = smov 64   ;;  %s296_s5 = smov 4  }
 0x120   :  { %159 = dma.vmem_to_hbm [thread:$0]  %s154_s22, 256, %s379_s3, [#allocation4], %s295_s4, %s295_s4, %s296_s5  }
 0x121   :  { %287 = dma.done.wait [#allocation4], 256  }
 0x122   :  { %288 = vsyncadd [#allocation4], 4294967040 }
 0x123   :  { %163 = vsyncpa [#allocation3], 1 }
 0x124   :  { %164 = vsyncpa [#allocation6], 1 }
 0x125   :  { %165 = vsyncpa [#allocation4], 1 }

// kernel: transformer_decoder_forward.10
= control target key start
LH: loop header
LB: loop body
LE: loop exit
PB: predicated region body
PF: predicated region fallthrough
CT: control target
= control target key end

     0   :  { %s2443_s0 = inlined_call_operand.hbm [shape: bf16[2,16,32], index: 0, kind: input, shape index: {}]   ;;  %s2444_s1 = inlined_call_operand.hbm [shape: bf16[2,16,96], index: 1, kind: input, shape index: {}, may-alias: {1,2}]   ;;  %s2445_s2 = inlined_call_operand.hbm [shape: bf16[2,16,96], index: 2, kind: input, shape index: {}, may-alias: {1,2}]   ;;  %s2446_s3 = inlined_call_operand.hbm [shape: bf16[32,32], index: 3, kind: input, shape index: {}]   ;;  %s2447_s4 = inlined_call_operand.hbm [shape: f32[1,32], index: 4, kind: input, shape index: {}]   ;;  %s2448_s5 = inlined_call_operand.hbm [shape: f32[1,32], index: 5, kind: input, shape index: {}]   ;;  %s2449_s6 = inlined_call_operand.hbm [shape: f32[1,32], index: 6, kind: input, shape index: {}]   ;;  %s2450_s7 = inlined_call_operand.hbm [shape: bf16[2,16,32], index: 7, kind: output, shape index: {}]  }
   0x1   :  { %2477 = sst [smem:[#allocation28_spill]] %s2444_s1 }
   0x2   :  { %2478 = sst [smem:[#allocation29_spill]] %s2446_s3 }
   0x3   :  { %2479 = sst [smem:[#allocation30_spill]] %s2448_s5 }
   0x4   :  { %2480 = sst [smem:[#allocation31_spill]] %s2450_s7 }
   0x5   :  { %12 = vsyncpa [#allocation3], 0 }
   0x6   :  { %14 = vsyncpa [#allocation3 + $0x1], 0 }
   0x7   :  { %15 = vsyncpa [#allocation6], 0 }
   0x8   :  { %17 = vsyncpa [#allocation6 + $0x1], 0 }
   0x9   :  { %18 = vsyncpa [#allocation9], 0 }
   0xa   :  { %19 = vsyncpa [#allocation12], 0 }
   0xb   :  { %20 = vsyncpa [#allocation4], 0 }
   0xc   :  { %22 = vsyncpa [#allocation4 + $0x1], 0  ;;  %s1966_s24 = smov 0   ;;  %s1968_s25 = smov 0  }
   0xd   :  { %s1970_s26 = smov 0   ;;  %s1972_s27 = smov 0  }
   0xe   :  { %s1974_s28 = smov 0   ;;  %s1976_s29 = smov 0  }
   0xf LB: > { %2481 = sst [smem:[#allocation20_spill]] %s1877_s24  ;;  %s1997_s30 = sadd.s32 4294967295, %s1897_s29   ;;  %s1897_s29 = sphi %s1976_s29, %s28_s29   ;;  %s1893_s28 = sphi %s1974_s28, %s2525_s28   ;;  %s1889_s27 = sphi %s1972_s27, %s2524_s27   ;;  %s1885_s26 = sphi %s1970_s26, %s2528_s26   ;;  %s1881_s25 = sphi %s1968_s25, %s2527_s25   ;;  %s1877_s24 = sphi %s1966_s24, %s2526_s24  }
  0x10   : > { %2482 = sst [smem:[#allocation21_spill]] %s1889_s27  ;;  %s1296_s8 = sadd.s32 4294967294, %s1897_s29  }
  0x11   : > { %2483 = sst [smem:[#allocation22_spill]] %s1893_s28  ;;  %p62_p0 = scmp.ne.s32.totalorder %s1881_s25, %s1877_s24 }
  0x12   : > { %2484 = sst [smem:[#allocation23_spill]] %s1897_s29  ;;  %p2451_p1 = scmp.eq.s32.totalorder %s1997_s30, 0 }
  0x13   : > { %p232_p3 = scmp.eq.s32.totalorder %s1296_s8, 1  ;;  %p1297_p5 = scmp.ge.s32.totalorder %s1897_s29, 1 }
  0x14   : > { %p2006_p4 = por %p2451_p1, %p62_p0  ;;  %p239_p7 = scmp.lt.s32.totalorder %s1897_s29, 3 }
  0x15   : > { %p2011_p6 = por %p232_p3, %p62_p0  ;;  %s1899_s12 = smov [#allocation8]  }
  0x16   : > { %s2485_s9 = scalar_select %p2006_p4, 1, 0 }
  0x17   : > { %s2486_s10 = scalar_select %p2011_p6, 1, 0 }
  0x18   : > { %p2016_p8 = pnand %p1297_p5, %p239_p7  ;;  %s251_s13 = sshll.u32 %s1899_s12, 4  ;;  %s2020_s13 = int_to_ptr.vmem [resolvable:$true] %s251_s13 }
  0x19   : > { %2487 = sst [smem:[#allocation24_spill]] %s2486_s10  ;;  %s1900_s15 = smov [#allocation11]  }
  0x1a   : > { %s2488_s11 = scalar_select %p2016_p8, 1, 0 }
  0x1b   : > { %p1453_p9 = pneg %p2016_p8  ;;  %s276_s16 = sshll.u32 %s1900_s15, 4  ;;  %s2031_s16 = int_to_ptr.vmem [resolvable:$true] %s276_s16 }
  0x1c   : > { %s2490_s3 = sld [smem:[#allocation29_spill]] }
  0x1d   : > { %p2027_p11 = pnand %p1453_p9, %p2451_p1 }
  0x1f   : > { %s2489_s14 = scalar_select %p2027_p11, 1, 0 }
  0x20   : > { %p2041_p13 = pneg %p2027_p11 }
  0x22   : > { %s1601_s19 = scalar_lea.hbm %s2490_s3, 256 }
  0x23   : > { %p1602_p12 = scmp.ne.s32.totalorder %s2490_s3, %s1601_s19  ;;  %p1608_p5 = scmp.lt.u32.totalorder %s1601_s19, %s2490_s3 }
  0x24   : > { %s2491_s22 = scalar_select %p2041_p13, 1, 0 }
  0x25   : > { %p1604_p0 = pnand %p2041_p13, %p1602_p12 }
  0x27   : > { %p1605_p3 = pneg %p1604_p0 }
  0x29   : > { %p1610_p7 = pnand %p1608_p5, %p1605_p3 }
  0x2b   : > { %1613 = shalt.err (!%p1610_p7)
}
  0x2c   : > { %s1614_s12 = scalar_lea.vmem %s2020_s13, 256  ;;  %p1622_p2 = scmp.lt.s32.totalorder %s2020_s13, %s2020_s13 }
  0x2d   : > { %p1615_p9 = scmp.ne.s32.totalorder %s2020_s13, %s1614_s12  ;;  %p1623_p6 = scmp.lt.s32.totalorder %s1614_s12, %s1614_s12 }
  0x2f   : > { %p1617_p10 = pnand %p1615_p9, %p2041_p13  ;;  %p1624_p12 = por %p1623_p6, %p1622_p2 }
  0x31   : > { %p1618_p1 = pneg %p1617_p10 }
  0x33   : > { %p1625_p0 = pnand %p1624_p12, %p1618_p1 }
  0x35   : > { %1628 = shalt.err (!%p1625_p0)
}
  0x36   : > { %s2454_s15 = smov 64   ;;  %s2456_s17 = smov 4  }
  0x37   : > { %1456 = dma.hbm_to_vmem [thread:$0]  (!%p2027_p11), %s2490_s3, 256, %s2020_s13, [#allocation9], %s2454_s15, %s2454_s15, %s2456_s17  }
  0x38   : > { %s2492_s5 = sld [smem:[#allocation30_spill]] }
  0x3e   : > { %s1629_s23 = scalar_lea.hbm %s2492_s5, 16 }
  0x3f   : > { %p1630_p1 = scmp.ne.s32.totalorder %s2492_s5, %s1629_s23  ;;  %p1636_p10 = scmp.lt.u32.totalorder %s1629_s23, %s2492_s5 }
  0x41   : > { %p1632_p2 = pnand %p1630_p1, %p2041_p13 }
  0x43   : > { %p1633_p6 = pneg %p1632_p2 }
  0x45   : > { %p1638_p3 = pnand %p1636_p10, %p1633_p6 }
  0x47   : > { %1641 = shalt.err (!%p1638_p3)
}
  0x48   : > { %s1642_s13 = scalar_lea.vmem %s2031_s16, 16  ;;  %s1649_s18 = scalar_lea.vmem %s2031_s16, 32 }
  0x49   : > { %p1643_p5 = scmp.ne.s32.totalorder %s2031_s16, %s1642_s13  ;;  %p1650_p12 = scmp.lt.s32.totalorder %s2031_s16, %s2031_s16 }
  0x4a   : > { %p1651_p0 = scmp.lt.s32.totalorder %s1649_s18, %s1642_s13 }
  0x4b   : > { %p1645_p7 = pnand %p1643_p5, %p2041_p13 }
  0x4c   : > { %p1652_p1 = por %p1651_p0, %p1650_p12 }
  0x4d   : > { %p1646_p9 = pneg %p1645_p7 }
  0x4f   : > { %p1653_p2 = pnand %p1652_p1, %p1646_p9 }
  0x51   : > { %1656 = shalt.err (!%p1653_p2)
}
  0x52   : > { %1462 = dma.hbm_to_vmem [thread:$0]  (!%p2027_p11), %s2492_s5, 16, %s2031_s16, [#allocation12]  }
  0x53   : > { %s40_s19 = sadd.s32 1, %s1893_s28  ;;  %s49_s20 = sadd.s32 1, %s1885_s26 }
  0x54   : > { %p42_p6 = scmp.ge.s32.totalorder %s40_s19, 2  ;;  %p56_p10 = scmp.ne.s32.totalorder %s1885_s26, %s1881_s25 }
  0x55   : > { %p57_p3 = scmp.eq.s32.totalorder %s1897_s29, 0  ;;  %p1484_p5 = scmp.lt.s32.totalorder %s1897_s29, 2 }
  0x56   : > { %s2530_s19 = smov (%p42_p6, %s40_s19), 0  ;;  %p2494_p9 = scmp.eq.s32.totalorder %s1997_s30, 1 }
  0x57   : > { %2493 = sst [smem:[#allocation25_spill]] %s2530_s19  ;;  %p58_p7 = por %p57_p3, %p56_p10 }
  0x58   : > { %p2099_p12 = por %p2494_p9, %p56_p10  ;;  %s44_s23 = ssub.s32 %s1893_s28, %s2530_s19 }
  0x59   : > { %s2458_s8 = sand.u32 1, %s1885_s26   ;;  %p47_p0 = scmp.eq.s32.totalorder %s44_s23, 0 }
  0x5a   : > { %s2495_s21 = scalar_select %p2099_p12, 1, 0 }
  0x5b   : > { %s2108_s16 = sshll.u32 %s2458_s8, 3  ;;  %s2111_s12 = sshll.u32 %s1893_s28, 7 }
  0x5c   : > { %2496 = sst [smem:[#allocation26_spill]] %s2495_s21  ;;  %p2113_p1 = pnand %p1484_p5, %p58_p7 }
  0x5d   : > { %s2118_s18 = scalar_select %p47_p0, %s1885_s26, %s49_s20  }
  0x5e   : > { %s2497_s13 = scalar_select %p2113_p1, 1, 0 }
  0x5f   : > { %2498 = sst [smem:[#allocation27_spill]] %s2118_s18  ;;  %s321_s24 = sand.u32 1, %s1897_s29  }
  0x60   : > { %s2499_s1 = sld [smem:[#allocation28_spill]]  ;;  %s325_s23 = scalar_lea.vmem [#allocation5], %s2108_s16 }
  0x61   : > { %s334_s8 = sshll.u32 %s325_s23, 4  ;;  %s2130_s3 = scalar_lea.sflag [#allocation6], %s321_s24  ;;  %s2128_s8 = int_to_ptr.vmem [resolvable:$true] %s334_s8 }
  0x62   : > { %p2136_p6 = pneg %p2113_p1 }
  0x64   : > { %s2500_s20 = scalar_select %p2136_p6, 1, 0 }
  0x66   : > { %s2125_s17 = scalar_lea.hbm %s2499_s1, %s2111_s12  ;;  %s1662_s19 = scalar_lea.hbm %s2499_s1, 256 }
  0x67   : > { %s1657_s5 = scalar_lea.hbm %s2125_s17, 128  ;;  %p1663_p5 = scmp.lt.u32.totalorder %s2125_s17, %s2499_s1 }
  0x68   : > { %p1658_p2 = scmp.ne.s32.totalorder %s2125_s17, %s1657_s5  ;;  %p1664_p7 = scmp.lt.u32.totalorder %s1662_s19, %s1657_s5 }
  0x69   : > { %p1666_p0 = scmp.lt.u32.totalorder %s1657_s5, %s2125_s17 }
  0x6a   : > { %p1660_p10 = pnand %p2136_p6, %p1658_p2  ;;  %p1665_p9 = por %p1664_p7, %p1663_p5 }
  0x6c   : > { %p1661_p3 = pneg %p1660_p10  ;;  %p1667_p12 = por %p1666_p0, %p1665_p9 }
  0x6e   : > { %p1668_p4 = pnand %p1667_p12, %p1661_p3 }
  0x70   : > { %1671 = shalt.err (!%p1668_p4)
}
  0x71   : > { %s1672_s24 = scalar_lea.vmem %s2128_s8, 128  ;;  %s1903_s15 = smov [#allocation5]  }
  0x72   : > { %p1673_p2 = scmp.ne.s32.totalorder %s2128_s8, %s1672_s24  ;;  %s1677_s10 = sshll.u32 %s1903_s15, 4  ;;  %s1678_s10 = int_to_ptr.vmem [resolvable:$false] %s1677_s10 }
  0x73   : > { %s1679_s28 = scalar_lea.vmem %s1678_s10, 256  ;;  %p1680_p11 = scmp.lt.s32.totalorder %s2128_s8, %s1678_s10 }
  0x74   : > { %p1675_p10 = pnand %p1673_p2, %p2136_p6  ;;  %p1681_p13 = scmp.lt.s32.totalorder %s1679_s28, %s1672_s24 }
  0x76   : > { %p1676_p8 = pneg %p1675_p10  ;;  %p1682_p5 = por %p1681_p13, %p1680_p11 }
  0x78   : > { %p1683_p7 = pnand %p1682_p5, %p1676_p8 }
  0x7a   : > { %1686 = shalt.err (!%p1683_p7)
}
  0x7b   : > { %s2501_s5 = smov 4   ;;  %s2502_s19 = smov 64  }
  0x7c   : > { %1472 = dma.hbm_to_vmem [thread:$0]  (!%p2113_p1), %s2125_s17, 128, %s2128_s8, %s2130_s3, %s2502_s19, %s2502_s19, %s2501_s5  }
  0x7d   : > { %s1904_s23 = smov [#allocation10]   ;;  %s1905_s15 = smov [#allocation13]  }
  0x7e   : > { %s265_s1 = sshll.u32 %s1904_s23, 4  ;;  %s287_s18 = sshll.u32 %s1905_s15, 4  ;;  %s266_s1 = int_to_ptr.vmem [resolvable:$true] %s265_s1  ;;  %s288_s18 = int_to_ptr.vmem [resolvable:$true] %s287_s18 }
  0x7f   : > { %s1687_s28 = scalar_lea.hbm %s2447_s4, 16  ;;  %p2503_p8 = scmp.ne.s32.totalorder %s2491_s22, 0 }
  0x80   : > { %p1688_p4 = scmp.ne.s32.totalorder %s2447_s4, %s1687_s28  ;;  %p1694_p12 = scmp.lt.u32.totalorder %s1687_s28, %s2447_s4 }
  0x82   : > { %p1690_p11 = pnand %p1688_p4, %p2503_p8 }
  0x84   : > { %p1691_p13 = pneg %p1690_p11 }
  0x86   : > { %p1696_p3 = pnand %p1694_p12, %p1691_p13 }
  0x88   : > { %1699 = shalt.err (!%p1696_p3)
}
  0x89   : > { %s1700_s17 = scalar_lea.vmem %s266_s1, 16  ;;  %s1707_s8 = scalar_lea.vmem %s266_s1, 32 }
  0x8a   : > { %p1701_p9 = scmp.ne.s32.totalorder %s266_s1, %s1700_s17  ;;  %p1708_p10 = scmp.lt.s32.totalorder %s266_s1, %s266_s1 }
  0x8b   : > { %p1709_p5 = scmp.lt.s32.totalorder %s1707_s8, %s1700_s17 }
  0x8c   : > { %p1703_p0 = pnand %p1701_p9, %p2503_p8 }
  0x8d   : > { %p1710_p7 = por %p1709_p5, %p1708_p10 }
  0x8e   : > { %p1704_p2 = pneg %p1703_p0 }
  0x90   : > { %p1711_p1 = pnand %p1710_p7, %p1704_p2 }
  0x92   : > { %1714 = shalt.err (!%p1711_p1)
}
  0x93   : > { %p2504_p4 = scmp.ne.s32.totalorder %s2489_s14, 0  ;;  %s1715_s23 = scalar_lea.hbm %s2449_s6, 16 }
  0x94   : > { %p1716_p11 = scmp.ne.s32.totalorder %s2449_s6, %s1715_s23  ;;  %p1722_p1 = scmp.lt.u32.totalorder %s1715_s23, %s2449_s6 }
  0x95   : > { %1459 = dma.hbm_to_vmem [thread:$0]  (!%p2504_p4), %s2447_s4, 16, %s266_s1, [#allocation9]  }
  0x96   : > { %p1718_p13 = pnand %p1716_p11, %p2503_p8 }
  0x98   : > { %p1719_p12 = pneg %p1718_p13 }
  0x9a   : > { %p1724_p3 = pnand %p1722_p1, %p1719_p12 }
  0x9c   : > { %1727 = shalt.err (!%p1724_p3)
}
  0x9d   : > { %s1728_s17 = scalar_lea.vmem %s288_s18, 16  ;;  %s1735_s1 = scalar_lea.vmem %s288_s18, 32 }
  0x9e   : > { %p1729_p9 = scmp.ne.s32.totalorder %s288_s18, %s1728_s17  ;;  %p1736_p10 = scmp.lt.s32.totalorder %s288_s18, %s288_s18 }
  0x9f   : > { %p1737_p5 = scmp.lt.s32.totalorder %s1735_s1, %s1728_s17 }
  0xa0   : > { %p1731_p0 = pnand %p1729_p9, %p2503_p8 }
  0xa1   : > { %p1738_p7 = por %p1737_p5, %p1736_p10 }
  0xa2   : > { %p1732_p2 = pneg %p1731_p0 }
  0xa4   : > { %p1739_p6 = pnand %p1738_p7, %p1732_p2 }
  0xa6   : > { %1742 = shalt.err (!%p1739_p6)
}
  0xa7   : > { %1465 = dma.hbm_to_vmem [thread:$0]  (!%p2504_p4), %s2449_s6, 16, %s288_s18, [#allocation12]  }
  0xa8   : > { %s2203_s27 = scalar_lea.hbm %s2443_s0, %s2111_s12  ;;  %s302_s21 = scalar_lea.vmem [#allocation2], %s2108_s16 }
  0xa9   : > { %s311_s14 = sshll.u32 %s302_s21, 4  ;;  %s2212_s10 = scalar_lea.hbm %s2445_s2, %s2111_s12  ;;  %s2206_s14 = int_to_ptr.vmem [resolvable:$true] %s311_s14 }
  0xaa   : > { %s2505_s24 = sand.u32 1, %s1885_s26   ;;  %s1743_s28 = scalar_lea.hbm %s2203_s27, 128 }
  0xab   : > { %s2216_s18 = scalar_lea.sflag [#allocation3], %s2505_s24  ;;  %p1744_p6 = scmp.ne.s32.totalorder %s2203_s27, %s1743_s28 }
  0xac   : > { %p2506_p8 = scmp.ne.s32.totalorder %s2500_s20, 0  ;;  %s1748_s8 = scalar_lea.hbm %s2443_s0, 256 }
  0xad   : > { %p1749_p13 = scmp.lt.u32.totalorder %s2203_s27, %s2443_s0  ;;  %p1750_p12 = scmp.lt.u32.totalorder %s1748_s8, %s1743_s28 }
  0xae   : > { %p1746_p4 = pnand %p1744_p6, %p2506_p8  ;;  %p1752_p3 = scmp.lt.u32.totalorder %s1743_s28, %s2203_s27 }
  0xaf   : > { %p1751_p1 = por %p1750_p12, %p1749_p13 }
  0xb0   : > { %p1747_p11 = pneg %p1746_p4 }
  0xb1   : > { %p1753_p9 = por %p1752_p3, %p1751_p1 }
  0xb3   : > { %p1754_p0 = pnand %p1753_p9, %p1747_p11 }
  0xb5   : > { %1757 = shalt.err (!%p1754_p0)
}
  0xb6   : > { %s1758_s12 = scalar_lea.vmem %s2206_s14, 128  ;;  %s1906_s29 = smov [#allocation2]  }
  0xb7   : > { %p1759_p2 = scmp.ne.s32.totalorder %s2206_s14, %s1758_s12  ;;  %s1763_s21 = sshll.u32 %s1906_s29, 4  ;;  %s1764_s21 = int_to_ptr.vmem [resolvable:$false] %s1763_s21 }
  0xb8   : > { %s1765_s23 = scalar_lea.vmem %s1764_s21, 256  ;;  %p1766_p7 = scmp.lt.s32.totalorder %s2206_s14, %s1764_s21 }
  0xb9   : > { %p1761_p10 = pnand %p1759_p2, %p2506_p8  ;;  %p1767_p6 = scmp.lt.s32.totalorder %s1765_s23, %s1758_s12 }
  0xbb   : > { %p1762_p5 = pneg %p1761_p10  ;;  %p1768_p4 = por %p1767_p6, %p1766_p7 }
  0xbd   : > { %p1769_p13 = pnand %p1768_p4, %p1762_p5 }
  0xbf   : > { %1772 = shalt.err (!%p1769_p13)
}
  0xc0   : > { %p2507_p11 = scmp.ne.s32.totalorder %s2497_s13, 0  ;;  %s348_s15 = scalar_lea.vmem [#allocation7], %s2108_s16 }
  0xc1   : > { %s355_s24 = sshll.u32 %s348_s15, 4  ;;  %s1773_s28 = scalar_lea.hbm %s2212_s10, 128  ;;  %s2244_s24 = int_to_ptr.vmem [resolvable:$true] %s355_s24 }
  0xc2   : > { %1469 = dma.hbm_to_vmem [thread:$0]  (!%p2507_p11), %s2203_s27, 128, %s2206_s14, %s2216_s18, %s2502_s19, %s2502_s19, %s2501_s5  }
  0xc3   : > { %p1774_p12 = scmp.ne.s32.totalorder %s2212_s10, %s1773_s28  ;;  %s1778_s8 = scalar_lea.hbm %s2445_s2, 256 }
  0xc4   : > { %p1779_p9 = scmp.lt.u32.totalorder %s2212_s10, %s2445_s2  ;;  %p1780_p0 = scmp.lt.u32.totalorder %s1778_s8, %s1773_s28 }
  0xc5   : > { %p1776_p1 = pnand %p1774_p12, %p2506_p8  ;;  %p1782_p10 = scmp.lt.u32.totalorder %s1773_s28, %s2212_s10 }
  0xc6   : > { %p1781_p2 = por %p1780_p0, %p1779_p9 }
  0xc7   : > { %p1777_p3 = pneg %p1776_p1 }
  0xc8   : > { %p1783_p5 = por %p1782_p10, %p1781_p2 }
  0xca   : > { %p1784_p7 = pnand %p1783_p5, %p1777_p3 }
  0xcc   : > { %1787 = shalt.err (!%p1784_p7)
}
  0xcd   : > { %s1788_s16 = scalar_lea.vmem %s2244_s24, 128  ;;  %s1907_s27 = smov [#allocation7]  }
  0xce   : > { %p1789_p6 = scmp.ne.s32.totalorder %s2244_s24, %s1788_s16  ;;  %s1793_s14 = sshll.u32 %s1907_s27, 4  ;;  %s1794_s14 = int_to_ptr.vmem [resolvable:$false] %s1793_s14 }
  0xcf   : > { %s1795_s18 = scalar_lea.vmem %s1794_s14, 256  ;;  %p1796_p12 = scmp.lt.s32.totalorder %s2244_s24, %s1794_s14 }
  0xd0   : > { %p1791_p4 = pnand %p1789_p6, %p2506_p8  ;;  %p1797_p1 = scmp.lt.s32.totalorder %s1795_s18, %s1788_s16 }
  0xd2   : > { %p1792_p13 = pneg %p1791_p4  ;;  %p1798_p9 = por %p1797_p1, %p1796_p12 }
  0xd4   : > { %p1799_p0 = pnand %p1798_p9, %p1792_p13 }
  0xd6   : > { %1802 = shalt.err (!%p1799_p0)
}
  0xd7   : > { %1475 = dma.hbm_to_vmem [thread:$0]  (!%p2507_p11), %s2212_s10, 128, %s2244_s24, %s2130_s3, %s2502_s19, %s2502_s19, %s2501_s5  }
  0xd8   : > { %p2508_p8 = scmp.ne.s32.totalorder %s2488_s11, 0 }
  0xd9   : > { %s2274_s20 = sand.u32 (!%p2508_p8), 1, %s1881_s25   ;;  %p2509_p3 = scmp.ne.s32.totalorder (!%p2508_p8), %s2485_s9, 0 }
  0xda   : > { %367 = sbr.rel (%p2508_p8) target bundleno = 2334 (0x91e), region = 48  ;;  %s2277_s12 = sshll.u32 (!%p2508_p8), %s2274_s20, 3 }
  0xdb   : > { %s370_s13 = scalar_lea.sflag (!%p2508_p8), [#allocation3], %s2274_s20  ;;  %s373_s29 = scalar_lea.vmem (!%p2508_p8), [#allocation2], %s2277_s12 }
  0xe1   : > { %1856 = dma.done.wait (%p2509_p3), %s370_s13, 128  }
  0xe2   : > { %1858 = vsyncadd (%p2509_p3), %s370_s13, 4294967168  ;;  %s378_s3 = sand.u32 1, %s1997_s30   ;;  %s382_s5 = scalar_lea.vmem [#allocation5], %s2277_s12 }
  0xe3   : > { %s379_s11 = scalar_lea.sflag [#allocation6], %s378_s3 }
  0xe4   : > { %1860 = dma.done.wait (%p2509_p3), %s379_s11, 256  }
  0xe5   : > { %1862 = vsyncadd (%p2509_p3), %s379_s11, 4294967040  ;;  %s391_s19 = scalar_lea.vmem [#allocation7], %s2277_s12  ;;  %p2510_p11 = scmp.eq.s32.totalorder %s1997_s30, 0 }
  0xe7   : > { %1864 = dma.done.wait (%p2510_p11), [#allocation9], 272   ;;  %p2511_p2 = pmov %p2510_p11 }
  0xe9   : > { %1866 = vsyncadd (%p2511_p2), [#allocation9], 4294967024  ;;  %p2512_p10 = pmov %p2511_p2 }
  0xea   : > { %p2513_p5 = pmov %p2511_p2 }
  0xeb   : > { %1868 = dma.done.wait (%p2512_p10), [#allocation12], 32  }
  0xec   : > { %1870 = vsyncadd (%p2513_p5), [#allocation12], 4294967264  ;;  %v1908_v0 = vmov 0.0   ;;  %vm1909_vm0 = vmmov 0   ;;  %v2306_v1 = vld [vmem:[%s391_s19] sm:$0xff]   ;;  %s1910_s9 = smov 96  }
  0xed   : > { %1373 = vmatprep.subr.bf16.mxu0 %v1908_v0  ;;  %1375 = vmatprep.mubr.msk.bf16.mxu0 %vm1909_vm0, %v1908_v0  ;;  %vm468_vm1 = vcmask 64512   ;;  %v1562_v4 = vld [vmem:[%s382_s5] sm:$0xff]   ;;  %vm518_vm2 = vcmask 130048   ;;  %s1911_s30 = smov 64   ;;  %s1912_s10 = smov 80   ;;  %vm976_vm3 = vcmask 195584  }
  0xee   : > { %1379 = vmatprep.subr.bf16.mxu1 %v1908_v0  ;;  %1381 = vmatprep.mubr.msk.bf16.mxu1 %vm1909_vm0, %v1908_v0  ;;  %s1913_s21 = smov 88   ;;  %s1914_s23 = smov 120   ;;  %vm1002_vm4 = vcmask 261120   ;;  %vm1105_vm5 = vcmask 257024  }
  0xef   : > { %466 = vrot.lane.b32.xlu0 %v2306_v1, %s1910_s9  ;;  %s1915_s15 = smov 112   ;;  %s1916_s24 = smov 72  }
  0xf0   : > { %s1917_s28 = smov 104   ;;  %s1918_s17 = smov 56  }
  0xf1   : > { %s1919_s1 = smov 40   ;;  %s1920_s8 = smov 48  }
  0xf2   : > { %s1921_s7 = smov 8   ;;  %s1922_s22 = smov 16  }
  0xf3   : > { %s1923_s16 = smov 24   ;;  %s2514_s27 = sld [smem:[#allocation21_spill]] }
  0xf4   : > { %s2515_s14 = sld [smem:[#allocation26_spill]]  ;;  %s447_s13 = scalar_lea.vmem [#allocation14], %s2277_s12 }
  0xf5   : > { %s2516_s5 = sld [smem:[#allocation31_spill]]  ;;  %s1109_s9 = scalar_lea.sflag [#allocation4], %s2274_s20 }
  0xf6   : > { %s1924_s12 = smov [#allocation14]  }
  0xf9   : > { %s1349_s18 = sshll.u32 %s2514_s27, 7 }
  0xfa   : > { %p2517_p6 = scmp.ne.s32.totalorder %s2515_s14, 0 }
  0xfb   : > { %s2390_s19 = scalar_lea.hbm %s2516_s5, %s1349_s18 }
 0x161   : > { %v467_v2 = vpop.permute.xlu0 %466 }
 0x162   : > { %v473_v3 = vsel %vm468_vm1, %v467_v2, 0 }
 0x163   : > { %1374 = vmatpush3.bf16.xpose.msra.mxu0 %v473_v3 }
 0x164   : > { %1391 = vmatprep.subr.bf16.mxu0 %v1908_v0 }
 0x16a   : > { %1376 = vmatmul.mubr.msk.bf16.vlgmr.msra.gmra.mrb[0].mxu0 %vm468_vm1, %v1562_v4 }
 0x16b   : > { %1393 = vmatprep.mubr.msk.bf16.mxu0 %vm1909_vm0, %v1908_v0 }
 0x23d   : > { %v509_v5 = vpop.f32.mrb[0].mxu0 }
 0x23e   : > { %v516_v6 = vmul.f32 0.35355338, %v509_v5  ;;  %v1377_v7 = vpop.f32.mrb[1].mxu0 }
 0x23f   : > { %v512_v8 = vpop.f32.mrb[2].mxu0 }
 0x240   : > { %v517_v9 = vmul.f32 0.35355338, %v512_v8  ;;  %v1378_v10 = vpop.f32.mrb[3].mxu0  ;;  %v519_v11 = vsel %vm518_vm2, %v516_v6, -inf }
 0x241   : > { %520 = vmax.xlane.f32.xlu0 %v519_v11 }
 0x242   : > { %v522_v12 = vsel %vm518_vm2, %v517_v9, -inf }
 0x243   : > { %523 = vmax.xlane.f32.xlu1 %v522_v12 }
 0x254   : > { %542 = vrot.lane.b32.xlu1 %v2306_v1, %s1911_s30 }
 0x257   : > { %716 = vrot.lane.b32.xlu0 %v2306_v1, %s1912_s10 }
 0x2ce   : > { %v521_v13 = vpop.xlane.xlu0 %520 }
 0x2cf   : > { %v525_v14 = vsub.f32 %v516_v6, %v521_v13 }
 0x2d0   : > { %v524_v15 = vpop.xlane.xlu1 %523 }
 0x2d1   : > { %v527_v16 = vmul.f32 1.442695, %v525_v14  ;;  %v526_v17 = vsub.f32 %v517_v9, %v524_v15 }
 0x2d2   : > { %v717_v34 = vpop.permute.xlu0 %716 }
 0x2d3   : > { %1565 = vpow2.f32 %v527_v16  ;;  %v529_v18 = vmul.f32 1.442695, %v526_v17  ;;  %v722_v36 = vsel %vm468_vm1, %v717_v34, 0 }
 0x2d4   : > { %v543_v19 = vpop.permute.xlu1 %542 }
 0x2d5   : > { %1567 = vpow2.f32 %v529_v18  ;;  %1380 = vmatpush3.bf16.msra.mxu1 %v543_v19 }
 0x2d6   : > { %1385 = vmatprep.subr.bf16.mxu1 %v1908_v0 }
 0x2dd   : > { %v1566_v20 = vpop.eup %1565 }
 0x2de   : > { %v531_v21 = vsel %vm518_vm2, %v1566_v20, 0.0 }
 0x2df   : > { %v1568_v22 = vpop.eup %1567  ;;  %532 = vadd.xlane.f32.xlu1 %v531_v21 }
 0x2e0   : > { %v534_v23 = vsel %vm518_vm2, %v1568_v22, 0.0 }
 0x2e3   : > { %535 = vadd.xlane.f32.xlu1 %v534_v23 }
 0x2f4   : > { %592 = vrot.lane.b32.xlu1 %v2306_v1, %s1913_s21  ;;  %s1807_s21 = sshll.u32 %s1924_s12, 4  ;;  %s1808_s21 = int_to_ptr.vmem [resolvable:$false] %s1807_s21 }
 0x2f8   : > { %590 = vrot.lane.b32.xlu1 %v1562_v4, %s1914_s23  ;;  %s1809_s23 = scalar_lea.vmem %s1808_s21, 256 }
 0x2fc   : > { %714 = vrot.lane.b32.xlu1 %v1562_v4, %s1915_s15 }
 0x300   : > { %840 = vrot.lane.b32.xlu1 %v2306_v1, %s1916_s24 }
 0x304   : > { %838 = vrot.lane.b32.xlu1 %v1562_v4, %s1917_s28 }
 0x36c   : > { %v533_v24 = vpop.xlane.xlu1 %532 }
 0x36d   : > { %1569 = vrcp.f32 %v533_v24 }
 0x370   : > { %v536_v25 = vpop.xlane.xlu1 %535 }
 0x371   : > { %1571 = vrcp.f32 %v536_v25 }
 0x374   : > { %v593_v28 = vpop.permute.xlu1 %592 }
 0x375   : > { %v598_v31 = vsel %vm468_vm1, %v593_v28, 0 }
 0x377   : > { %v1570_v26 = vpop.eup %1569 }
 0x378   : > { %v539_v29 = vmul.f32 %v1570_v26, %v1566_v20  ;;  %v591_v33 = vpop.permute.xlu1 %590 }
 0x37b   : > { %v1572_v27 = vpop.eup %1571 }
 0x37c   : > { %v540_v30 = vmul.f32 %v1572_v27, %v1568_v22  ;;  %v715_v35 = vpop.permute.xlu1 %714 }
 0x37e   : > { %v541_v32 = vpack.c.bf16 %v540_v30, %v539_v29 }
 0x380   : > { %1382 = vmatmul.mubr.msk.bf16.vlgmr.msra.gmra.mrb[0].mxu1 %vm518_vm2, %v541_v32  ;;  %v841_v37 = vpop.permute.xlu1 %840 }
 0x381   : > { %1386 = vmatpush3.bf16.xpose.msra.mxu1 %v598_v31  ;;  %1387 = vmatprep.mubr.msk.bf16.mxu1 %vm1909_vm0, %v1908_v0  ;;  %v846_v38 = vsel %vm468_vm1, %v841_v37, 0 }
 0x382   : > { %1397 = vmatprep.subr.bf16.mxu1 %v1908_v0 }
 0x384   : > { %v839_v39 = vpop.permute.xlu1 %838 }
 0x388   : > { %1388 = vmatmul.mubr.msk.bf16.vlgmr.msra.gmra.mrb[4].mxu1 %vm468_vm1, %v591_v33 }
 0x389   : > { %1398 = vmatpush3.bf16.xpose.msra.mxu1 %v722_v36  ;;  %1399 = vmatprep.mubr.msk.bf16.mxu1 %vm1909_vm0, %v1908_v0 }
 0x38a   : > { %1409 = vmatprep.subr.bf16.mxu1 %v1908_v0 }
 0x390   : > { %1400 = vmatmul.mubr.msk.bf16.vlgmr.msra.gmra.mrb[8].mxu1 %vm468_vm1, %v715_v35 }
 0x391   : > { %1410 = vmatpush3.bf16.xpose.msra.mxu1 %v846_v38  ;;  %1411 = vmatprep.mubr.msk.bf16.mxu1 %vm1909_vm0, %v1908_v0 }
 0x392   : > { %1421 = vmatprep.subr.bf16.mxu1 %v1908_v0 }
 0x398   : > { %1412 = vmatmul.mubr.msk.bf16.vlgmr.msra.gmra.mrb[12].mxu1 %vm468_vm1, %v839_v39 }
 0x399   : > { %1425 = vmatprep.mubr.msk.bf16.mxu1 %vm1909_vm0, %v1908_v0 }
 0x453   : > { %v2342_v40 = vpop.f32.mrb[0].mxu1 }
 0x454   : > { %v1383_v41 = vpop.f32.mrb[1].mxu1 }
 0x455   : > { %v2344_v42 = vpop.f32.mrb[2].mxu1 }
 0x456   : > { %v589_v43 = vpack.c.bf16 %v2344_v42, %v2342_v40  ;;  %v1384_v44 = vpop.f32.mrb[3].mxu1 }
 0x45b   : > { %v634_v45 = vpop.f32.mrb[4].mxu1 }
 0x45c   : > { %v641_v46 = vmul.f32 0.35355338, %v634_v45  ;;  %v1389_v47 = vpop.f32.mrb[5].mxu1 }
 0x45d   : > { %v637_v48 = vpop.f32.mrb[6].mxu1 }
 0x45e   : > { %v642_v49 = vmul.f32 0.35355338, %v637_v48  ;;  %v1390_v50 = vpop.f32.mrb[7].mxu1  ;;  %v643_v51 = vsel %vm518_vm2, %v641_v46, -inf }
 0x45f   : > { %644 = vmax.xlane.f32.xlu1 %v643_v51 }
 0x460   : > { %v646_v52 = vsel %vm518_vm2, %v642_v49, -inf }
 0x461   : > { %647 = vmax.xlane.f32.xlu0 %v646_v52 }
 0x463   : > { %v758_v53 = vpop.f32.mrb[8].mxu1 }
 0x464   : > { %v765_v54 = vmul.f32 0.35355338, %v758_v53  ;;  %v1401_v55 = vpop.f32.mrb[9].mxu1 }
 0x465   : > { %v761_v56 = vpop.f32.mrb[10].mxu1 }
 0x466   : > { %v766_v57 = vmul.f32 0.35355338, %v761_v56  ;;  %v1402_v58 = vpop.f32.mrb[11].mxu1  ;;  %v767_v59 = vsel %vm518_vm2, %v765_v54, -inf }
 0x467   : > { %768 = vmax.xlane.f32.xlu1 %v767_v59 }
 0x468   : > { %v770_v60 = vsel %vm518_vm2, %v766_v57, -inf }
 0x469   : > { %771 = vmax.xlane.f32.xlu0 %v770_v60 }
 0x46b   : > { %v882_v61 = vpop.f32.mrb[12].mxu1 }
 0x46c   : > { %v889_v62 = vmul.f32 0.35355338, %v882_v61  ;;  %v1413_v63 = vpop.f32.mrb[13].mxu1 }
 0x46d   : > { %v885_v2 = vpop.f32.mrb[14].mxu1 }
 0x46e   : > { %v890_v3 = vmul.f32 0.35355338, %v885_v2  ;;  %v1414_v4 = vpop.f32.mrb[15].mxu1  ;;  %v891_v5 = vsel %vm518_vm2, %v889_v62, -inf  ;;  %v1563_v2 = vld [vmem:[#allocation8] sm:$0xff]  }
 0x46f   : > { %892 = vmax.xlane.f32.xlu1 %v891_v5  ;;  %1422 = vmatpush3.bf16.msra.mxu1 %v1563_v2  ;;  %v1564_v5 = vld [vmem:[#allocation8 + $0x8] sm:$0xff]  }
 0x470   : > { %v894_v6 = vsel %vm518_vm2, %v890_v3, -inf  ;;  %1423 = vmatprep.subr.bf16.mxu1 %v1908_v0 }
 0x471   : > { %895 = vmax.xlane.f32.xlu0 %v894_v6 }
 0x473   : > { %1424 = vmatpush3.bf16.msra.mxu1 %v1564_v5 }
 0x480   : > { %666 = vrot.lane.b32.xlu1 %v2306_v1, %s1918_s17 }
 0x4ec   : > { %v645_v7 = vpop.xlane.xlu1 %644 }
 0x4ed   : > { %v649_v8 = vsub.f32 %v641_v46, %v645_v7 }
 0x4ee   : > { %v648_v9 = vpop.xlane.xlu0 %647 }
 0x4ef   : > { %v651_v10 = vmul.f32 1.442695, %v649_v8  ;;  %v650_v11 = vsub.f32 %v642_v49, %v648_v9 }
 0x4f1   : > { %1573 = vpow2.f32 %v651_v10  ;;  %v653_v12 = vmul.f32 1.442695, %v650_v11 }
 0x4f3   : > { %1575 = vpow2.f32 %v653_v12 }
 0x4f4   : > { %v769_v13 = vpop.xlane.xlu1 %768 }
 0x4f5   : > { %v773_v14 = vsub.f32 %v765_v54, %v769_v13 }
 0x4f6   : > { %v772_v15 = vpop.xlane.xlu0 %771 }
 0x4f7   : > { %v775_v16 = vmul.f32 1.442695, %v773_v14  ;;  %v774_v17 = vsub.f32 %v766_v57, %v772_v15 }
 0x4f9   : > { %1577 = vpow2.f32 %v775_v16  ;;  %v777_v18 = vmul.f32 1.442695, %v774_v17 }
 0x4fb   : > { %v1574_v19 = vpop.eup %1573  ;;  %1579 = vpow2.f32 %v777_v18 }
 0x4fc   : > { %v893_v20 = vpop.xlane.xlu1 %892  ;;  %v655_v21 = vsel %vm518_vm2, %v1574_v19, 0.0 }
 0x4fd   : > { %v1576_v22 = vpop.eup %1575  ;;  %v897_v23 = vsub.f32 %v889_v62, %v893_v20  ;;  %656 = vadd.xlane.f32.xlu1 %v655_v21 }
 0x4fe   : > { %v896_v24 = vpop.xlane.xlu0 %895  ;;  %v658_v25 = vsel %vm518_vm2, %v1576_v22, 0.0 }
 0x4ff   : > { %v899_v26 = vmul.f32 1.442695, %v897_v23  ;;  %v898_v27 = vsub.f32 %v890_v3, %v896_v24  ;;  %659 = vadd.xlane.f32.xlu0 %v658_v25  ;;  %v1351_v23 = vld [vmem:[%s373_s29] sm:$0xff]   ;;  %s1124_s29 = sshll.u32 %s447_s13, 4  ;;  %s2392_s29 = int_to_ptr.vmem [resolvable:$true] %s1124_s29 }
 0x500   : > { %v667_v28 = vpop.permute.xlu1 %666  ;;  %v1331_v24 = vld [vmem:[#allocation10] ss:$0 sm:$0xff]  ;;  %v1352_v25 = vunpack.c.l.bf16 %v1351_v23  ;;  %s1803_s10 = scalar_lea.vmem %s2392_s29, 128  ;;  %p1810_p12 = scmp.lt.s32.totalorder %s2392_s29, %s1808_s21 }
 0x501   : > { %1581 = vpow2.f32 %v899_v26  ;;  %v901_v29 = vmul.f32 1.442695, %v898_v27  ;;  %1392 = vmatpush3.bf16.msra.mxu0 %v667_v28  ;;  %p1804_p7 = scmp.ne.s32.totalorder %s2392_s29, %s1803_s10  ;;  %p1811_p1 = scmp.lt.s32.totalorder %s1809_s23, %s1803_s10 }
 0x502   : > { %1403 = vmatprep.subr.bf16.mxu0 %v1908_v0 }
 0x503   : > { %v1578_v30 = vpop.eup %1577  ;;  %1583 = vpow2.f32 %v901_v29  ;;  %v1353_v29 = vunpack.c.h.bf16 %v1351_v23  ;;  %p1805_p4 = pnand %p1804_p7, %p2517_p6  ;;  %p1812_p9 = por %p1811_p1, %p1810_p12 }
 0x504   : > { %v779_v31 = vsel %vm518_vm2, %v1578_v30, 0.0 }
 0x505   : > { %v1580_v32 = vpop.eup %1579  ;;  %780 = vadd.xlane.f32.xlu1 %v779_v31  ;;  %p1806_p13 = pneg %p1805_p4 }
 0x506   : > { %v782_v33 = vsel %vm518_vm2, %v1580_v32, 0.0 }
 0x507   : > { %783 = vadd.xlane.f32.xlu0 %v782_v33  ;;  %p1813_p0 = pnand %p1812_p9, %p1806_p13 }
 0x50b   : > { %v1582_v34 = vpop.eup %1581 }
 0x50c   : > { %v903_v35 = vsel %vm518_vm2, %v1582_v34, 0.0 }
 0x50d   : > { %v1584_v36 = vpop.eup %1583  ;;  %904 = vadd.xlane.f32.xlu1 %v903_v35 }
 0x50e   : > { %v906_v37 = vsel %vm518_vm2, %v1584_v36, 0.0 }
 0x50f   : > { %907 = vadd.xlane.f32.xlu0 %v906_v37 }
 0x51e   : > { %914 = vrot.lane.b32.xlu1 %v2306_v1, %s1919_s1 }
 0x525   : > { %790 = vrot.lane.b32.xlu0 %v2306_v1, %s1920_s8 }
 0x58a   : > { %v657_v38 = vpop.xlane.xlu1 %656 }
 0x58b   : > { %1585 = vrcp.f32 %v657_v38 }
 0x58c   : > { %v660_v39 = vpop.xlane.xlu0 %659 }
 0x58d   : > { %1587 = vrcp.f32 %v660_v39 }
 0x592   : > { %v781_v41 = vpop.xlane.xlu1 %780 }
 0x593   : > { %1589 = vrcp.f32 %v781_v41 }
 0x594   : > { %v784_v44 = vpop.xlane.xlu0 %783 }
 0x595   : > { %v1586_v45 = vpop.eup %1585  ;;  %1591 = vrcp.f32 %v784_v44 }
 0x596   : > { %v663_v47 = vmul.f32 %v1586_v45, %v1574_v19 }
 0x597   : > { %v1588_v46 = vpop.eup %1587 }
 0x598   : > { %v664_v48 = vmul.f32 %v1588_v46, %v1576_v22 }
 0x59a   : > { %v905_v49 = vpop.xlane.xlu1 %904  ;;  %v665_v50 = vpack.c.bf16 %v664_v48, %v663_v47 }
 0x59b   : > { %1593 = vrcp.f32 %v905_v49 }
 0x59c   : > { %v908_v51 = vpop.xlane.xlu0 %907  ;;  %1394 = vmatmul.mubr.msk.bf16.vlgmr.msra.gmra.mrb[4].mxu0 %vm518_vm2, %v665_v50 }
 0x59d   : > { %v1590_v52 = vpop.eup %1589  ;;  %1595 = vrcp.f32 %v908_v51  ;;  %1405 = vmatprep.mubr.msk.bf16.mxu0 %vm1909_vm0, %v1908_v0 }
 0x59e   : > { %v787_v53 = vmul.f32 %v1590_v52, %v1578_v30  ;;  %v915_v57 = vpop.permute.xlu1 %914 }
 0x59f   : > { %v1592_v1 = vpop.eup %1591 }
 0x5a0   : > { %v788_v54 = vmul.f32 %v1592_v1, %v1580_v32  ;;  %v791_v55 = vpop.permute.xlu0 %790 }
 0x5a1   : > { %1404 = vmatpush3.bf16.msra.mxu0 %v791_v55  ;;  %v1336_v55 = vld [vmem:[#allocation13] ss:$0 sm:$0xff] }
 0x5a2   : > { %v789_v56 = vpack.c.bf16 %v788_v54, %v787_v53  ;;  %1415 = vmatprep.subr.bf16.mxu0 %v1908_v0  ;;  %v1335_v53 = vld [vmem:[#allocation11] ss:$0 sm:$0xff] }
 0x5a4   : > { %1406 = vmatmul.mubr.msk.bf16.vlgmr.msra.gmra.mrb[8].mxu0 %vm518_vm2, %v789_v56 }
 0x5a5   : > { %v1594_v58 = vpop.eup %1593  ;;  %1416 = vmatpush3.bf16.msra.mxu0 %v915_v57  ;;  %1417 = vmatprep.mubr.msk.bf16.mxu0 %vm1909_vm0, %v1908_v0 }
 0x5a6   : > { %v911_v60 = vmul.f32 %v1594_v58, %v1582_v34 }
 0x5a7   : > { %v1596_v59 = vpop.eup %1595 }
 0x5a8   : > { %v912_v61 = vmul.f32 %v1596_v59, %v1584_v36 }
 0x5aa   : > { %v913_v62 = vpack.c.bf16 %v912_v61, %v911_v60 }
 0x5ac   : > { %1418 = vmatmul.mubr.msk.bf16.vlgmr.msra.gmra.mrb[12].mxu0 %vm518_vm2, %v913_v62 }
 0x66f   : > { %v706_v63 = vpop.f32.mrb[4].mxu0 }
 0x670   : > { %v1395_v3 = vpop.f32.mrb[5].mxu0 }
 0x671   : > { %v709_v4 = vpop.f32.mrb[6].mxu0 }
 0x672   : > { %v713_v6 = vpack.c.bf16 %v709_v4, %v706_v63  ;;  %v1396_v7 = vpop.f32.mrb[7].mxu0 }
 0x674   : > { %963 = vrot.lane.b32.xlu1 %v713_v6, %s1921_s7 }
 0x677   : > { %v830_v8 = vpop.f32.mrb[8].mxu0 }
 0x678   : > { %v1407_v9 = vpop.f32.mrb[9].mxu0 }
 0x679   : > { %v833_v10 = vpop.f32.mrb[10].mxu0 }
 0x67a   : > { %v837_v11 = vpack.c.bf16 %v833_v10, %v830_v8  ;;  %v1408_v12 = vpop.f32.mrb[11].mxu0 }
 0x67c   : > { %966 = vrot.lane.b32.xlu0 %v837_v11, %s1922_s22 }
 0x67f   : > { %v954_v13 = vpop.f32.mrb[12].mxu0 }
 0x680   : > { %v1419_v14 = vpop.f32.mrb[13].mxu0 }
 0x681   : > { %v957_v15 = vpop.f32.mrb[14].mxu0 }
 0x682   : > { %v961_v16 = vpack.c.bf16 %v957_v15, %v954_v13  ;;  %v1420_v17 = vpop.f32.mrb[15].mxu0 }
 0x684   : > { %969 = vrot.lane.b32.xlu1 %v961_v16, %s1923_s16 }
 0x6e6   : > { %v964_v18 = vpop.permute.xlu1 %963 }
 0x6e7   : > { %v973_v19 = vsel %vm468_vm1, %v589_v43, %v964_v18 }
 0x6ee   : > { %v967_v0 = vpop.permute.xlu0 %966 }
 0x6ef   : > { %v975_v20 = vsel %vm518_vm2, %v973_v19, %v967_v0 }
 0x6f6   : > { %v970_v21 = vpop.permute.xlu1 %969 }
 0x6f7   : > { %v978_v22 = vsel %vm976_vm3, %v975_v20, %v970_v21 }
 0x6f8   : > { %1426 = vmatmul.mubr.msk.bf16.vlgmr.msra.gmra.mrb[16].mxu1 %vm1002_vm4, %v978_v22 }
 0x7cb   : > { %v1039_v26 = vpop.f32.mrb[16].mxu1 }
 0x7cc   : > { %v1040_v27 = vadd.f32 %v1331_v24, %v1039_v26  ;;  %v1427_v28 = vpop.f32.mrb[17].mxu1 }
 0x7cd   : > { %v1042_v30 = vpop.f32.mrb[18].mxu1 }
 0x7ce   : > { %v1043_v31 = vadd.f32 %v1331_v24, %v1042_v30  ;;  %v1428_v40 = vpop.f32.mrb[19].mxu1  ;;  %v1050_v42 = vadd.f32 %v1352_v25, %v1040_v27 }
 0x7d0   : > { %v1052_v43 = vsel %vm1002_vm4, %v1050_v42, 0.0  ;;  %v1051_v32 = vadd.f32 %v1353_v29, %v1043_v31 }
 0x7d1   : > { %1053 = vadd.xlane.f32.xlu0 %v1052_v43 }
 0x7d2   : > { %v1055_v33 = vsel %vm1002_vm4, %v1051_v32, 0.0 }
 0x7d3   : > { %1056 = vadd.xlane.f32.xlu1 %v1055_v33 }
 0x85e   : > { %v1054_v34 = vpop.xlane.xlu0 %1053 }
 0x85f   : > { %v1059_v35 = vmul.f32 0.03125, %v1054_v34 }
 0x860   : > { %v1057_v36 = vpop.xlane.xlu1 %1056 }
 0x861   : > { %v1061_v37 = vsub.f32 %v1050_v42, %v1059_v35  ;;  %v1060_v38 = vmul.f32 0.03125, %v1057_v36 }
 0x863   : > { %v1062_v39 = vsub.f32 %v1051_v32, %v1060_v38  ;;  %v1063_v41 = vmul.f32 %v1061_v37, %v1061_v37 }
 0x865   : > { %v1065_v44 = vsel %vm1002_vm4, %v1063_v41, 0.0  ;;  %v1064_v45 = vmul.f32 %v1062_v39, %v1062_v39 }
 0x866   : > { %1066 = vadd.xlane.f32.xlu0 %v1065_v44 }
 0x867   : > { %v1068_v46 = vsel %vm1002_vm4, %v1064_v45, 0.0 }
 0x86a   : > { %1069 = vadd.xlane.f32.xlu0 %v1068_v46 }
 0x8f3   : > { %v1067_v47 = vpop.xlane.xlu0 %1066 }
 0x8f4   : > { %v1071_v48 = vmul.f32 0.03125, %v1067_v47 }
 0x8f6   : > { %v1073_v49 = vadd.f32 1e-05, %v1071_v48 }
 0x8f7   : > { %v1070_v50 = vpop.xlane.xlu0 %1069 }
 0x8f8   : > { %1597 = vrsqrt.f32 %v1073_v49  ;;  %v1072_v51 = vmul.f32 0.03125, %v1070_v50 }
 0x8fa   : > { %v1074_v52 = vadd.f32 1e-05, %v1072_v51 }
 0x8fc   : > { %1599 = vrsqrt.f32 %v1074_v52 }
 0x902   : > { %v1598_v1 = vpop.eup %1597 }
 0x903   : > { %v1077_v54 = vmul.f32 %v1598_v1, %v1061_v37 }
 0x905   : > { %v1086_v56 = vmul.f32 %v1335_v53, %v1077_v54 }
 0x906   : > { %v1600_v57 = vpop.eup %1599 }
 0x907   : > { %v1095_v58 = vadd.f32 %v1336_v55, %v1086_v56  ;;  %v1078_v59 = vmul.f32 %v1600_v57, %v1062_v39 }
 0x909   : > { %v1347_v60 = vpack.c.bf16 %v1095_v58, %v1095_v58  ;;  %v1087_v61 = vmul.f32 %v1335_v53, %v1078_v59 }
 0x90b   : > { %v1096_v62 = vadd.f32 %v1336_v55, %v1087_v61  ;;  %1106 = vst.msk [vmem:[%s447_s13] sm:$0xf] %vm1105_vm5, %v1347_v60 }
 0x90d   : > { %v1348_v63 = vpack.c.bf16 %v1096_v62, %v1096_v62 }
 0x90f   : > { %1107 = vst.msk [vmem:[%s447_s13 + $0x4] sm:$0xf] %vm1105_vm5, %v1348_v63 }
 0x910   : > { %1816 = shalt.err (!%p1813_p0)
}
 0x911   : > { %s1817_s15 = scalar_lea.hbm %s2390_s19, 128  ;;  %s1821_s17 = scalar_lea.hbm %s2516_s5, 256 }
 0x912   : > { %p1818_p8 = scmp.ne.s32.totalorder %s2390_s19, %s1817_s15  ;;  %p1822_p2 = scmp.lt.u32.totalorder %s2390_s19, %s2516_s5 }
 0x913   : > { %p1823_p10 = scmp.lt.u32.totalorder %s1821_s17, %s1817_s15  ;;  %p1825_p7 = scmp.lt.u32.totalorder %s1817_s15, %s2390_s19 }
 0x914   : > { %p1819_p3 = pnand %p1818_p8, %p2517_p6 }
 0x915   : > { %p1824_p5 = por %p1823_p10, %p1822_p2 }
 0x916   : > { %p1820_p11 = pneg %p1819_p3 }
 0x917   : > { %p1826_p4 = por %p1825_p7, %p1824_p5 }
 0x919   : > { %p1827_p13 = pnand %p1826_p4, %p1820_p11 }
 0x91b   : > { %1830 = shalt.err (!%p1827_p13)
}
 0x91c   : > { %s1925_s7 = smov 4  }
 0x91d   : > { %1451 = dma.vmem_to_hbm [thread:$0]  (%p2517_p6), %s2392_s29, 128, %s2390_s19, %s1109_s9, %s1911_s30, %s1911_s30, %s1925_s7  }
 0x91e PF: > { %s2518_s22 = sld [smem:[#allocation20_spill]]  ;;  %s2519_s16 = sld [smem:[#allocation24_spill]] }
 0x91f   : > { %s2520_s27 = sld [smem:[#allocation23_spill]] }
 0x924   : > { %s1139_s18 = sand.u32 1, %s2518_s22   ;;  %p2521_p12 = scmp.ne.s32.totalorder %s2519_s16, 0 }
 0x925   : > { %p2522_p1 = scmp.ge.s32.totalorder %s2520_s27, 2  ;;  %s1140_s13 = scalar_lea.sflag [#allocation4], %s1139_s18 }
 0x927   : > { %p1477_p9 = pnand %p2522_p1, %p2521_p12 }
 0x929   : > { %1872 = dma.done.wait (!%p1477_p9), %s1140_s13, 128  }
 0x92a   : > { %1874 = vsyncadd (!%p1477_p9), %s1140_s13, 4294967168  ;;  %s28_s29 = sadd.s32 1, %s2520_s27   ;;  %s2523_s20 = sld [smem:[#allocation27_spill]] }
 0x92b   : > { %p25_p0 = scmp.ge.s32.totalorder %s28_s29, 4   ;;  %s2524_s27 = sld [smem:[#allocation22_spill]] }
 0x92c   : > { %s2525_s28 = sld [smem:[#allocation25_spill]]  ;;  %s2526_s24 = smov %s1881_s25 }
 0x92d   : > { %s2527_s25 = smov %s1885_s26  ;;  %27 = sbr.rel (!%p25_p0) target bundleno = 15 (0xf), region = 133 }
 0x930   : > { %s2528_s26 = smov %s2523_s20 }
 0x934   :  { %1145 = vsyncpa [#allocation3], 1 }
 0x935   :  { %1147 = vsyncpa [#allocation3 + $0x1], 1 }
 0x936   :  { %1148 = vsyncpa [#allocation6], 1 }
 0x937   :  { %1150 = vsyncpa [#allocation6 + $0x1], 1 }
 0x938   :  { %1151 = vsyncpa [#allocation9], 1 }
 0x939   :  { %1152 = vsyncpa [#allocation12], 1 }
 0x93a   :  { %1153 = vsyncpa [#allocation4], 1 }
 0x93b   :  { %1155 = vsyncpa [#allocation4 + $0x1], 1 }

// kernel: transformer_decoder_forward.15
= control target key start
LH: loop header
LB: loop body
LE: loop exit
PB: predicated region body
PF: predicated region fallthrough
CT: control target
= control target key end

     0   :  { %8 = vsyncpa [#allocation3], 0  ;;  %s378_s0 = inlined_call_operand.hbm [shape: bf16[32,32], index: 0, kind: input, shape index: {}]   ;;  %s379_s1 = inlined_call_operand.hbm [shape: bf16[32,128], index: 1, kind: input, shape index: {}]   ;;  %s380_s2 = inlined_call_operand.hbm [shape: f32[1,128], index: 2, kind: input, shape index: {}]   ;;  %s381_s3 = inlined_call_operand.hbm [shape: f32[32,128], index: 3, kind: output, shape index: {}]  }
   0x1   :  { %9 = vsyncpa [#allocation6], 0 }
   0x2   :  { %10 = vsyncpa [#allocation4], 0  ;;  %s295_s12 = smov [#allocation5]   ;;  %s296_s14 = smov [#allocation2]  }
   0x3   :  { %s28_s13 = sshll.u32 %s295_s12, 4  ;;  %s16_s15 = sshll.u32 %s296_s14, 4  ;;  %s29_s13 = int_to_ptr.vmem [resolvable:$true] %s28_s13  ;;  %s323_s15 = int_to_ptr.vmem [resolvable:$true] %s16_s15 }
   0x4   :  { %s201_s18 = scalar_lea.hbm %s379_s1, 256 }
   0x5   :  { %p202_p0 = scmp.ne.s32.totalorder %s379_s1, %s201_s18  ;;  %p205_p1 = scmp.lt.u32.totalorder %s201_s18, %s379_s1 }
   0x7   :  { %p207_p2 = pnand %p205_p1, %p202_p0 }
   0x9   :  { %210 = shalt.err (!%p207_p2)
}
   0xa   :  { %s211_s23 = scalar_lea.vmem %s29_s13, 256  ;;  %p216_p4 = scmp.lt.s32.totalorder %s29_s13, %s29_s13 }
   0xb   :  { %p212_p3 = scmp.ne.s32.totalorder %s29_s13, %s211_s23  ;;  %p217_p5 = scmp.lt.s32.totalorder %s211_s23, %s211_s23 }
   0xd   :  { %p218_p6 = por %p217_p5, %p216_p4 }
   0xf   :  { %p219_p7 = pnand %p218_p6, %p212_p3 }
  0x11   :  { %222 = shalt.err (!%p219_p7)
}
  0x12   :  { %s297_s24 = smov 64   ;;  %s298_s25 = smov 4  }
  0x13   :  { %34 = dma.hbm_to_vmem [thread:$0]  %s379_s1, 256, %s29_s13, [#allocation6], %s297_s24, %s297_s24, %s298_s25  }
  0x14   :  { %s223_s30 = scalar_lea.hbm %s378_s0, 256 }
  0x15   :  { %p224_p8 = scmp.ne.s32.totalorder %s378_s0, %s223_s30  ;;  %p227_p9 = scmp.lt.u32.totalorder %s223_s30, %s378_s0 }
  0x17   :  { %p229_p10 = pnand %p227_p9, %p224_p8 }
  0x19   :  { %232 = shalt.err (!%p229_p10)
}
  0x1a   :  { %s233_s8 = scalar_lea.vmem %s323_s15, 256  ;;  %p238_p12 = scmp.lt.s32.totalorder %s323_s15, %s323_s15 }
  0x1b   :  { %p234_p11 = scmp.ne.s32.totalorder %s323_s15, %s233_s8  ;;  %p239_p13 = scmp.lt.s32.totalorder %s233_s8, %s233_s8 }
  0x1d   :  { %p240_p0 = por %p239_p13, %p238_p12 }
  0x1f   :  { %p241_p1 = pnand %p240_p0, %p234_p11 }
  0x21   :  { %244 = shalt.err (!%p241_p1)
}
  0x22   :  { %22 = dma.hbm_to_vmem [thread:$0]  %s378_s0, 256, %s323_s15, [#allocation3], %s297_s24, %s297_s24, %s298_s25  }
  0x23   :  { %s299_s10 = smov [#allocation7]   ;;  %s245_s14 = scalar_lea.hbm %s380_s2, 16 }
  0x24   :  { %s41_s11 = sshll.u32 %s299_s10, 4  ;;  %p246_p2 = scmp.ne.s32.totalorder %s380_s2, %s245_s14  ;;  %s42_s11 = int_to_ptr.vmem [resolvable:$true] %s41_s11 }
  0x25   :  { %p249_p3 = scmp.lt.u32.totalorder %s245_s14, %s380_s2 }
  0x27   :  { %p251_p4 = pnand %p249_p3, %p246_p2 }
  0x29   :  { %254 = shalt.err (!%p251_p4)
}
  0x2a   :  { %s255_s20 = scalar_lea.vmem %s42_s11, 16  ;;  %s259_s0 = scalar_lea.vmem %s42_s11, 32 }
  0x2b   :  { %p256_p5 = scmp.ne.s32.totalorder %s42_s11, %s255_s20  ;;  %p260_p6 = scmp.lt.s32.totalorder %s42_s11, %s42_s11 }
  0x2c   :  { %p261_p7 = scmp.lt.s32.totalorder %s259_s0, %s255_s20 }
  0x2e   :  { %p262_p8 = por %p261_p7, %p260_p6 }
  0x30   :  { %p263_p9 = pnand %p262_p8, %p256_p5 }
  0x32   :  { %266 = shalt.err (!%p263_p9)
}
  0x33   :  { %44 = dma.hbm_to_vmem [thread:$0]  %s380_s2, 16, %s42_s11, [#allocation6]  }
  0x34   :  { %289 = dma.done.wait [#allocation3], 256  }
  0x35   :  { %290 = vsyncadd [#allocation3], 4294967040 }
  0x36   :  { %291 = dma.done.wait [#allocation6], 272  }
  0x37   :  { %292 = vsyncadd [#allocation6], 4294967024  ;;  %v197_v0 = vld [vmem:[#allocation5] sm:$0xff]   ;;  %v198_v1 = vld [vmem:[#allocation5 + $0x8] sm:$0xff]   ;;  %vm92_vm0 = vcmask 261120   ;;  %s300_s22 = smov [#allocation8]  }
  0x38   :  { %181 = vmatprep.subr.bf16.mxu0 %v197_v0  ;;  %v199_v2 = vld [vmem:[#allocation2] sm:$0xff]   ;;  %v200_v3 = vld [vmem:[#allocation2 + $0x8] sm:$0xff]   ;;  %s157_s23 = sshll.u32 %s300_s22, 4  ;;  %s158_s23 = int_to_ptr.vmem [resolvable:$true] %s157_s23 }
  0x39   :  { %182 = vmatpush3.bf16.msra.mxu0 %v197_v0  ;;  %185 = vmatprep.mubr.msk.bf16.mxu0 %vm92_vm0, %v199_v2  ;;  %v170_v4 = vld [vmem:[#allocation7] ss:$0 sm:$0xff]  ;;  %s267_s2 = scalar_lea.vmem %s158_s23, 512  ;;  %p272_p11 = scmp.lt.s32.totalorder %s158_s23, %s158_s23 }
  0x3a   :  { %183 = vmatprep.subr.bf16.mxu0 %v198_v1  ;;  %p268_p10 = scmp.ne.s32.totalorder %s158_s23, %s267_s2  ;;  %p273_p12 = scmp.lt.s32.totalorder %s267_s2, %s267_s2 }
  0x3c   :  { %p274_p13 = por %p273_p12, %p272_p11 }
  0x3d   :  { %184 = vmatpush3.bf16.msra.mxu0 %v198_v1 }
  0x3e   :  { %p275_p0 = pnand %p274_p13, %p268_p10 }
  0x40   :  { %186 = vmatmul.mubr.msk.bf16.vlgmr.msra.gmra.mrb[0].mxu0 %vm92_vm0, %v200_v3 }
 0x113   :  { %v187_v5 = vpop.f32.mrb[0].mxu0 }
 0x114   :  { %v142_v6 = vadd.f32 %v187_v5, %v170_v4  ;;  %v133_v7 = vpop.f32.mrb[1].mxu0 }
 0x115   :  { %v134_v8 = vadd.f32 %v170_v4, %v133_v7  ;;  %v188_v9 = vpop.f32.mrb[2].mxu0 }
 0x116   :  { %150 = vst [vmem:[#allocation8 + $0x10] sm:$0xff] %v142_v6  ;;  %v145_v10 = vadd.f32 %v188_v9, %v170_v4  ;;  %v136_v11 = vpop.f32.mrb[3].mxu0 }
 0x117   :  { %148 = vst [vmem:[#allocation8] sm:$0xff] %v134_v8  ;;  %v137_v12 = vadd.f32 %v170_v4, %v136_v11 }
 0x118   :  { %151 = vst [vmem:[#allocation8 + $0x18] sm:$0xff] %v145_v10 }
 0x119   :  { %149 = vst [vmem:[#allocation8 + $0x8] sm:$0xff] %v137_v12 }
 0x11a   :  { %278 = shalt.err (!%p275_p0)
}
 0x11b   :  { %s279_s26 = scalar_lea.hbm %s381_s3, 512 }
 0x11c   :  { %p280_p1 = scmp.ne.s32.totalorder %s381_s3, %s279_s26  ;;  %p283_p2 = scmp.lt.u32.totalorder %s279_s26, %s381_s3 }
 0x11e   :  { %p285_p3 = pnand %p283_p2, %p280_p1 }
 0x120   :  { %288 = shalt.err (!%p285_p3)
}
 0x121   :  { %s301_s4 = smov 128   ;;  %s302_s5 = smov 8  }
 0x122   :  { %163 = dma.vmem_to_hbm [thread:$0]  %s158_s23, 512, %s381_s3, [#allocation4], %s301_s4, %s301_s4, %s302_s5  }
 0x123   :  { %293 = dma.done.wait [#allocation4], 512  }
 0x124   :  { %294 = vsyncadd [#allocation4], 4294966784 }
 0x125   :  { %167 = vsyncpa [#allocation3], 1 }
 0x126   :  { %168 = vsyncpa [#allocation6], 1 }
 0x127   :  { %169 = vsyncpa [#allocation4], 1 }

// kernel: transformer_decoder_forward.11
= control target key start
LH: loop header
LB: loop body
LE: loop exit
PB: predicated region body
PF: predicated region fallthrough
CT: control target
= control target key end

     0   :  { %12 = vsyncpa [#allocation3], 0  ;;  %s3660_s0 = inlined_call_operand.hbm [shape: bf16[32,32], index: 0, kind: input, shape index: {}]   ;;  %s3661_s1 = inlined_call_operand.hbm [shape: bf16[32,2048], index: 1, kind: input, shape index: {}]   ;;  %s3662_s2 = inlined_call_operand.hbm [shape: f32[1,2048], index: 2, kind: input, shape index: {}]   ;;  %s3663_s3 = inlined_call_operand.hbm [shape: bf16[2048,32], index: 3, kind: input, shape index: {}]   ;;  %s3664_s4 = inlined_call_operand.hbm [shape: f32[1,32], index: 4, kind: input, shape index: {}]   ;;  %s3665_s5 = inlined_call_operand.hbm [shape: f32[1,32], index: 5, kind: input, shape index: {}]   ;;  %s3666_s6 = inlined_call_operand.hbm [shape: f32[1,32], index: 6, kind: input, shape index: {}]   ;;  %s3667_s7 = inlined_call_operand.hbm [shape: bf16[32,32], index: 7, kind: output, shape index: {}]  }
   0x1   :  { %13 = vsyncpa [#allocation6], 0 }
   0x2   :  { %14 = vsyncpa [#allocation9], 0 }
   0x3   :  { %15 = vsyncpa [#allocation12], 0 }
   0x4   :  { %16 = vsyncpa [#allocation4], 0  ;;  %s3232_s24 = smov [#allocation5]   ;;  %s3046_s28 = scalar_lea.hbm %s3661_s1, 4096 }
   0x5   :  { %s34_s25 = sshll.u32 %s3232_s24, 4  ;;  %p3047_p0 = scmp.ne.s32.totalorder %s3661_s1, %s3046_s28  ;;  %s35_s25 = int_to_ptr.vmem [resolvable:$true] %s34_s25 }
   0x6   :  { %p3050_p1 = scmp.lt.u32.totalorder %s3046_s28, %s3661_s1 }
   0x8   :  { %p3052_p2 = pnand %p3050_p1, %p3047_p0 }
   0xa   :  { %3055 = shalt.err (!%p3052_p2)
}
   0xb   :  { %s3056_s10 = scalar_lea.vmem %s35_s25, 4096  ;;  %p3061_p4 = scmp.lt.s32.totalorder %s35_s25, %s35_s25 }
   0xc   :  { %p3057_p3 = scmp.ne.s32.totalorder %s35_s25, %s3056_s10  ;;  %p3062_p5 = scmp.lt.s32.totalorder %s3056_s10, %s3056_s10 }
   0xe   :  { %p3063_p6 = por %p3062_p5, %p3061_p4 }
  0x10   :  { %p3064_p7 = pnand %p3063_p6, %p3057_p3 }
  0x12   :  { %3067 = shalt.err (!%p3064_p7)
}
  0x13   :  { %s3233_s11 = smov 1024   ;;  %s3234_s12 = smov 64  }
  0x14   :  { %40 = dma.hbm_to_vmem [thread:$0]  %s3661_s1, 4096, %s35_s25, [#allocation6], %s3233_s11, %s3233_s11, %s3234_s12  }
  0x15   :  { %s3235_s15 = smov [#allocation8]   ;;  %s3236_s17 = smov [#allocation11]  }
  0x16   :  { %s56_s16 = sshll.u32 %s3235_s15, 4  ;;  %s79_s18 = sshll.u32 %s3236_s17, 4  ;;  %s57_s16 = int_to_ptr.vmem [resolvable:$true] %s56_s16  ;;  %s80_s18 = int_to_ptr.vmem [resolvable:$true] %s79_s18 }
  0x17   :  { %s3068_s21 = scalar_lea.hbm %s3663_s3, 16384 }
  0x18   :  { %p3069_p8 = scmp.ne.s32.totalorder %s3663_s3, %s3068_s21  ;;  %p3072_p9 = scmp.lt.u32.totalorder %s3068_s21, %s3663_s3 }
  0x1a   :  { %p3074_p10 = pnand %p3072_p9, %p3069_p8 }
  0x1c   :  { %3077 = shalt.err (!%p3074_p10)
}
  0x1d   :  { %s3078_s1 = scalar_lea.vmem %s57_s16, 16384  ;;  %p3083_p12 = scmp.lt.s32.totalorder %s57_s16, %s57_s16 }
  0x1e   :  { %p3079_p11 = scmp.ne.s32.totalorder %s57_s16, %s3078_s1  ;;  %p3084_p13 = scmp.lt.s32.totalorder %s3078_s1, %s3078_s1 }
  0x20   :  { %p3085_p0 = por %p3084_p13, %p3083_p12 }
  0x22   :  { %p3086_p1 = pnand %p3085_p0, %p3079_p11 }
  0x24   :  { %3089 = shalt.err (!%p3086_p1)
}
  0x25   :  { %s3237_s25 = smov 4   ;;  %s3090_s8 = scalar_lea.hbm %s3665_s5, 16 }
  0x26   :  { %62 = dma.hbm_to_vmem [thread:$0]  %s3663_s3, 16384, %s57_s16, [#allocation9], %s3234_s12, %s3234_s12, %s3237_s25  }
  0x27   :  { %p3091_p2 = scmp.ne.s32.totalorder %s3665_s5, %s3090_s8  ;;  %p3094_p3 = scmp.lt.u32.totalorder %s3090_s8, %s3665_s5 }
  0x29   :  { %p3096_p4 = pnand %p3094_p3, %p3091_p2 }
  0x2b   :  { %3099 = shalt.err (!%p3096_p4)
}
  0x2c   :  { %s3100_s14 = scalar_lea.vmem %s80_s18, 16  ;;  %s3104_s15 = scalar_lea.vmem %s80_s18, 32 }
  0x2d   :  { %p3101_p5 = scmp.ne.s32.totalorder %s80_s18, %s3100_s14  ;;  %p3105_p6 = scmp.lt.s32.totalorder %s80_s18, %s80_s18 }
  0x2e   :  { %p3106_p7 = scmp.lt.s32.totalorder %s3104_s15, %s3100_s14 }
  0x30   :  { %p3107_p8 = por %p3106_p7, %p3105_p6 }
  0x32   :  { %p3108_p9 = pnand %p3107_p8, %p3101_p5 }
  0x34   :  { %3111 = shalt.err (!%p3108_p9)
}
  0x35   :  { %82 = dma.hbm_to_vmem [thread:$0]  %s3665_s5, 16, %s80_s18, [#allocation12]  }
  0x36   :  { %s3238_s17 = smov [#allocation2]   ;;  %s3239_s20 = smov [#allocation7]  }
  0x37   :  { %s22_s19 = sshll.u32 %s3238_s17, 4  ;;  %s47_s21 = sshll.u32 %s3239_s20, 4  ;;  %s23_s19 = int_to_ptr.vmem [resolvable:$true] %s22_s19  ;;  %s48_s21 = int_to_ptr.vmem [resolvable:$true] %s47_s21 }
  0x38   :  { %s3112_s24 = scalar_lea.hbm %s3660_s0, 256 }
  0x39   :  { %p3113_p10 = scmp.ne.s32.totalorder %s3660_s0, %s3112_s24  ;;  %p3116_p11 = scmp.lt.u32.totalorder %s3112_s24, %s3660_s0 }
  0x3b   :  { %p3118_p12 = pnand %p3116_p11, %p3113_p10 }
  0x3d   :  { %3121 = shalt.err (!%p3118_p12)
}
  0x3e   :  { %s3122_s5 = scalar_lea.vmem %s23_s19, 256  ;;  %p3127_p0 = scmp.lt.s32.totalorder %s23_s19, %s23_s19 }
  0x3f   :  { %p3123_p13 = scmp.ne.s32.totalorder %s23_s19, %s3122_s5  ;;  %p3128_p1 = scmp.lt.s32.totalorder %s3122_s5, %s3122_s5 }
  0x41   :  { %p3129_p2 = por %p3128_p1, %p3127_p0 }
  0x43   :  { %p3130_p3 = pnand %p3129_p2, %p3123_p13 }
  0x45   :  { %3133 = shalt.err (!%p3130_p3)
}
  0x46   :  { %28 = dma.hbm_to_vmem [thread:$0]  %s3660_s0, 256, %s23_s19, [#allocation3], %s3234_s12, %s3234_s12, %s3237_s25  }
  0x47   :  { %s3134_s9 = scalar_lea.hbm %s3662_s2, 256 }
  0x48   :  { %p3135_p4 = scmp.ne.s32.totalorder %s3662_s2, %s3134_s9  ;;  %p3138_p5 = scmp.lt.u32.totalorder %s3134_s9, %s3662_s2 }
  0x4a   :  { %p3140_p6 = pnand %p3138_p5, %p3135_p4 }
  0x4c   :  { %3143 = shalt.err (!%p3140_p6)
}
  0x4d   :  { %s3144_s15 = scalar_lea.vmem %s48_s21, 256  ;;  %p3149_p8 = scmp.lt.s32.totalorder %s48_s21, %s48_s21 }
  0x4e   :  { %p3145_p7 = scmp.ne.s32.totalorder %s48_s21, %s3144_s15  ;;  %p3150_p9 = scmp.lt.s32.totalorder %s3144_s15, %s3144_s15 }
  0x50   :  { %p3151_p10 = por %p3150_p9, %p3149_p8 }
  0x52   :  { %p3152_p11 = pnand %p3151_p10, %p3145_p7 }
  0x54   :  { %3155 = shalt.err (!%p3152_p11)
}
  0x55   :  { %50 = dma.hbm_to_vmem [thread:$0]  %s3662_s2, 256, %s48_s21, [#allocation6]  }
  0x56   :  { %s3240_s16 = smov [#allocation10]   ;;  %s3241_s19 = smov [#allocation13]  }
  0x57   :  { %s69_s17 = sshll.u32 %s3240_s16, 4  ;;  %s89_s20 = sshll.u32 %s3241_s19, 4  ;;  %s70_s17 = int_to_ptr.vmem [resolvable:$true] %s69_s17  ;;  %s90_s20 = int_to_ptr.vmem [resolvable:$true] %s89_s20 }
  0x58   :  { %s3156_s24 = scalar_lea.hbm %s3664_s4, 16 }
  0x59   :  { %p3157_p12 = scmp.ne.s32.totalorder %s3664_s4, %s3156_s24  ;;  %p3160_p13 = scmp.lt.u32.totalorder %s3156_s24, %s3664_s4 }
  0x5b   :  { %p3162_p0 = pnand %p3160_p13, %p3157_p12 }
  0x5d   :  { %3165 = shalt.err (!%p3162_p0)
}
  0x5e   :  { %s3166_s2 = scalar_lea.vmem %s70_s17, 16  ;;  %s3170_s21 = scalar_lea.vmem %s70_s17, 32 }
  0x5f   :  { %p3167_p1 = scmp.ne.s32.totalorder %s70_s17, %s3166_s2  ;;  %p3171_p2 = scmp.lt.s32.totalorder %s70_s17, %s70_s17 }
  0x60   :  { %p3172_p3 = scmp.lt.s32.totalorder %s3170_s21, %s3166_s2 }
  0x62   :  { %p3173_p4 = por %p3172_p3, %p3171_p2 }
  0x64   :  { %p3174_p5 = pnand %p3173_p4, %p3167_p1 }
  0x66   :  { %3177 = shalt.err (!%p3174_p5)
}
  0x67   :  { %72 = dma.hbm_to_vmem [thread:$0]  %s3664_s4, 16, %s70_s17, [#allocation9]  }
  0x68   :  { %s3178_s8 = scalar_lea.hbm %s3666_s6, 16 }
  0x69   :  { %p3179_p6 = scmp.ne.s32.totalorder %s3666_s6, %s3178_s8  ;;  %p3182_p7 = scmp.lt.u32.totalorder %s3178_s8, %s3666_s6 }
  0x6b   :  { %p3184_p8 = pnand %p3182_p7, %p3179_p6 }
  0x6d   :  { %3187 = shalt.err (!%p3184_p8)
}
  0x6e   :  { %s3188_s14 = scalar_lea.vmem %s90_s20, 16  ;;  %s3192_s15 = scalar_lea.vmem %s90_s20, 32 }
  0x6f   :  { %p3189_p9 = scmp.ne.s32.totalorder %s90_s20, %s3188_s14  ;;  %p3193_p10 = scmp.lt.s32.totalorder %s90_s20, %s90_s20 }
  0x70   :  { %p3194_p11 = scmp.lt.s32.totalorder %s3192_s15, %s3188_s14 }
  0x72   :  { %p3195_p12 = por %p3194_p11, %p3193_p10 }
  0x74   :  { %p3196_p13 = pnand %p3195_p12, %p3189_p9 }
  0x76   :  { %3199 = shalt.err (!%p3196_p13)
}
  0x77   :  { %92 = dma.hbm_to_vmem [thread:$0]  %s3666_s6, 16, %s90_s20, [#allocation12]  }
  0x78   :  { %3222 = dma.done.wait [#allocation3], 256  }
  0x79   :  { %3223 = vsyncadd [#allocation3], 4294967040 }
  0x7a   :  { %3224 = dma.done.wait [#allocation6], 4352  }
  0x7b   :  { %3225 = vsyncadd [#allocation6], 4294962944 }
  0x7c   :  { %3226 = dma.done.wait [#allocation9], 16400  }
  0x7d   :  { %3227 = vsyncadd [#allocation9], 4294950896 }
  0x7e   :  { %3228 = dma.done.wait [#allocation12], 32  }
  0x7f   :  { %3229 = vsyncadd [#allocation12], 4294967264  ;;  %v3242_v0 = vmov 0   ;;  %v119_v1 = vld [vmem:[#allocation5] sm:$0xff]  ;;  %v120_v3 = vld [vmem:[#allocation5 + $0x8] sm:$0xff]  ;;  %vm661_vm0 = vcmask 261120  }
  0x80   :  { %700 = vmatprep.mubr.bf16.mxu0 %v3242_v0  ;;  %753 = vmatprep.mubr.bf16.mxu1 %v3242_v0  ;;  %v127_v2 = vld [vmem:[#allocation5 + $0x40] sm:$0xff]  ;;  %v128_v5 = vld [vmem:[#allocation5 + $0x48] sm:$0xff]  ;;  %v121_v15 = vld [vmem:[#allocation5 + $0x10] sm:$0xff]  ;;  %vm2454_vm1 = vcmask 257024   ;;  %s3243_s6 = smov [#allocation14]  }
  0x81   :  { %v2482_v4 = vcombine.high %v119_v1, %v127_v2  ;;  %v2481_v6 = vcombine.low %v119_v1, %v127_v2  ;;  %v135_v7 = vld [vmem:[#allocation5 + $0x80] sm:$0xff]  ;;  %v2484_v9 = vcombine.high %v120_v3, %v128_v5  ;;  %v2483_v10 = vcombine.low %v120_v3, %v128_v5  ;;  %v136_v12 = vld [vmem:[#allocation5 + $0x88] sm:$0xff]  ;;  %v129_v16 = vld [vmem:[#allocation5 + $0x50] sm:$0xff]  ;;  %s2464_s3 = sshll.u32 %s3243_s6, 4  ;;  %s2465_s3 = int_to_ptr.vmem [resolvable:$true] %s2464_s3 }
  0x82   :  { %v143_v8 = vld [vmem:[#allocation5 + $0xc0] sm:$0xff]  ;;  %v144_v13 = vld [vmem:[#allocation5 + $0xc8] sm:$0xff]  ;;  %v3377_v18 = vld [vmem:[#allocation2] sm:$0xff]   ;;  %v2486_v22 = vcombine.high %v121_v15, %v129_v16  ;;  %v2485_v28 = vcombine.low %v121_v15, %v129_v16  ;;  %s3200_s16 = scalar_lea.vmem %s2465_s3, 256  ;;  %p3205_p1 = scmp.lt.s32.totalorder %s2465_s3, %s2465_s3 }
  0x83   :  { %v2498_v11 = vcombine.high %v135_v7, %v143_v8  ;;  %668 = vmatprep.subr.bf16.mxu0 %v2482_v4  ;;  %v2500_v14 = vcombine.high %v136_v12, %v144_v13  ;;  %721 = vmatprep.subr.bf16.mxu1 %v2484_v9  ;;  %v2497_v17 = vcombine.low %v135_v7, %v143_v8  ;;  %v122_v19 = vld [vmem:[#allocation5 + $0x18] sm:$0xff]  ;;  %v137_v24 = vld [vmem:[#allocation5 + $0x90] sm:$0xff]  ;;  %v123_v32 = vld [vmem:[#allocation5 + $0x20] sm:$0xff]  ;;  %p3201_p0 = scmp.ne.s32.totalorder %s2465_s3, %s3200_s16  ;;  %p3206_p2 = scmp.lt.s32.totalorder %s3200_s16, %s3200_s16 }
  0x84   :  { %669 = vmatpush1.bf16.msra.mxu0 %v2481_v6  ;;  %v130_v20 = vld [vmem:[#allocation5 + $0x58] sm:$0xff]  ;;  %722 = vmatpush1.bf16.msra.mxu1 %v2483_v10  ;;  %v2499_v21 = vcombine.low %v136_v12, %v144_v13  ;;  %v145_v25 = vld [vmem:[#allocation5 + $0xd0] sm:$0xff]  ;;  %v131_v33 = vld [vmem:[#allocation5 + $0x60] sm:$0xff] }
  0x85   :  { %670 = vmatprep.subr.bf16.mxu0 %v2498_v11  ;;  %723 = vmatprep.subr.bf16.mxu1 %v2500_v14  ;;  %v2488_v23 = vcombine.high %v122_v19, %v130_v20  ;;  %v138_v26 = vld [vmem:[#allocation5 + $0x98] sm:$0xff]  ;;  %v2487_v30 = vcombine.low %v122_v19, %v130_v20  ;;  %v2502_v31 = vcombine.high %v137_v24, %v145_v25  ;;  %v124_v35 = vld [vmem:[#allocation5 + $0x28] sm:$0xff]  ;;  %v139_v41 = vld [vmem:[#allocation5 + $0xa0] sm:$0xff]  ;;  %p3207_p3 = por %p3206_p2, %p3205_p1 }
  0x86   :  { %v146_v27 = vld [vmem:[#allocation5 + $0xd8] sm:$0xff]  ;;  %v132_v36 = vld [vmem:[#allocation5 + $0x68] sm:$0xff]  ;;  %v2501_v37 = vcombine.low %v137_v24, %v145_v25  ;;  %v2490_v39 = vcombine.high %v123_v32, %v131_v33  ;;  %v147_v42 = vld [vmem:[#allocation5 + $0xe0] sm:$0xff]  ;;  %v2489_v45 = vcombine.low %v123_v32, %v131_v33 }
  0x87   :  { %v3379_v29 = vld [vmem:[#allocation2 + $0x8] sm:$0xff]   ;;  %v2504_v34 = vcombine.high %v138_v26, %v146_v27  ;;  %v2503_v38 = vcombine.low %v138_v26, %v146_v27  ;;  %v2492_v40 = vcombine.high %v124_v35, %v132_v36  ;;  %v140_v43 = vld [vmem:[#allocation5 + $0xa8] sm:$0xff]  ;;  %v125_v46 = vld [vmem:[#allocation5 + $0x30] sm:$0xff]  ;;  %v2491_v47 = vcombine.low %v124_v35, %v132_v36  ;;  %p3208_p4 = pnand %p3207_p3, %p3201_p0 }
  0x88   :  { %671 = vmatpush1.bf16.msra.mxu0 %v2497_v17  ;;  %724 = vmatpush1.bf16.msra.mxu1 %v2499_v21  ;;  %v148_v44 = vld [vmem:[#allocation5 + $0xe8] sm:$0xff]  ;;  %v2506_v48 = vcombine.high %v139_v41, %v147_v42  ;;  %v133_v49 = vld [vmem:[#allocation5 + $0x70] sm:$0xff]  ;;  %v126_v51 = vld [vmem:[#allocation5 + $0x38] sm:$0xff]  ;;  %v2505_v53 = vcombine.low %v139_v41, %v147_v42 }
  0x89   :  { %774 = vmatprep.subr.bf16.mxu0 %v2486_v22  ;;  %827 = vmatprep.subr.bf16.mxu1 %v2488_v23  ;;  %v2508_v50 = vcombine.high %v140_v43, %v148_v44  ;;  %v134_v52 = vld [vmem:[#allocation5 + $0x78] sm:$0xff]  ;;  %v2507_v54 = vcombine.low %v140_v43, %v148_v44  ;;  %v2494_v55 = vcombine.high %v125_v46, %v133_v49  ;;  %v141_v57 = vld [vmem:[#allocation5 + $0xb0] sm:$0xff]  ;;  %v2914_v12 = vld [vmem:[#allocation8 + $0x50] sm:$0xff]  }
  0x8a   :  { %v2496_v56 = vcombine.high %v126_v51, %v134_v52  ;;  %v149_v58 = vld [vmem:[#allocation5 + $0xf0] sm:$0xff]  ;;  %v142_v59 = vld [vmem:[#allocation5 + $0xb8] sm:$0xff]  ;;  %v2493_v61 = vcombine.low %v125_v46, %v133_v49  ;;  %v2495_v62 = vcombine.low %v126_v51, %v134_v52  ;;  %v2915_v13 = vld [vmem:[#allocation8 + $0xd0] sm:$0xff]  }
  0x8b   :  { %2513 = vmatmul.mubr.msk.bf16.vlgmr.msra.gmra.mrb[0].mxu0 %vm661_vm0, %v3377_v18  ;;  %2515 = vmatmul.mubr.msk.bf16.vlgmr.msra.gmra.mrb[0].mxu1 %vm661_vm0, %v3377_v18  ;;  %v150_v60 = vld [vmem:[#allocation5 + $0xf8] sm:$0xff]  ;;  %v2510_v63 = vcombine.high %v141_v57, %v149_v58  ;;  %v2906_v2 = vld [vmem:[#allocation8 + $0x40] sm:$0xff]   ;;  %v2509_v3 = vcombine.low %v141_v57, %v149_v58  ;;  %v2916_v14 = vld [vmem:[#allocation8 + $0x10] sm:$0xff]  }
  0x8c   :  { %710 = vmatprep.mubr.bf16.mxu0 %v3242_v0  ;;  %775 = vmatpush1.bf16.msra.mxu0 %v2485_v28  ;;  %v2512_v1 = vcombine.high %v142_v59, %v150_v60  ;;  %v2907_v4 = vld [vmem:[#allocation8 + $0xc0] sm:$0xff]   ;;  %v2511_v5 = vcombine.low %v142_v59, %v150_v60  ;;  %v2910_v8 = vld [vmem:[#allocation8 + $0x48] sm:$0xff]   ;;  %v2917_v15 = vld [vmem:[#allocation8 + $0x90] sm:$0xff]  }
  0x8d   :  { %763 = vmatprep.mubr.bf16.mxu1 %v3242_v0  ;;  %828 = vmatpush1.bf16.msra.mxu1 %v2487_v30  ;;  %v2908_v6 = vld [vmem:[#allocation8] sm:$0xff]   ;;  %v2911_v9 = vld [vmem:[#allocation8 + $0xc8] sm:$0xff]   ;;  %v2918_v16 = vld [vmem:[#allocation8 + $0x58] sm:$0xff]  }
  0x8e   :  { %776 = vmatprep.subr.bf16.mxu0 %v2502_v31  ;;  %829 = vmatprep.subr.bf16.mxu1 %v2504_v34  ;;  %v2909_v7 = vld [vmem:[#allocation8 + $0x80] sm:$0xff]   ;;  %v2912_v10 = vld [vmem:[#allocation8 + $0x8] sm:$0xff]   ;;  %v2919_v17 = vld [vmem:[#allocation8 + $0xd8] sm:$0xff]  }
  0x8f   :  { %v2913_v11 = vld [vmem:[#allocation8 + $0x88] sm:$0xff]   ;;  %v2922_v19 = vld [vmem:[#allocation8 + $0x60] sm:$0xff]   ;;  %v2930_v27 = vld [vmem:[#allocation8 + $0x70] sm:$0xff]  }
  0x90   :  { %777 = vmatpush1.bf16.msra.mxu0 %v2501_v37  ;;  %v2923_v20 = vld [vmem:[#allocation8 + $0xe0] sm:$0xff]   ;;  %v2926_v23 = vld [vmem:[#allocation8 + $0x68] sm:$0xff]   ;;  %v2931_v28 = vld [vmem:[#allocation8 + $0xf0] sm:$0xff]   ;;  %v411_v37 = vlaneseq }
  0x91   :  { %830 = vmatpush1.bf16.msra.mxu1 %v2503_v38  ;;  %880 = vmatprep.subr.bf16.mxu0 %v2490_v39  ;;  %v2924_v21 = vld [vmem:[#allocation8 + $0x20] sm:$0xff]   ;;  %v2927_v24 = vld [vmem:[#allocation8 + $0xe8] sm:$0xff]   ;;  %v2933_v30 = vld [vmem:[#allocation8 + $0xb0] sm:$0xff]  }
  0x92   :  { %933 = vmatprep.subr.bf16.mxu1 %v2492_v40  ;;  %v2925_v22 = vld [vmem:[#allocation8 + $0xa0] sm:$0xff]   ;;  %v2928_v25 = vld [vmem:[#allocation8 + $0x28] sm:$0xff]   ;;  %v2934_v31 = vld [vmem:[#allocation8 + $0x78] sm:$0xff]   ;;  %v3427_v38 = vshrl.u32 %v411_v37, 7 }
  0x93   :  { %2514 = vmatmul.mubr.msk.bf16.gmra.mrb[4].mxu0 %vm661_vm0, %v3379_v29  ;;  %2516 = vmatmul.mubr.msk.bf16.gmra.mrb[4].mxu1 %vm661_vm0, %v3379_v29  ;;  %v2929_v26 = vld [vmem:[#allocation8 + $0xa8] sm:$0xff]   ;;  %v2935_v32 = vld [vmem:[#allocation8 + $0xf8] sm:$0xff]   ;;  %v2938_v35 = vld [vmem:[#allocation8 + $0x140] sm:$0xff]  }
  0x94   :  { %806 = vmatprep.mubr.bf16.mxu0 %v3242_v0  ;;  %859 = vmatprep.mubr.bf16.mxu1 %v3242_v0  ;;  %v2936_v33 = vld [vmem:[#allocation8 + $0x38] sm:$0xff]   ;;  %v2939_v36 = vld [vmem:[#allocation8 + $0x1c0] sm:$0xff]   ;;  %v413_v39 = vsub.s32 0, %v3427_v38  ;;  %v3430_v40 = vld [vmem:[#allocation7] sm:$0xff]  ;;  %v421_v41 = vsub.s32 2, %v3427_v38  ;;  %v417_v42 = vsub.s32 1, %v3427_v38 }
  0x95   :  { %v2937_v34 = vld [vmem:[#allocation8 + $0xb8] sm:$0xff]   ;;  %v425_v43 = vsub.s32 3, %v3427_v38 }
  0x96   :  { %v414_v44 = vrot.slane %v3430_v40, %v413_v39  ;;  %v418_v46 = vrot.slane %v3430_v40, %v417_v42 }
  0x9b   :  { %2517 = vmatmul.mubr.msk.bf16.vlgmr.msra.gmra.mrb[8].mxu0 %vm661_vm0, %v3377_v18  ;;  %2519 = vmatmul.mubr.msk.bf16.vlgmr.msra.gmra.mrb[8].mxu1 %vm661_vm0, %v3377_v18 }
  0x9c   :  { %816 = vmatprep.mubr.bf16.mxu0 %v3242_v0  ;;  %869 = vmatprep.mubr.bf16.mxu1 %v3242_v0 }
  0x9d   :  { %881 = vmatpush1.bf16.msra.mxu0 %v2489_v45  ;;  %934 = vmatpush1.bf16.msra.mxu1 %v2491_v47  ;;  %v422_v45 = vrot.slane %v3430_v40, %v421_v41  ;;  %v3447_v47 = vrot.slane %v3430_v40, %v425_v43 }
  0x9e   :  { %882 = vmatprep.subr.bf16.mxu0 %v2506_v48  ;;  %935 = vmatprep.subr.bf16.mxu1 %v2508_v50 }
  0xa1   :  { %883 = vmatpush1.bf16.msra.mxu0 %v2505_v53  ;;  %936 = vmatpush1.bf16.msra.mxu1 %v2507_v54 }
  0xa2   :  { %986 = vmatprep.subr.bf16.mxu0 %v2494_v55  ;;  %1039 = vmatprep.subr.bf16.mxu1 %v2496_v56 }
  0xa3   :  { %2518 = vmatmul.mubr.msk.bf16.gmra.mrb[12].mxu0 %vm661_vm0, %v3379_v29  ;;  %2520 = vmatmul.mubr.msk.bf16.gmra.mrb[12].mxu1 %vm661_vm0, %v3379_v29 }
  0xa4   :  { %912 = vmatprep.mubr.bf16.mxu0 %v3242_v0  ;;  %965 = vmatprep.mubr.bf16.mxu1 %v3242_v0 }
  0xab   :  { %2521 = vmatmul.mubr.msk.bf16.vlgmr.msra.gmra.mrb[16].mxu0 %vm661_vm0, %v3377_v18  ;;  %2523 = vmatmul.mubr.msk.bf16.vlgmr.msra.gmra.mrb[16].mxu1 %vm661_vm0, %v3377_v18 }
  0xac   :  { %922 = vmatprep.mubr.bf16.mxu0 %v3242_v0  ;;  %975 = vmatprep.mubr.bf16.mxu1 %v3242_v0 }
  0xad   :  { %987 = vmatpush1.bf16.msra.mxu0 %v2493_v61  ;;  %1040 = vmatpush1.bf16.msra.mxu1 %v2495_v62 }
  0xae   :  { %988 = vmatprep.subr.bf16.mxu0 %v2510_v63  ;;  %1041 = vmatprep.subr.bf16.mxu1 %v2512_v1 }
  0xb1   :  { %989 = vmatpush1.bf16.msra.mxu0 %v2509_v3  ;;  %1042 = vmatpush1.bf16.msra.mxu1 %v2511_v5 }
  0xb2   :  { %2668 = vmatprep.subr.bf16.mxu0 %v2906_v2  ;;  %2696 = vmatprep.subr.bf16.mxu1 %v2907_v4 }
  0xb3   :  { %2522 = vmatmul.mubr.msk.bf16.gmra.mrb[20].mxu0 %vm661_vm0, %v3379_v29  ;;  %2524 = vmatmul.mubr.msk.bf16.gmra.mrb[20].mxu1 %vm661_vm0, %v3379_v29 }
  0xb4   :  { %1018 = vmatprep.mubr.bf16.mxu0 %v3242_v0  ;;  %1071 = vmatprep.mubr.bf16.mxu1 %v3242_v0 }
  0xbb   :  { %2525 = vmatmul.mubr.msk.bf16.vlgmr.msra.gmra.mrb[24].mxu0 %vm661_vm0, %v3377_v18  ;;  %2527 = vmatmul.mubr.msk.bf16.vlgmr.msra.gmra.mrb[24].mxu1 %vm661_vm0, %v3377_v18  ;;  %v2920_v18 = vld [vmem:[#allocation8 + $0x18] sm:$0xff]  }
  0xbc   :  { %1028 = vmatprep.mubr.bf16.mxu0 %v3242_v0  ;;  %1081 = vmatprep.mubr.bf16.mxu1 %v3242_v0  ;;  %v2921_v0 = vld [vmem:[#allocation8 + $0x98] sm:$0xff]  }
  0xbd   :  { %2669 = vmatpush3.bf16.msra.mxu0 %v2908_v6  ;;  %2697 = vmatpush3.bf16.msra.mxu1 %v2909_v7 }
  0xbe   :  { %2670 = vmatprep.subr.bf16.mxu0 %v2910_v8  ;;  %2698 = vmatprep.subr.bf16.mxu1 %v2911_v9 }
  0xc1   :  { %2671 = vmatpush3.bf16.msra.mxu0 %v2912_v10  ;;  %2699 = vmatpush3.bf16.msra.mxu1 %v2913_v11 }
  0xc2   :  { %2672 = vmatprep.subr.bf16.mxu0 %v2914_v12  ;;  %2700 = vmatprep.subr.bf16.mxu1 %v2915_v13  ;;  %v2940_v12 = vld [vmem:[#allocation8 + $0x100] sm:$0xff]  }
  0xc3   :  { %2526 = vmatmul.mubr.msk.bf16.gmra.mrb[28].mxu0 %vm661_vm0, %v3379_v29  ;;  %2528 = vmatmul.mubr.msk.bf16.gmra.mrb[28].mxu1 %vm661_vm0, %v3379_v29  ;;  %v2932_v29 = vld [vmem:[#allocation8 + $0x30] sm:$0xff]  }
  0xc5   :  { %2673 = vmatpush3.bf16.msra.mxu0 %v2916_v14  ;;  %2701 = vmatpush3.bf16.msra.mxu1 %v2917_v15  ;;  %v2941_v15 = vld [vmem:[#allocation8 + $0x180] sm:$0xff]  }
  0xc6   :  { %2674 = vmatprep.subr.bf16.mxu0 %v2918_v16  ;;  %2702 = vmatprep.subr.bf16.mxu1 %v2919_v17  ;;  %v2942_v16 = vld [vmem:[#allocation8 + $0x148] sm:$0xff]  }
  0xc9   :  { %2675 = vmatpush3.bf16.msra.mxu0 %v2920_v18  ;;  %2703 = vmatpush3.bf16.msra.mxu1 %v2921_v0 }
  0xca   :  { %2676 = vmatprep.subr.bf16.mxu0 %v2922_v19  ;;  %2704 = vmatprep.subr.bf16.mxu1 %v2923_v20  ;;  %v429_v19 = vsub.s32 4, %v3427_v38  ;;  %v2943_v20 = vld [vmem:[#allocation8 + $0x1c8] sm:$0xff]  }
  0xcd   :  { %2677 = vmatpush3.bf16.msra.mxu0 %v2924_v21  ;;  %2705 = vmatpush3.bf16.msra.mxu1 %v2925_v22 }
  0xce   :  { %2678 = vmatprep.subr.bf16.mxu0 %v2926_v23  ;;  %2706 = vmatprep.subr.bf16.mxu1 %v2927_v24 }
  0xd1   :  { %2679 = vmatpush3.bf16.msra.mxu0 %v2928_v25  ;;  %2707 = vmatpush3.bf16.msra.mxu1 %v2929_v26  ;;  %v433_v25 = vsub.s32 5, %v3427_v38  ;;  %v437_v26 = vsub.s32 6, %v3427_v38 }
  0xd2   :  { %2680 = vmatprep.subr.bf16.mxu0 %v2930_v27  ;;  %2708 = vmatprep.subr.bf16.mxu1 %v2931_v28 }
  0xd5   :  { %2681 = vmatpush3.bf16.msra.mxu0 %v2932_v29  ;;  %2709 = vmatpush3.bf16.msra.mxu1 %v2933_v30 }
  0xd6   :  { %2682 = vmatprep.subr.bf16.mxu0 %v2934_v31  ;;  %2710 = vmatprep.subr.bf16.mxu1 %v2935_v32  ;;  %v441_v32 = vsub.s32 7, %v3427_v38 }
  0xd9   :  { %2683 = vmatpush3.bf16.msra.mxu0 %v2936_v33  ;;  %2711 = vmatpush3.bf16.msra.mxu1 %v2937_v34  ;;  %v2944_v33 = vld [vmem:[#allocation8 + $0x108] sm:$0xff]  }
  0xda   :  { %2724 = vmatprep.subr.bf16.mxu0 %v2938_v35  ;;  %2752 = vmatprep.subr.bf16.mxu1 %v2939_v36 }
 0x15e   :  { %v702_v48 = vpop.f32.mrb[0].mxu0  ;;  %v755_v50 = vpop.f32.mrb[0].mxu1 }
 0x15f   :  { %v703_v49 = vadd.f32 %v702_v48, %v414_v44  ;;  %v704_v51 = vpop.f32.mrb[1].mxu0  ;;  %v756_v52 = vadd.f32 %v755_v50, %v422_v45  ;;  %v757_v54 = vpop.f32.mrb[1].mxu1  ;;  %v2946_v50 = vld [vmem:[#allocation8 + $0x150] sm:$0xff]  }
 0x160   :  { %v705_v53 = vadd.f32 %v704_v51, %v418_v46  ;;  %v706_v55 = vpop.f32.mrb[2].mxu0  ;;  %v758_v56 = vadd.f32 %v757_v54, %v3447_v47  ;;  %v759_v58 = vpop.f32.mrb[2].mxu1  ;;  %v2947_v54 = vld [vmem:[#allocation8 + $0x1d0] sm:$0xff]  }
 0x161   :  { %v707_v57 = vadd.f32 %v706_v55, %v414_v44  ;;  %v708_v59 = vpop.f32.mrb[3].mxu0  ;;  %v1094_v60 = vmax.f32 %v756_v52, 0.0  ;;  %v760_v61 = vadd.f32 %v759_v58, %v422_v45  ;;  %v761_v63 = vpop.f32.mrb[3].mxu1  ;;  %v1092_v1 = vmax.f32 %v703_v49, 0.0  ;;  %v2945_v49 = vld [vmem:[#allocation8 + $0x188] sm:$0xff]  }
 0x162   :  { %v709_v62 = vadd.f32 %v708_v59, %v418_v46  ;;  %v1095_v2 = vmax.f32 %v758_v56, 0.0  ;;  %v762_v4 = vadd.f32 %v761_v63, %v3447_v47  ;;  %v1093_v5 = vmax.f32 %v705_v53, 0.0  ;;  %v2948_v59 = vld [vmem:[#allocation8 + $0x110] sm:$0xff]  }
 0x163   :  { %v1108_v3 = vmax.f32 %v707_v57, 0.0  ;;  %v1110_v6 = vmax.f32 %v760_v61, 0.0  ;;  %v3460_v53 = vrot.slane %v3430_v40, %v429_v19  ;;  %v3475_v58 = vrot.slane %v3430_v40, %v441_v32  ;;  %v2949_v63 = vld [vmem:[#allocation8 + $0x190] sm:$0xff]  }
 0x164   :  { %v1109_v7 = vmax.f32 %v709_v62, 0.0  ;;  %v1111_v9 = vmax.f32 %v762_v4, 0.0 }
 0x165   :  { %v1156_v8 = vpack.c.bf16 %v1108_v3, %v1092_v1  ;;  %v1158_v10 = vpack.c.bf16 %v1110_v6, %v1094_v60  ;;  %v2951_v6 = vld [vmem:[#allocation8 + $0x1d8] sm:$0xff]  }
 0x166   :  { %v1157_v11 = vpack.c.bf16 %v1109_v7, %v1093_v5  ;;  %v712_v13 = vpop.f32.mrb[4].mxu0  ;;  %v1159_v14 = vpack.c.bf16 %v1111_v9, %v1095_v2  ;;  %v765_v0 = vpop.f32.mrb[4].mxu1  ;;  %v2950_v2 = vld [vmem:[#allocation8 + $0x158] sm:$0xff]  }
 0x167   :  { %v713_v17 = vadd.f32 %v712_v13, %v414_v44  ;;  %v714_v18 = vpop.f32.mrb[5].mxu0  ;;  %v766_v23 = vadd.f32 %v765_v0, %v422_v45  ;;  %v767_v24 = vpop.f32.mrb[5].mxu1 }
 0x168   :  { %1995 = vmatprep.mubr.bf16.mxu0 %v1157_v11  ;;  %v715_v21 = vadd.f32 %v714_v18, %v418_v46  ;;  %v716_v22 = vpop.f32.mrb[6].mxu0  ;;  %2044 = vmatprep.mubr.bf16.mxu1 %v1159_v14  ;;  %v768_v30 = vadd.f32 %v767_v24, %v3447_v47  ;;  %v769_v31 = vpop.f32.mrb[6].mxu1 }
 0x169   :  { %1996 = vmatmul.mubr.bf16.vlgmr.msra.gmra.mrb[32].mxu0 %v1156_v8  ;;  %v1124_v27 = vmax.f32 %v713_v17, 0.0  ;;  %v717_v28 = vadd.f32 %v716_v22, %v414_v44  ;;  %v718_v29 = vpop.f32.mrb[7].mxu0  ;;  %2045 = vmatmul.mubr.bf16.vlgmr.msra.gmra.mrb[32].mxu1 %v1158_v10  ;;  %v1126_v35 = vmax.f32 %v766_v23, 0.0  ;;  %v770_v37 = vadd.f32 %v769_v31, %v422_v45  ;;  %v771_v48 = vpop.f32.mrb[7].mxu1  ;;  %v2954_v22 = vld [vmem:[#allocation8 + $0x160] sm:$0xff]  }
 0x16a   :  { %2725 = vmatpush3.bf16.msra.mxu0 %v2940_v12  ;;  %v1125_v34 = vmax.f32 %v715_v21, 0.0  ;;  %v719_v36 = vadd.f32 %v718_v29, %v418_v46  ;;  %2753 = vmatpush3.bf16.msra.mxu1 %v2941_v15  ;;  %v1127_v44 = vmax.f32 %v768_v30, 0.0  ;;  %v772_v52 = vadd.f32 %v771_v48, %v3447_v47  ;;  %v2952_v15 = vld [vmem:[#allocation8 + $0x118] sm:$0xff]   ;;  %v2957_v48 = vld [vmem:[#allocation8 + $0x1a0] sm:$0xff]  }
 0x16b   :  { %2726 = vmatprep.subr.bf16.mxu0 %v2942_v16  ;;  %v1140_v51 = vmax.f32 %v717_v28, 0.0  ;;  %2754 = vmatprep.subr.bf16.mxu1 %v2943_v20  ;;  %v1142_v56 = vmax.f32 %v770_v37, 0.0  ;;  %v3465_v45 = vrot.slane %v3430_v40, %v433_v25  ;;  %v3470_v46 = vrot.slane %v3430_v40, %v437_v26  ;;  %v2953_v21 = vld [vmem:[#allocation8 + $0x198] sm:$0xff]   ;;  %v2955_v28 = vld [vmem:[#allocation8 + $0x1e0] sm:$0xff]  }
 0x16c   :  { %v1141_v55 = vmax.f32 %v719_v36, 0.0  ;;  %v1143_v57 = vmax.f32 %v772_v52, 0.0 }
 0x16d   :  { %v1172_v47 = vpack.c.bf16 %v1140_v51, %v1124_v27  ;;  %v1174_v61 = vpack.c.bf16 %v1142_v56, %v1126_v35 }
 0x16e   :  { %2727 = vmatpush3.bf16.msra.mxu0 %v2944_v33  ;;  %v1173_v60 = vpack.c.bf16 %v1141_v55, %v1125_v34  ;;  %v808_v62 = vpop.f32.mrb[8].mxu0  ;;  %2755 = vmatpush3.bf16.msra.mxu1 %v2945_v49  ;;  %v1175_v1 = vpack.c.bf16 %v1143_v57, %v1127_v44  ;;  %v861_v5 = vpop.f32.mrb[8].mxu1  ;;  %v2956_v34 = vld [vmem:[#allocation8 + $0x120] sm:$0xff]   ;;  %v2958_v49 = vld [vmem:[#allocation8 + $0x168] sm:$0xff]  }
 0x16f   :  { %2728 = vmatprep.subr.bf16.mxu0 %v2946_v50  ;;  %v809_v3 = vadd.f32 %v808_v62, %v3460_v53  ;;  %v810_v4 = vpop.f32.mrb[9].mxu0  ;;  %2756 = vmatprep.subr.bf16.mxu1 %v2947_v54  ;;  %v862_v8 = vadd.f32 %v861_v5, %v3470_v46  ;;  %v863_v9 = vpop.f32.mrb[9].mxu1  ;;  %v2959_v54 = vld [vmem:[#allocation8 + $0x1e8] sm:$0xff]  }
 0x170   :  { %2003 = vmatprep.mubr.bf16.mxu0 %v1173_v60  ;;  %v811_v40 = vadd.f32 %v810_v4, %v3465_v45  ;;  %v812_v7 = vpop.f32.mrb[10].mxu0  ;;  %2052 = vmatprep.mubr.bf16.mxu1 %v1175_v1  ;;  %v864_v13 = vadd.f32 %v863_v9, %v3475_v58  ;;  %v865_v14 = vpop.f32.mrb[10].mxu1 }
 0x171   :  { %2004 = vmatmul.mubr.bf16.gmra.mrb[36].mxu0 %v1172_v47  ;;  %v1096_v10 = vmax.f32 %v809_v3, 0.0  ;;  %v813_v11 = vadd.f32 %v812_v7, %v3460_v53  ;;  %v814_v12 = vpop.f32.mrb[11].mxu0  ;;  %2053 = vmatmul.mubr.bf16.gmra.mrb[36].mxu1 %v1174_v61  ;;  %v1098_v17 = vmax.f32 %v862_v8, 0.0  ;;  %v866_v0 = vadd.f32 %v865_v14, %v3470_v46  ;;  %v867_v20 = vpop.f32.mrb[11].mxu1  ;;  %v2961_v7 = vld [vmem:[#allocation8 + $0x1a8] sm:$0xff]   ;;  %v2962_v8 = vld [vmem:[#allocation8 + $0x170] sm:$0xff]  }
 0x172   :  { %2729 = vmatpush3.bf16.msra.mxu0 %v2948_v59  ;;  %v1097_v16 = vmax.f32 %v811_v40, 0.0  ;;  %v815_v18 = vadd.f32 %v814_v12, %v3465_v45  ;;  %2757 = vmatpush3.bf16.msra.mxu1 %v2949_v63  ;;  %v1099_v24 = vmax.f32 %v864_v13, 0.0  ;;  %v868_v27 = vadd.f32 %v867_v20, %v3475_v58  ;;  %v3492_v59 = vld [vmem:[#allocation7 + $0x8] sm:$0xff]  ;;  %v2963_v12 = vld [vmem:[#allocation8 + $0x1f0] sm:$0xff]  }
 0x173   :  { %2730 = vmatprep.subr.bf16.mxu0 %v2950_v2  ;;  %v1112_v23 = vmax.f32 %v813_v11, 0.0  ;;  %2758 = vmatprep.subr.bf16.mxu1 %v2951_v6  ;;  %v1114_v30 = vmax.f32 %v866_v0, 0.0  ;;  %v2960_v2 = vld [vmem:[#allocation8 + $0x128] sm:$0xff]   ;;  %v3502_v11 = vrot.slane %v3492_v59, %v413_v39  ;;  %v3512_v14 = vrot.slane %v3492_v59, %v421_v41  ;;  %v2965_v0 = vld [vmem:[#allocation8 + $0x1b0] sm:$0xff]   ;;  %v2966_v41 = vld [vmem:[#allocation8 + $0x178] sm:$0xff]  }
 0x174   :  { %v1113_v29 = vmax.f32 %v815_v18, 0.0  ;;  %v1115_v33 = vmax.f32 %v868_v27, 0.0  ;;  %v3519_v39 = vrot.slane %v3492_v59, %v425_v43  ;;  %v2967_v43 = vld [vmem:[#allocation8 + $0x1f8] sm:$0xff]  }
 0x175   :  { %v3485_v31 = vpack.c.bf16 %v1112_v23, %v1096_v10  ;;  %v3487_v36 = vpack.c.bf16 %v1114_v30, %v1098_v17 }
 0x176   :  { %2731 = vmatpush3.bf16.msra.mxu0 %v2952_v15  ;;  %v1161_v35 = vpack.c.bf16 %v1113_v29, %v1097_v16  ;;  %v818_v37 = vpop.f32.mrb[12].mxu0  ;;  %2759 = vmatpush3.bf16.msra.mxu1 %v2953_v21  ;;  %v1163_v50 = vpack.c.bf16 %v1115_v33, %v1099_v24  ;;  %v871_v52 = vpop.f32.mrb[12].mxu1  ;;  %v2964_v16 = vld [vmem:[#allocation8 + $0x130] sm:$0xff]  }
 0x177   :  { %2732 = vmatprep.subr.bf16.mxu0 %v2954_v22  ;;  %v819_v51 = vadd.f32 %v818_v37, %v3460_v53  ;;  %v820_v44 = vpop.f32.mrb[13].mxu0  ;;  %2760 = vmatprep.subr.bf16.mxu1 %v2955_v28  ;;  %v872_v47 = vadd.f32 %v871_v52, %v3470_v46  ;;  %v873_v57 = vpop.f32.mrb[13].mxu1 }
 0x178   :  { %2093 = vmatprep.mubr.bf16.mxu0 %v1161_v35  ;;  %v821_v55 = vadd.f32 %v820_v44, %v3465_v45  ;;  %v822_v56 = vpop.f32.mrb[14].mxu0  ;;  %2142 = vmatprep.mubr.bf16.mxu1 %v1163_v50  ;;  %v874_v63 = vadd.f32 %v873_v57, %v3475_v58  ;;  %v875_v1 = vpop.f32.mrb[14].mxu1 }
 0x179   :  { %v1128_v60 = vmax.f32 %v819_v51, 0.0  ;;  %v823_v61 = vadd.f32 %v822_v56, %v3460_v53  ;;  %v824_v62 = vpop.f32.mrb[15].mxu0  ;;  %v1130_v4 = vmax.f32 %v872_v47, 0.0  ;;  %v876_v6 = vadd.f32 %v875_v1, %v3470_v46  ;;  %v877_v40 = vpop.f32.mrb[15].mxu1 }
 0x17a   :  { %2733 = vmatpush3.bf16.msra.mxu0 %v2956_v34  ;;  %v1129_v3 = vmax.f32 %v821_v55, 0.0  ;;  %v825_v5 = vadd.f32 %v824_v62, %v3465_v45  ;;  %2761 = vmatpush3.bf16.msra.mxu1 %v2957_v48  ;;  %v1131_v53 = vmax.f32 %v874_v63, 0.0  ;;  %v878_v10 = vadd.f32 %v877_v40, %v3475_v58  ;;  %v2968_v48 = vld [vmem:[#allocation8 + $0x138] sm:$0xff]   ;;  %v2970_v55 = vld [vmem:[#allocation8 + $0x240] sm:$0xff]   ;;  %v2974_v40 = vld [vmem:[#allocation8 + $0x248] sm:$0xff]  }
 0x17b   :  { %2734 = vmatprep.subr.bf16.mxu0 %v2958_v49  ;;  %v1144_v9 = vmax.f32 %v823_v61, 0.0  ;;  %2762 = vmatprep.subr.bf16.mxu1 %v2959_v54  ;;  %v1146_v45 = vmax.f32 %v876_v6, 0.0  ;;  %v3507_v46 = vrot.slane %v3492_v59, %v417_v42  ;;  %v2969_v54 = vld [vmem:[#allocation8 + $0x1b8] sm:$0xff]   ;;  %v2973_v6 = vld [vmem:[#allocation8 + $0x280] sm:$0xff]  }
 0x17c   :  { %v1145_v13 = vmax.f32 %v825_v5, 0.0  ;;  %v1147_v15 = vmax.f32 %v878_v10, 0.0  ;;  %v2975_v10 = vld [vmem:[#allocation8 + $0x2c8] sm:$0xff]  }
 0x17d   :  { %v3514_v58 = vpack.c.bf16 %v1144_v9, %v1128_v60  ;;  %v3523_v18 = vpack.c.bf16 %v1146_v45, %v1130_v4  ;;  %v2971_v60 = vld [vmem:[#allocation8 + $0x2c0] sm:$0xff]  }
 0x17e   :  { %2735 = vmatpush3.bf16.msra.mxu0 %v2960_v2  ;;  %v3521_v17 = vpack.c.bf16 %v1145_v13, %v1129_v3  ;;  %v914_v42 = vpop.f32.mrb[16].mxu0  ;;  %2763 = vmatpush3.bf16.msra.mxu1 %v2961_v7  ;;  %v3525_v20 = vpack.c.bf16 %v1147_v15, %v1131_v53  ;;  %v967_v23 = vpop.f32.mrb[16].mxu1  ;;  %v2972_v2 = vld [vmem:[#allocation8 + $0x200] sm:$0xff]  }
 0x17f   :  { %2736 = vmatprep.subr.bf16.mxu0 %v2962_v8  ;;  %v915_v21 = vadd.f32 %v914_v42, %v3502_v11  ;;  %v916_v22 = vpop.f32.mrb[17].mxu0  ;;  %2764 = vmatprep.subr.bf16.mxu1 %v2963_v12  ;;  %v968_v28 = vadd.f32 %v967_v23, %v3512_v14  ;;  %v969_v29 = vpop.f32.mrb[17].mxu1 }
 0x180   :  { %v917_v24 = vadd.f32 %v916_v22, %v3507_v46  ;;  %v918_v27 = vpop.f32.mrb[18].mxu0  ;;  %v970_v35 = vadd.f32 %v969_v29, %v3519_v39  ;;  %v971_v37 = vpop.f32.mrb[18].mxu1  ;;  %v2976_v22 = vld [vmem:[#allocation8 + $0x208] sm:$0xff]   ;;  %v2978_v29 = vld [vmem:[#allocation8 + $0x250] sm:$0xff]  }
 0x181   :  { %v1100_v30 = vmax.f32 %v915_v21, 0.0  ;;  %v919_v33 = vadd.f32 %v918_v27, %v3502_v11  ;;  %v920_v34 = vpop.f32.mrb[19].mxu0  ;;  %v1102_v50 = vmax.f32 %v968_v28, 0.0  ;;  %v972_v44 = vadd.f32 %v971_v37, %v3512_v14  ;;  %v973_v52 = vpop.f32.mrb[19].mxu1 }
 0x182   :  { %2737 = vmatpush3.bf16.msra.mxu0 %v2964_v16  ;;  %v1101_v49 = vmax.f32 %v917_v24, 0.0  ;;  %v921_v51 = vadd.f32 %v920_v34, %v3507_v46  ;;  %2765 = vmatpush3.bf16.msra.mxu1 %v2965_v0  ;;  %v1103_v47 = vmax.f32 %v970_v35, 0.0  ;;  %v974_v57 = vadd.f32 %v973_v52, %v3519_v39 }
 0x183   :  { %2738 = vmatprep.subr.bf16.mxu0 %v2966_v41  ;;  %v1116_v56 = vmax.f32 %v919_v33, 0.0  ;;  %2766 = vmatprep.subr.bf16.mxu1 %v2967_v43  ;;  %v1118_v62 = vmax.f32 %v972_v44, 0.0  ;;  %v3562_v35 = vrot.slane %v3492_v59, %v433_v25 }
 0x184   :  { %v1117_v61 = vmax.f32 %v921_v51, 0.0  ;;  %v1119_v1 = vmax.f32 %v974_v57, 0.0  ;;  %v2982_v51 = vld [vmem:[#allocation8 + $0x258] sm:$0xff]  }
 0x185   :  { %v3535_v63 = vpack.c.bf16 %v1116_v56, %v1100_v30  ;;  %v3539_v4 = vpack.c.bf16 %v1118_v62, %v1102_v50 }
 0x186   :  { %2739 = vmatpush3.bf16.msra.mxu0 %v2968_v48  ;;  %v3537_v3 = vpack.c.bf16 %v1117_v61, %v1101_v49  ;;  %v924_v5 = vpop.f32.mrb[20].mxu0  ;;  %2767 = vmatpush3.bf16.msra.mxu1 %v2969_v54  ;;  %v3541_v7 = vpack.c.bf16 %v1119_v1, %v1103_v47  ;;  %v977_v53 = vpop.f32.mrb[20].mxu1  ;;  %v2980_v48 = vld [vmem:[#allocation8 + $0x210] sm:$0xff]   ;;  %v2984_v1 = vld [vmem:[#allocation8 + $0x218] sm:$0xff]  }
 0x187   :  { %2780 = vmatprep.subr.bf16.mxu0 %v2970_v55  ;;  %v925_v8 = vadd.f32 %v924_v5, %v3502_v11  ;;  %v926_v9 = vpop.f32.mrb[21].mxu0  ;;  %2808 = vmatprep.subr.bf16.mxu1 %v2971_v60  ;;  %v978_v45 = vadd.f32 %v977_v53, %v3512_v14  ;;  %v979_v15 = vpop.f32.mrb[21].mxu1 }
 0x188   :  { %v927_v12 = vadd.f32 %v926_v9, %v3507_v46  ;;  %v928_v13 = vpop.f32.mrb[22].mxu0  ;;  %v980_v41 = vadd.f32 %v979_v15, %v3519_v39  ;;  %v981_v21 = vpop.f32.mrb[22].mxu1  ;;  %v2986_v9 = vld [vmem:[#allocation8 + $0x260] sm:$0xff]  }
 0x189   :  { %2094 = vmatmul.mubr.bf16.vlgmr.msra.gmra.mrb[40].mxu0 %v3485_v31  ;;  %v1132_v16 = vmax.f32 %v925_v8, 0.0  ;;  %v929_v42 = vadd.f32 %v928_v13, %v3502_v11  ;;  %v930_v0 = vpop.f32.mrb[23].mxu0  ;;  %2143 = vmatmul.mubr.bf16.vlgmr.msra.gmra.mrb[40].mxu1 %v3487_v36  ;;  %v1134_v43 = vmax.f32 %v978_v45, 0.0  ;;  %v982_v27 = vadd.f32 %v981_v21, %v3512_v14  ;;  %v983_v28 = vpop.f32.mrb[23].mxu1  ;;  %v2977_v31 = vld [vmem:[#allocation8 + $0x288] sm:$0xff]   ;;  %v2987_v13 = vld [vmem:[#allocation8 + $0x2e0] sm:$0xff]  }
 0x18a   :  { %2781 = vmatpush3.bf16.msra.mxu0 %v2972_v2  ;;  %v1133_v23 = vmax.f32 %v927_v12, 0.0  ;;  %v931_v24 = vadd.f32 %v930_v0, %v3507_v46  ;;  %2809 = vmatpush3.bf16.msra.mxu1 %v2973_v6  ;;  %v1135_v30 = vmax.f32 %v980_v41, 0.0  ;;  %v984_v33 = vadd.f32 %v983_v28, %v3519_v39  ;;  %v2979_v46 = vld [vmem:[#allocation8 + $0x2d0] sm:$0xff]  }
 0x18b   :  { %2782 = vmatprep.subr.bf16.mxu0 %v2974_v40  ;;  %v1148_v11 = vmax.f32 %v929_v42, 0.0  ;;  %v3556_v36 = vrot.slane %v3492_v59, %v429_v19  ;;  %2810 = vmatprep.subr.bf16.mxu1 %v2975_v10  ;;  %v1150_v14 = vmax.f32 %v982_v27, 0.0  ;;  %v3567_v39 = vrot.slane %v3492_v59, %v437_v26  ;;  %v2981_v26 = vld [vmem:[#allocation8 + $0x290] sm:$0xff]   ;;  %v2988_v42 = vld [vmem:[#allocation8 + $0x220] sm:$0xff]   ;;  %v2991_v27 = vld [vmem:[#allocation8 + $0x2e8] sm:$0xff]  }
 0x18c   :  { %2101 = vmatprep.mubr.bf16.mxu0 %v3521_v17  ;;  %v1149_v34 = vmax.f32 %v931_v24, 0.0  ;;  %2150 = vmatprep.mubr.bf16.mxu1 %v3525_v20  ;;  %v1151_v37 = vmax.f32 %v984_v33, 0.0  ;;  %v3575_v17 = vrot.slane %v3492_v59, %v441_v32  ;;  %v2983_v32 = vld [vmem:[#allocation8 + $0x2d8] sm:$0xff]  }
 0x18d   :  { %v3570_v19 = vpack.c.bf16 %v1148_v11, %v1132_v16  ;;  %v3579_v25 = vpack.c.bf16 %v1150_v14, %v1134_v43 }
 0x18e   :  { %2783 = vmatpush3.bf16.msra.mxu0 %v2976_v22  ;;  %v3577_v49 = vpack.c.bf16 %v1149_v34, %v1133_v23  ;;  %v1020_v50 = vpop.f32.mrb[24].mxu0  ;;  %2811 = vmatpush3.bf16.msra.mxu1 %v2977_v31  ;;  %v3581_v20 = vpack.c.bf16 %v1151_v37, %v1135_v30  ;;  %v1073_v38 = vpop.f32.mrb[24].mxu1  ;;  %v2989_v22 = vld [vmem:[#allocation8 + $0x2a0] sm:$0xff]   ;;  %v2990_v23 = vld [vmem:[#allocation8 + $0x268] sm:$0xff]  }
 0x18f   :  { %2784 = vmatprep.subr.bf16.mxu0 %v2978_v29  ;;  %v1021_v44 = vadd.f32 %v1020_v50, %v3556_v36  ;;  %v1022_v52 = vpop.f32.mrb[25].mxu0  ;;  %2812 = vmatprep.subr.bf16.mxu1 %v2979_v46  ;;  %v1074_v55 = vadd.f32 %v1073_v38, %v3567_v39  ;;  %v1075_v56 = vpop.f32.mrb[25].mxu1  ;;  %v2992_v37 = vld [vmem:[#allocation8 + $0x228] sm:$0xff]   ;;  %v2994_v38 = vld [vmem:[#allocation8 + $0x270] sm:$0xff]  }
 0x190   :  { %v1023_v59 = vadd.f32 %v1022_v52, %v3562_v35  ;;  %v1024_v54 = vpop.f32.mrb[26].mxu0  ;;  %v1076_v61 = vadd.f32 %v1075_v56, %v3575_v17  ;;  %v1077_v62 = vpop.f32.mrb[26].mxu1  ;;  %v2993_v52 = vld [vmem:[#allocation8 + $0x2a8] sm:$0xff]  }
 0x191   :  { %2102 = vmatmul.mubr.bf16.gmra.mrb[44].mxu0 %v3514_v58  ;;  %v1104_v47 = vmax.f32 %v1021_v44, 0.0  ;;  %v1025_v57 = vadd.f32 %v1024_v54, %v3556_v36  ;;  %v1026_v60 = vpop.f32.mrb[27].mxu0  ;;  %2151 = vmatmul.mubr.bf16.gmra.mrb[44].mxu1 %v3523_v18  ;;  %v1106_v5 = vmax.f32 %v1074_v55, 0.0  ;;  %v1078_v40 = vadd.f32 %v1077_v62, %v3567_v39  ;;  %v1079_v8 = vpop.f32.mrb[27].mxu1  ;;  %v2985_v58 = vld [vmem:[#allocation8 + $0x298] sm:$0xff]   ;;  %v2995_v54 = vld [vmem:[#allocation8 + $0x2f0] sm:$0xff]  }
 0x192   :  { %2785 = vmatpush3.bf16.msra.mxu0 %v2980_v48  ;;  %v1105_v2 = vmax.f32 %v1023_v59, 0.0  ;;  %v1027_v6 = vadd.f32 %v1026_v60, %v3562_v35  ;;  %2813 = vmatpush3.bf16.msra.mxu1 %v2981_v26  ;;  %v1107_v10 = vmax.f32 %v1076_v61, 0.0  ;;  %v1080_v12 = vadd.f32 %v1079_v8, %v3575_v17  ;;  %v2997_v61 = vld [vmem:[#allocation8 + $0x2b0] sm:$0xff]   ;;  %v2998_v62 = vld [vmem:[#allocation8 + $0x278] sm:$0xff]   ;;  %v3004_v8 = vld [vmem:[#allocation8 + $0x300] sm:$0xff]  }
 0x193   :  { %2786 = vmatprep.subr.bf16.mxu0 %v2982_v51  ;;  %v1120_v53 = vmax.f32 %v1025_v57, 0.0  ;;  %2814 = vmatprep.subr.bf16.mxu1 %v2983_v32  ;;  %v1122_v45 = vmax.f32 %v1078_v40, 0.0  ;;  %v3003_v40 = vld [vmem:[#allocation8 + $0x3c0] sm:$0xff]  }
 0x194   :  { %2191 = vmatprep.mubr.bf16.mxu0 %v3537_v3  ;;  %v1121_v18 = vmax.f32 %v1027_v6, 0.0  ;;  %2240 = vmatprep.mubr.bf16.mxu1 %v3541_v7  ;;  %v1123_v16 = vmax.f32 %v1080_v12, 0.0  ;;  %v3002_v6 = vld [vmem:[#allocation8 + $0x340] sm:$0xff]   ;;  %v3009_v12 = vld [vmem:[#allocation8 + $0x388] sm:$0xff]  }
 0x195   :  { %v3595_v15 = vpack.c.bf16 %v1120_v53, %v1104_v47  ;;  %v3599_v41 = vpack.c.bf16 %v1122_v45, %v1106_v5  ;;  %v3001_v5 = vld [vmem:[#allocation8 + $0x2b8] sm:$0xff]   ;;  %v3007_v53 = vld [vmem:[#allocation8 + $0x3c8] sm:$0xff]   ;;  %v3012_v45 = vld [vmem:[#allocation8 + $0x310] sm:$0xff]  }
 0x196   :  { %2787 = vmatpush3.bf16.msra.mxu0 %v2984_v1  ;;  %v3597_v0 = vpack.c.bf16 %v1121_v18, %v1105_v2  ;;  %v1030_v21 = vpop.f32.mrb[28].mxu0  ;;  %2815 = vmatpush3.bf16.msra.mxu1 %v2985_v58  ;;  %v3601_v43 = vpack.c.bf16 %v1123_v16, %v1107_v10  ;;  %v1083_v7 = vpop.f32.mrb[28].mxu1  ;;  %v3000_v2 = vld [vmem:[#allocation8 + $0x238] sm:$0xff]   ;;  %v3005_v58 = vld [vmem:[#allocation8 + $0x380] sm:$0xff]   ;;  %v3008_v10 = vld [vmem:[#allocation8 + $0x308] sm:$0xff]  }
 0x197   :  { %2788 = vmatprep.subr.bf16.mxu0 %v2986_v9  ;;  %v1031_v3 = vadd.f32 %v1030_v21, %v3556_v36  ;;  %v1032_v24 = vpop.f32.mrb[29].mxu0  ;;  %2816 = vmatprep.subr.bf16.mxu1 %v2987_v13  ;;  %v1084_v29 = vadd.f32 %v1083_v7, %v3567_v39  ;;  %v1085_v11 = vpop.f32.mrb[29].mxu1  ;;  %v3006_v9 = vld [vmem:[#allocation8 + $0x348] sm:$0xff]   ;;  %v3010_v13 = vld [vmem:[#allocation8 + $0x350] sm:$0xff]   ;;  %v3018_v21 = vld [vmem:[#allocation8 + $0x360] sm:$0xff]  }
 0x198   :  { %v1033_v28 = vadd.f32 %v1032_v24, %v3562_v35  ;;  %v1034_v31 = vpop.f32.mrb[30].mxu0  ;;  %v1086_v34 = vadd.f32 %v1085_v11, %v3575_v17  ;;  %v1087_v14 = vpop.f32.mrb[30].mxu1  ;;  %v3011_v18 = vld [vmem:[#allocation8 + $0x3d0] sm:$0xff]   ;;  %v3025_v24 = vld [vmem:[#allocation8 + $0x3a8] sm:$0xff]   ;;  %v3033_v11 = vld [vmem:[#allocation8 + $0x3b8] sm:$0xff]  }
 0x199   :  { %v1136_v30 = vmax.f32 %v1031_v3, 0.0  ;;  %v1035_v33 = vadd.f32 %v1034_v31, %v3556_v36  ;;  %v1036_v46 = vpop.f32.mrb[31].mxu0  ;;  %v1138_v50 = vmax.f32 %v1084_v29, 0.0  ;;  %v1088_v51 = vadd.f32 %v1087_v14, %v3567_v39  ;;  %v1089_v44 = vpop.f32.mrb[31].mxu1  ;;  %v3013_v16 = vld [vmem:[#allocation8 + $0x390] sm:$0xff]   ;;  %v3023_v3 = vld [vmem:[#allocation8 + $0x3e8] sm:$0xff]  }
 0x19a   :  { %2789 = vmatpush3.bf16.msra.mxu0 %v2988_v42  ;;  %v1137_v48 = vmax.f32 %v1033_v28, 0.0  ;;  %v1037_v26 = vadd.f32 %v1036_v46, %v3562_v35  ;;  %2817 = vmatpush3.bf16.msra.mxu1 %v2989_v22  ;;  %v1139_v59 = vmax.f32 %v1086_v34, 0.0  ;;  %v1090_v36 = vadd.f32 %v1089_v44, %v3575_v17  ;;  %v2996_v35 = vld [vmem:[#allocation8 + $0x230] sm:$0xff]   ;;  %v2999_v17 = vld [vmem:[#allocation8 + $0x2f8] sm:$0xff]   ;;  %v3020_v22 = vld [vmem:[#allocation8 + $0x320] sm:$0xff]  }
 0x19b   :  { %2790 = vmatprep.subr.bf16.mxu0 %v2990_v23  ;;  %v1152_v32 = vmax.f32 %v1035_v33, 0.0  ;;  %2818 = vmatprep.subr.bf16.mxu1 %v2991_v27  ;;  %v1154_v56 = vmax.f32 %v1088_v51, 0.0  ;;  %v3016_v42 = vld [vmem:[#allocation8 + $0x318] sm:$0xff]   ;;  %v3021_v23 = vld [vmem:[#allocation8 + $0x3a0] sm:$0xff]   ;;  %v3026_v7 = vld [vmem:[#allocation8 + $0x370] sm:$0xff]  }
 0x19c   :  { %v1153_v55 = vmax.f32 %v1037_v26, 0.0  ;;  %v1155_v57 = vmax.f32 %v1090_v36, 0.0  ;;  %v3027_v27 = vld [vmem:[#allocation8 + $0x3f0] sm:$0xff]   ;;  %v3030_v28 = vld [vmem:[#allocation8 + $0x378] sm:$0xff]   ;;  %v2529_v46 = vld [vmem:[#allocation10] ss:$0 sm:$0xff] }
 0x19d   :  { %v3611_v47 = vpack.c.bf16 %v1152_v32, %v1136_v30  ;;  %v3615_v39 = vpack.c.bf16 %v1154_v56, %v1138_v50  ;;  %v3031_v31 = vld [vmem:[#allocation8 + $0x3f8] sm:$0xff]  }
 0x19e   :  { %2791 = vmatpush3.bf16.msra.mxu0 %v2992_v37  ;;  %v3613_v60 = vpack.c.bf16 %v1153_v55, %v1137_v48  ;;  %2819 = vmatpush3.bf16.msra.mxu1 %v2993_v52  ;;  %v3617_v1 = vpack.c.bf16 %v1155_v57, %v1139_v59  ;;  %v3032_v29 = vld [vmem:[#allocation8 + $0x338] sm:$0xff]  }
 0x19f   :  { %2792 = vmatprep.subr.bf16.mxu0 %v2994_v38  ;;  %2820 = vmatprep.subr.bf16.mxu1 %v2995_v54 }
 0x1a2   :  { %2793 = vmatpush3.bf16.msra.mxu0 %v2996_v35  ;;  %2821 = vmatpush3.bf16.msra.mxu1 %v2997_v61 }
 0x1a3   :  { %2794 = vmatprep.subr.bf16.mxu0 %v2998_v62  ;;  %2822 = vmatprep.subr.bf16.mxu1 %v2999_v17 }
 0x1a6   :  { %2795 = vmatpush3.bf16.msra.mxu0 %v3000_v2  ;;  %2823 = vmatpush3.bf16.msra.mxu1 %v3001_v5 }
 0x1a7   :  { %2836 = vmatprep.subr.bf16.mxu0 %v3002_v6  ;;  %2864 = vmatprep.subr.bf16.mxu1 %v3003_v40 }
 0x1a9   :  { %2192 = vmatmul.mubr.bf16.vlgmr.msra.gmra.mrb[48].mxu0 %v3535_v63  ;;  %2241 = vmatmul.mubr.bf16.vlgmr.msra.gmra.mrb[48].mxu1 %v3539_v4  ;;  %v3014_v63 = vld [vmem:[#allocation8 + $0x358] sm:$0xff]  }
 0x1aa   :  { %2837 = vmatpush3.bf16.msra.mxu0 %v3004_v8  ;;  %2865 = vmatpush3.bf16.msra.mxu1 %v3005_v58  ;;  %v3015_v4 = vld [vmem:[#allocation8 + $0x3d8] sm:$0xff]  }
 0x1ab   :  { %2838 = vmatprep.subr.bf16.mxu0 %v3006_v9  ;;  %2866 = vmatprep.subr.bf16.mxu1 %v3007_v53 }
 0x1ac   :  { %2199 = vmatprep.mubr.bf16.mxu0 %v3577_v49  ;;  %2248 = vmatprep.mubr.bf16.mxu1 %v3581_v20  ;;  %v3017_v49 = vld [vmem:[#allocation8 + $0x398] sm:$0xff]   ;;  %v3019_v20 = vld [vmem:[#allocation8 + $0x3e0] sm:$0xff]  }
 0x1ae   :  { %2839 = vmatpush3.bf16.msra.mxu0 %v3008_v10  ;;  %2867 = vmatpush3.bf16.msra.mxu1 %v3009_v12 }
 0x1af   :  { %2840 = vmatprep.subr.bf16.mxu0 %v3010_v13  ;;  %2868 = vmatprep.subr.bf16.mxu1 %v3011_v18 }
 0x1b1   :  { %2200 = vmatmul.mubr.bf16.gmra.mrb[52].mxu0 %v3570_v19  ;;  %2249 = vmatmul.mubr.bf16.gmra.mrb[52].mxu1 %v3579_v25  ;;  %v3022_v19 = vld [vmem:[#allocation8 + $0x368] sm:$0xff]  }
 0x1b2   :  { %2841 = vmatpush3.bf16.msra.mxu0 %v3012_v45  ;;  %2869 = vmatpush3.bf16.msra.mxu1 %v3013_v16  ;;  %v3024_v25 = vld [vmem:[#allocation8 + $0x328] sm:$0xff]  }
 0x1b3   :  { %2842 = vmatprep.subr.bf16.mxu0 %v3014_v63  ;;  %2870 = vmatprep.subr.bf16.mxu1 %v3015_v4 }
 0x1b4   :  { %2289 = vmatprep.mubr.bf16.mxu0 %v3597_v0  ;;  %2338 = vmatprep.mubr.bf16.mxu1 %v3601_v43  ;;  %v3028_v0 = vld [vmem:[#allocation8 + $0x330] sm:$0xff]  }
 0x1b5   :  { %v3029_v43 = vld [vmem:[#allocation8 + $0x3b0] sm:$0xff]  }
 0x1b6   :  { %2843 = vmatpush3.bf16.msra.mxu0 %v3016_v42  ;;  %2871 = vmatpush3.bf16.msra.mxu1 %v3017_v49 }
 0x1b7   :  { %2844 = vmatprep.subr.bf16.mxu0 %v3018_v21  ;;  %2872 = vmatprep.subr.bf16.mxu1 %v3019_v20 }
 0x1ba   :  { %2845 = vmatpush3.bf16.msra.mxu0 %v3020_v22  ;;  %2873 = vmatpush3.bf16.msra.mxu1 %v3021_v23 }
 0x1bb   :  { %2846 = vmatprep.subr.bf16.mxu0 %v3022_v19  ;;  %2874 = vmatprep.subr.bf16.mxu1 %v3023_v3 }
 0x1be   :  { %2847 = vmatpush3.bf16.msra.mxu0 %v3024_v25  ;;  %2875 = vmatpush3.bf16.msra.mxu1 %v3025_v24 }
 0x1bf   :  { %2848 = vmatprep.subr.bf16.mxu0 %v3026_v7  ;;  %2876 = vmatprep.subr.bf16.mxu1 %v3027_v27 }
 0x1c2   :  { %2849 = vmatpush3.bf16.msra.mxu0 %v3028_v0  ;;  %2877 = vmatpush3.bf16.msra.mxu1 %v3029_v43 }
 0x1c3   :  { %2850 = vmatprep.subr.bf16.mxu0 %v3030_v28  ;;  %2878 = vmatprep.subr.bf16.mxu1 %v3031_v31 }
 0x1c6   :  { %2851 = vmatpush3.bf16.msra.mxu0 %v3032_v29  ;;  %2879 = vmatpush3.bf16.msra.mxu1 %v3033_v11 }
 0x1c9   :  { %2290 = vmatmul.mubr.bf16.vlgmr.msra.gmra.mrb[56].mxu0 %v3595_v15  ;;  %2339 = vmatmul.mubr.bf16.vlgmr.msra.gmra.mrb[56].mxu1 %v3599_v41 }
 0x1ca   :  { %2297 = vmatprep.mubr.bf16.mxu0 %v3613_v60  ;;  %2346 = vmatprep.mubr.bf16.mxu1 %v3617_v1 }
 0x1d1   :  { %2298 = vmatmul.mubr.bf16.gmra.mrb[60].mxu0 %v3611_v47  ;;  %2347 = vmatmul.mubr.bf16.gmra.mrb[60].mxu1 %v3615_v39 }
 0x23c   :  { %v2684_v30 = vpop.f32.mrb[32].mxu0  ;;  %v2712_v33 = vpop.f32.mrb[32].mxu1 }
 0x23d   :  { %v2685_v34 = vpop.f32.mrb[33].mxu0  ;;  %v2713_v37 = vpop.f32.mrb[33].mxu1 }
 0x23e   :  { %v2686_v14 = vadd.f32 %v2685_v34, %v2684_v30  ;;  %v2687_v48 = vpop.f32.mrb[34].mxu0  ;;  %v2714_v50 = vadd.f32 %v2713_v37, %v2712_v33  ;;  %v2715_v26 = vpop.f32.mrb[34].mxu1 }
 0x23f   :  { %v2688_v15 = vpop.f32.mrb[35].mxu0  ;;  %v2716_v44 = vpop.f32.mrb[35].mxu1 }
 0x240   :  { %v1998_v51 = vadd.f32 %v2686_v14, %v2529_v46  ;;  %v2689_v41 = vadd.f32 %v2688_v15, %v2687_v48  ;;  %v2717_v52 = vadd.f32 %v2716_v44, %v2715_v26 }
 0x242   :  { %v2047_v38 = vadd.f32 %v2714_v50, %v1998_v51  ;;  %v2001_v32 = vadd.f32 %v2689_v41, %v2529_v46 }
 0x244   :  { %v2050_v59 = vadd.f32 %v2717_v52, %v2001_v32  ;;  %v2690_v36 = vpop.f32.mrb[36].mxu0  ;;  %v2718_v55 = vpop.f32.mrb[36].mxu1 }
 0x245   :  { %v2691_v54 = vpop.f32.mrb[37].mxu0  ;;  %v2719_v57 = vpop.f32.mrb[37].mxu1 }
 0x246   :  { %v2692_v56 = vadd.f32 %v2691_v54, %v2690_v36  ;;  %v2693_v47 = vpop.f32.mrb[38].mxu0  ;;  %v2720_v60 = vadd.f32 %v2719_v57, %v2718_v55  ;;  %v2721_v39 = vpop.f32.mrb[38].mxu1 }
 0x247   :  { %v2694_v35 = vpop.f32.mrb[39].mxu0  ;;  %v2722_v1 = vpop.f32.mrb[39].mxu1 }
 0x248   :  { %v2006_v61 = vadd.f32 %v2692_v56, %v2529_v46  ;;  %v2695_v62 = vadd.f32 %v2694_v35, %v2693_v47  ;;  %v2723_v17 = vadd.f32 %v2722_v1, %v2721_v39 }
 0x24a   :  { %v2009_v2 = vadd.f32 %v2695_v62, %v2529_v46  ;;  %v2055_v5 = vadd.f32 %v2720_v60, %v2006_v61 }
 0x24c   :  { %v2058_v6 = vadd.f32 %v2723_v17, %v2009_v2 }
 0x25c   :  { %v2740_v40 = vpop.f32.mrb[40].mxu0  ;;  %v2768_v8 = vpop.f32.mrb[40].mxu1 }
 0x25d   :  { %v2741_v58 = vpop.f32.mrb[41].mxu0  ;;  %v2769_v53 = vpop.f32.mrb[41].mxu1 }
 0x25e   :  { %v2742_v9 = vadd.f32 %v2741_v58, %v2740_v40  ;;  %v2743_v10 = vpop.f32.mrb[42].mxu0  ;;  %v2770_v12 = vadd.f32 %v2769_v53, %v2768_v8  ;;  %v2771_v13 = vpop.f32.mrb[42].mxu1 }
 0x25f   :  { %v2744_v18 = vpop.f32.mrb[43].mxu0  ;;  %v2772_v63 = vpop.f32.mrb[43].mxu1 }
 0x260   :  { %v2096_v45 = vadd.f32 %v2742_v9, %v2047_v38  ;;  %v2745_v16 = vadd.f32 %v2744_v18, %v2743_v10  ;;  %v2773_v4 = vadd.f32 %v2772_v63, %v2771_v13 }
 0x262   :  { %v2145_v42 = vadd.f32 %v2770_v12, %v2096_v45  ;;  %v2099_v49 = vadd.f32 %v2745_v16, %v2050_v59 }
 0x264   :  { %v2148_v21 = vadd.f32 %v2773_v4, %v2099_v49  ;;  %v2746_v20 = vpop.f32.mrb[44].mxu0  ;;  %v2774_v23 = vpop.f32.mrb[44].mxu1  ;;  %v3044_v4 = vld [vmem:[#allocation2] sm:$0xff]  }
 0x265   :  { %v2747_v22 = vpop.f32.mrb[45].mxu0  ;;  %v2775_v25 = vpop.f32.mrb[45].mxu1 }
 0x266   :  { %v2748_v19 = vadd.f32 %v2747_v22, %v2746_v20  ;;  %v2749_v3 = vpop.f32.mrb[46].mxu0  ;;  %v2776_v7 = vadd.f32 %v2775_v25, %v2774_v23  ;;  %v2777_v27 = vpop.f32.mrb[46].mxu1  ;;  %v2356_v22 = vunpack.c.h.bf16 %v3044_v4 }
 0x267   :  { %v2750_v24 = vpop.f32.mrb[47].mxu0  ;;  %v2778_v28 = vpop.f32.mrb[47].mxu1 }
 0x268   :  { %v2104_v0 = vadd.f32 %v2748_v19, %v2055_v5  ;;  %v2751_v43 = vadd.f32 %v2750_v24, %v2749_v3  ;;  %v2779_v31 = vadd.f32 %v2778_v28, %v2777_v27 }
 0x26a   :  { %v2107_v29 = vadd.f32 %v2751_v43, %v2058_v6  ;;  %v2153_v11 = vadd.f32 %v2776_v7, %v2104_v0 }
 0x26c   :  { %v2156_v30 = vadd.f32 %v2779_v31, %v2107_v29 }
 0x27c   :  { %v2796_v33 = vpop.f32.mrb[48].mxu0  ;;  %v2824_v46 = vpop.f32.mrb[48].mxu1 }
 0x27d   :  { %v2797_v34 = vpop.f32.mrb[49].mxu0  ;;  %v2825_v37 = vpop.f32.mrb[49].mxu1 }
 0x27e   :  { %v2798_v14 = vadd.f32 %v2797_v34, %v2796_v33  ;;  %v2799_v48 = vpop.f32.mrb[50].mxu0  ;;  %v2826_v50 = vadd.f32 %v2825_v37, %v2824_v46  ;;  %v2827_v26 = vpop.f32.mrb[50].mxu1  ;;  %v3045_v34 = vld [vmem:[#allocation2 + $0x8] sm:$0xff]  }
 0x27f   :  { %v2800_v15 = vpop.f32.mrb[51].mxu0  ;;  %v2828_v44 = vpop.f32.mrb[51].mxu1 }
 0x280   :  { %v2194_v51 = vadd.f32 %v2798_v14, %v2145_v42  ;;  %v2801_v41 = vadd.f32 %v2800_v15, %v2799_v48  ;;  %v2829_v52 = vadd.f32 %v2828_v44, %v2827_v26  ;;  %v2355_v42 = vunpack.c.l.bf16 %v3044_v4 }
 0x281   :  { %v2357_v14 = vunpack.c.l.bf16 %v3045_v34  ;;  %v2358_v15 = vunpack.c.h.bf16 %v3045_v34 }
 0x282   :  { %v2243_v38 = vadd.f32 %v2826_v50, %v2194_v51  ;;  %v2197_v32 = vadd.f32 %v2801_v41, %v2148_v21 }
 0x284   :  { %v2246_v59 = vadd.f32 %v2829_v52, %v2197_v32  ;;  %v2802_v36 = vpop.f32.mrb[52].mxu0  ;;  %v2830_v55 = vpop.f32.mrb[52].mxu1 }
 0x285   :  { %v2803_v54 = vpop.f32.mrb[53].mxu0  ;;  %v2831_v57 = vpop.f32.mrb[53].mxu1 }
 0x286   :  { %v2804_v56 = vadd.f32 %v2803_v54, %v2802_v36  ;;  %v2805_v47 = vpop.f32.mrb[54].mxu0  ;;  %v2832_v60 = vadd.f32 %v2831_v57, %v2830_v55  ;;  %v2833_v39 = vpop.f32.mrb[54].mxu1 }
 0x287   :  { %v2806_v35 = vpop.f32.mrb[55].mxu0  ;;  %v2834_v1 = vpop.f32.mrb[55].mxu1 }
 0x288   :  { %v2202_v61 = vadd.f32 %v2804_v56, %v2153_v11  ;;  %v2807_v62 = vadd.f32 %v2806_v35, %v2805_v47  ;;  %v2835_v17 = vadd.f32 %v2834_v1, %v2833_v39 }
 0x28a   :  { %v2205_v2 = vadd.f32 %v2807_v62, %v2156_v30  ;;  %v2251_v5 = vadd.f32 %v2832_v60, %v2202_v61 }
 0x28c   :  { %v2254_v6 = vadd.f32 %v2835_v17, %v2205_v2 }
 0x29c   :  { %v2852_v40 = vpop.f32.mrb[56].mxu0  ;;  %v2880_v8 = vpop.f32.mrb[56].mxu1 }
 0x29d   :  { %v2853_v58 = vpop.f32.mrb[57].mxu0  ;;  %v2881_v53 = vpop.f32.mrb[57].mxu1 }
 0x29e   :  { %v2854_v9 = vadd.f32 %v2853_v58, %v2852_v40  ;;  %v2855_v10 = vpop.f32.mrb[58].mxu0  ;;  %v2882_v12 = vadd.f32 %v2881_v53, %v2880_v8  ;;  %v2883_v13 = vpop.f32.mrb[58].mxu1 }
 0x29f   :  { %v2856_v18 = vpop.f32.mrb[59].mxu0  ;;  %v2884_v63 = vpop.f32.mrb[59].mxu1 }
 0x2a0   :  { %v2292_v45 = vadd.f32 %v2854_v9, %v2243_v38  ;;  %v2857_v16 = vadd.f32 %v2856_v18, %v2855_v10  ;;  %v2885_v49 = vadd.f32 %v2884_v63, %v2883_v13 }
 0x2a2   :  { %v2341_v21 = vadd.f32 %v2882_v12, %v2292_v45  ;;  %v2295_v20 = vadd.f32 %v2857_v16, %v2246_v59 }
 0x2a4   :  { %v2344_v23 = vadd.f32 %v2885_v49, %v2295_v20  ;;  %v2858_v19 = vpop.f32.mrb[60].mxu0  ;;  %v2359_v3 = vadd.f32 %v2355_v42, %v2341_v21  ;;  %v2886_v25 = vpop.f32.mrb[60].mxu1  ;;  %v2658_v49 = vld [vmem:[#allocation11] ss:$0 sm:$0xff] }
 0x2a5   :  { %v2859_v24 = vpop.f32.mrb[61].mxu0  ;;  %v2887_v27 = vpop.f32.mrb[61].mxu1 }
 0x2a6   :  { %v2860_v7 = vadd.f32 %v2859_v24, %v2858_v19  ;;  %v2861_v0 = vpop.f32.mrb[62].mxu0  ;;  %v2363_v43 = vsel %vm661_vm0, %v2359_v3, 0.0  ;;  %v2360_v28 = vadd.f32 %v2356_v22, %v2344_v23  ;;  %v2888_v31 = vadd.f32 %v2887_v27, %v2886_v25  ;;  %v2889_v29 = vpop.f32.mrb[62].mxu1  ;;  %v2659_v22 = vld [vmem:[#allocation13] ss:$0 sm:$0xff] }
 0x2a7   :  { %v2862_v11 = vpop.f32.mrb[63].mxu0  ;;  %2364 = vadd.xlane.f32.xlu0 %v2363_v43  ;;  %v2890_v46 = vpop.f32.mrb[63].mxu1 }
 0x2a8   :  { %v2300_v30 = vadd.f32 %v2860_v7, %v2251_v5  ;;  %v2863_v33 = vadd.f32 %v2862_v11, %v2861_v0  ;;  %v2891_v37 = vadd.f32 %v2890_v46, %v2889_v29  ;;  %v2366_v26 = vsel %vm661_vm0, %v2360_v28, 0.0 }
 0x2aa   :  { %v2349_v48 = vadd.f32 %v2888_v31, %v2300_v30  ;;  %v2303_v50 = vadd.f32 %v2863_v33, %v2254_v6 }
 0x2ab   :  { %2367 = vadd.xlane.f32.xlu0 %v2366_v26 }
 0x2ac   :  { %v2352_v51 = vadd.f32 %v2891_v37, %v2303_v50  ;;  %v2361_v41 = vadd.f32 %v2357_v14, %v2349_v48 }
 0x2ae   :  { %v2369_v44 = vsel %vm661_vm0, %v2361_v41, 0.0  ;;  %v2362_v52 = vadd.f32 %v2358_v15, %v2352_v51 }
 0x2af   :  { %2370 = vadd.xlane.f32.xlu1 %v2369_v44 }
 0x2b0   :  { %v2372_v38 = vsel %vm661_vm0, %v2362_v52, 0.0 }
 0x2b3   :  { %2373 = vadd.xlane.f32.xlu1 %v2372_v38 }
 0x334   :  { %v2365_v32 = vpop.xlane.xlu0 %2364 }
 0x335   :  { %v2376_v59 = vmul.f32 0.03125, %v2365_v32 }
 0x337   :  { %v2380_v36 = vsub.f32 %v2359_v3, %v2376_v59 }
 0x338   :  { %v2368_v54 = vpop.xlane.xlu0 %2367 }
 0x339   :  { %v2377_v55 = vmul.f32 0.03125, %v2368_v54  ;;  %v2384_v56 = vmul.f32 %v2380_v36, %v2380_v36 }
 0x33b   :  { %v2381_v47 = vsub.f32 %v2360_v28, %v2377_v55  ;;  %v2388_v57 = vsel %vm661_vm0, %v2384_v56, 0.0 }
 0x33c   :  { %v2371_v35 = vpop.xlane.xlu1 %2370  ;;  %2389 = vadd.xlane.f32.xlu0 %v2388_v57 }
 0x33d   :  { %v2378_v60 = vmul.f32 0.03125, %v2371_v35  ;;  %v2385_v39 = vmul.f32 %v2381_v47, %v2381_v47 }
 0x33f   :  { %v2382_v61 = vsub.f32 %v2361_v41, %v2378_v60  ;;  %v2391_v62 = vsel %vm661_vm0, %v2385_v39, 0.0 }
 0x340   :  { %v2374_v1 = vpop.xlane.xlu1 %2373  ;;  %2392 = vadd.xlane.f32.xlu1 %v2391_v62 }
 0x341   :  { %v2379_v17 = vmul.f32 0.03125, %v2374_v1  ;;  %v2386_v2 = vmul.f32 %v2382_v61, %v2382_v61 }
 0x343   :  { %v2383_v5 = vsub.f32 %v2362_v52, %v2379_v17  ;;  %v2394_v6 = vsel %vm661_vm0, %v2386_v2, 0.0 }
 0x344   :  { %2395 = vadd.xlane.f32.xlu0 %v2394_v6 }
 0x345   :  { %v2387_v40 = vmul.f32 %v2383_v5, %v2383_v5 }
 0x347   :  { %v2397_v8 = vsel %vm661_vm0, %v2387_v40, 0.0 }
 0x348   :  { %2398 = vadd.xlane.f32.xlu1 %v2397_v8 }
 0x3c9   :  { %v2390_v58 = vpop.xlane.xlu0 %2389 }
 0x3ca   :  { %v2400_v9 = vmul.f32 0.03125, %v2390_v58 }
 0x3cc   :  { %v2404_v53 = vadd.f32 1e-05, %v2400_v9 }
 0x3cd   :  { %v2393_v10 = vpop.xlane.xlu1 %2392 }
 0x3ce   :  { %3036 = vrsqrt.f32 %v2404_v53  ;;  %v2401_v12 = vmul.f32 0.03125, %v2393_v10 }
 0x3d0   :  { %v2405_v13 = vadd.f32 1e-05, %v2401_v12 }
 0x3d1   :  { %v2396_v18 = vpop.xlane.xlu0 %2395 }
 0x3d2   :  { %3038 = vrsqrt.f32 %v2405_v13  ;;  %v2402_v45 = vmul.f32 0.03125, %v2396_v18 }
 0x3d4   :  { %v2406_v16 = vadd.f32 1e-05, %v2402_v45 }
 0x3d5   :  { %v2399_v63 = vpop.xlane.xlu1 %2398 }
 0x3d6   :  { %3040 = vrsqrt.f32 %v2406_v16  ;;  %v2403_v4 = vmul.f32 0.03125, %v2399_v63 }
 0x3d8   :  { %v3037_v42 = vpop.eup %3036  ;;  %v2407_v21 = vadd.f32 1e-05, %v2403_v4 }
 0x3d9   :  { %v2412_v20 = vmul.f32 %v3037_v42, %v2380_v36 }
 0x3da   :  { %3042 = vrsqrt.f32 %v2407_v21 }
 0x3db   :  { %v2423_v23 = vmul.f32 %v2658_v49, %v2412_v20 }
 0x3dc   :  { %v3039_v19 = vpop.eup %3038 }
 0x3dd   :  { %v2413_v3 = vmul.f32 %v3039_v19, %v2381_v47  ;;  %v2434_v25 = vadd.f32 %v2659_v22, %v2423_v23 }
 0x3df   :  { %v2424_v24 = vmul.f32 %v2658_v49, %v2413_v3  ;;  %v2664_v7 = vpack.c.bf16 %v2434_v25, %v2434_v25 }
 0x3e0   :  { %v3041_v27 = vpop.eup %3040 }
 0x3e1   :  { %v2414_v0 = vmul.f32 %v3041_v27, %v2382_v61  ;;  %v2435_v43 = vadd.f32 %v2659_v22, %v2424_v24  ;;  %2455 = vst.msk [vmem:[#allocation14] sm:$0xf] %vm2454_vm1, %v2664_v7 }
 0x3e3   :  { %v2425_v28 = vmul.f32 %v2658_v49, %v2414_v0  ;;  %v2665_v31 = vpack.c.bf16 %v2435_v43, %v2435_v43 }
 0x3e4   :  { %v3043_v29 = vpop.eup %3042 }
 0x3e5   :  { %v2415_v11 = vmul.f32 %v3043_v29, %v2383_v5  ;;  %v2436_v30 = vadd.f32 %v2659_v22, %v2425_v28  ;;  %2456 = vst.msk [vmem:[#allocation14 + $0x4] sm:$0xf] %vm2454_vm1, %v2665_v31 }
 0x3e7   :  { %v2426_v33 = vmul.f32 %v2658_v49, %v2415_v11  ;;  %v2666_v46 = vpack.c.bf16 %v2436_v30, %v2436_v30 }
 0x3e9   :  { %v2437_v34 = vadd.f32 %v2659_v22, %v2426_v33  ;;  %2457 = vst.msk [vmem:[#allocation14 + $0x8] sm:$0xf] %vm2454_vm1, %v2666_v46 }
 0x3eb   :  { %v2667_v14 = vpack.c.bf16 %v2437_v34, %v2437_v34 }
 0x3ed   :  { %2458 = vst.msk [vmem:[#allocation14 + $0xc] sm:$0xf] %vm2454_vm1, %v2667_v14 }
 0x3ee   :  { %3211 = shalt.err (!%p3208_p4)
}
 0x3ef   :  { %s3212_s20 = scalar_lea.hbm %s3667_s7, 256 }
 0x3f0   :  { %p3213_p5 = scmp.ne.s32.totalorder %s3667_s7, %s3212_s20  ;;  %p3216_p6 = scmp.lt.u32.totalorder %s3212_s20, %s3667_s7 }
 0x3f2   :  { %p3218_p7 = pnand %p3216_p6, %p3213_p5 }
 0x3f4   :  { %3221 = shalt.err (!%p3218_p7)
}
 0x3f5   :  { %2470 = dma.vmem_to_hbm [thread:$0]  %s2465_s3, 256, %s3667_s7, [#allocation4], %s3234_s12, %s3234_s12, %s3237_s25  }
 0x3f6   :  { %3230 = dma.done.wait [#allocation4], 256  }
 0x3f7   :  { %3231 = vsyncadd [#allocation4], 4294967040 }
 0x3f8   :  { %2474 = vsyncpa [#allocation3], 1 }
 0x3f9   :  { %2475 = vsyncpa [#allocation6], 1 }
 0x3fa   :  { %2476 = vsyncpa [#allocation9], 1 }
 0x3fb   :  { %2477 = vsyncpa [#allocation12], 1 }
 0x3fc   :  { %2478 = vsyncpa [#allocation4], 1 }

</bundles_post_ra>
